<compile_context>
chip_gen: v7x
topology: tpu7x:2x2x1
jax: 0.10.0
libtpu: 0.0.40
codegen_flags: <defaults>
</compile_context>

<pallas_src>
import jax
import jax.numpy as jnp
from jax import lax
from jax.experimental import pallas as pl
from jax.experimental.pallas import tpu as pltpu


def _round_up(x, m):
    return ((x + m - 1) // m) * m


def _pick_tile(n, target):
    """Largest multiple of 128 that divides n and is <= target; else n itself."""
    if n < 128:
        return n
    best = n
    t = 128
    while t <= min(n, target):
        if n % t == 0:
            best = t
        t += 128
    return best


def _nonlocal_flash_kernel(xq_ref, xkv_ref, wq_ref, bq_ref, wk_ref, bk_ref,
                           wv_ref, bv_ref, gamma_ref,
                           o_ref,
                           q_sc, m_sc, l_sc, acc_sc):
    kv = pl.program_id(2)

    @pl.when(kv == 0)
    def _init():
        # Project the query tile once per (b, q_tile); cache it in bf16 scratch.
        xq = xq_ref[0].astype(jnp.bfloat16)                                   # (TQ, Cp)
        q = jnp.dot(xq, wq_ref[...], preferred_element_type=jnp.float32) + bq_ref[...]
        q_sc[...] = q.astype(jnp.bfloat16)                                    # (TQ, C8p)
        m_sc[...] = jnp.full_like(m_sc, -jnp.inf)
        l_sc[...] = jnp.zeros_like(l_sc)
        acc_sc[...] = jnp.zeros_like(acc_sc)

    # Project the current KV tile (bf16 operands, f32 accumulation).
    xkv = xkv_ref[0]                                                          # (TK, Cp) bf16
    k = jnp.dot(xkv, wk_ref[...], preferred_element_type=jnp.float32) + bk_ref[...]   # (TK, C8p)
    v = jnp.dot(xkv, wv_ref[...], preferred_element_type=jnp.float32) + bv_ref[...]   # (TK, Cp)

    # energy tile = q @ k^T — contract last dims directly, no XLU transpose.
    s = lax.dot_general(q_sc[...], k.astype(jnp.bfloat16),
                        dimension_numbers=(((1,), (1,)), ((), ())),
                        preferred_element_type=jnp.float32)                   # (TQ, TK)

    # Online softmax (f32 statistics), un-normalized accumulation.
    m_prev = m_sc[...]
    m_new = jnp.maximum(m_prev, jnp.max(s, axis=-1, keepdims=True))           # (TQ, 1)
    alpha = jnp.exp(m_prev - m_new)
    p = jnp.exp(s - m_new)                                                    # (TQ, TK)
    l_sc[...] = alpha * l_sc[...] + jnp.sum(p, axis=-1, keepdims=True)
    acc_sc[...] = alpha * acc_sc[...] + jnp.dot(
        p.astype(jnp.bfloat16), v.astype(jnp.bfloat16),
        preferred_element_type=jnp.float32)                                   # (TQ, Cp)
    m_sc[...] = m_new

    @pl.when(kv == pl.num_programs(2) - 1)
    def _finalize():
        # Deferred normalization on the (TQ, Cp) result; residual add in f32.
        inv_l = pl.reciprocal(l_sc[...], approx=True)
        out = acc_sc[...] * inv_l
        o_ref[0] = gamma_ref[0] * out + xq_ref[0]


def nonlocal_block(x_nchw, params, *, tq_target=256, tk_target=512):
    """x_nchw: (B, C, W, H) float32. Returns (B, C, W, H) float32."""
    B, C, W, H = x_nchw.shape
    N = W * H
    C8 = max(C // 8, 1)

    Cp = _round_up(C, 128)     # lane-dense channel dim
    C8p = _round_up(C8, 128)   # lane-dense reduced channel dim

    # Glue: NCHW -> (B, N, C) with channels on the lane dim, zero-padded to Cp.
    x_bnc = jnp.transpose(x_nchw.reshape(B, C, N), (0, 2, 1)).astype(jnp.float32)
    x_bnc = jnp.pad(x_bnc, ((0, 0), (0, 0), (0, Cp - C)))
    x_kv = x_bnc.astype(jnp.bfloat16)   # bf16 copy streamed for the K/V tiles

    # Pre-transposed, zero-padded weights: (C_in_pad, C_out_pad), bf16.
    def pad_w(w, cout_p):                                 # w: (C_out, C_in)
        wT = jnp.transpose(w).astype(jnp.float32)         # (C_in, C_out)
        wT = jnp.pad(wT, ((0, Cp - wT.shape[0]), (0, cout_p - wT.shape[1])))
        return wT.astype(jnp.bfloat16)

    def pad_b(b, cout_p):                                 # b: (1, C_out), stays f32
        return jnp.pad(b.astype(jnp.float32), ((0, 0), (0, cout_p - b.shape[1])))

    wq = pad_w(params["wq"], C8p); bq = pad_b(params["bq"], C8p)
    wk = pad_w(params["wk"], C8p); bk = pad_b(params["bk"], C8p)
    wv = pad_w(params["wv"], Cp);  bv = pad_b(params["bv"], Cp)
    gamma = params["gamma"].reshape(1).astype(jnp.float32)   # SMEM scalar

    TQ = _pick_tile(N, tq_target)
    TK = _pick_tile(N, tk_target)
    grid = (B, N // TQ, N // TK)

    out_bnc = pl.pallas_call(
        _nonlocal_flash_kernel,
        out_shape=jax.ShapeDtypeStruct((B, N, Cp), jnp.float32),
        grid=grid,
        in_specs=[
            pl.BlockSpec((1, TQ, Cp), lambda b, qi, ki: (b, qi, 0)),   # x  (query tile, f32)
            pl.BlockSpec((1, TK, Cp), lambda b, qi, ki: (b, ki, 0)),   # x  (kv tile, bf16)
            pl.BlockSpec((Cp, C8p), lambda b, qi, ki: (0, 0)),         # wq (C_in, C_out)
            pl.BlockSpec((1, C8p), lambda b, qi, ki: (0, 0)),          # bq
            pl.BlockSpec((Cp, C8p), lambda b, qi, ki: (0, 0)),         # wk
            pl.BlockSpec((1, C8p), lambda b, qi, ki: (0, 0)),          # bk
            pl.BlockSpec((Cp, Cp), lambda b, qi, ki: (0, 0)),          # wv
            pl.BlockSpec((1, Cp), lambda b, qi, ki: (0, 0)),           # bv
            pl.BlockSpec(memory_space=pltpu.MemorySpace.SMEM),         # gamma scalar
        ],
        out_specs=pl.BlockSpec((1, TQ, Cp), lambda b, qi, ki: (b, qi, 0)),
        scratch_shapes=[
            pltpu.VMEM((TQ, C8p), jnp.bfloat16),   # cached projected q tile
            pltpu.VMEM((TQ, 1), jnp.float32),      # running max
            pltpu.VMEM((TQ, 1), jnp.float32),      # running sum
            pltpu.VMEM((TQ, Cp), jnp.float32),     # output accumulator
        ],
        compiler_params=pltpu.CompilerParams(
            dimension_semantics=("parallel", "parallel", "arbitrary"),
            vmem_limit_bytes=32 * 1024 * 1024),
    )(x_bnc, x_kv, wq, bq, wk, bk, wv, bv, gamma)

    # Glue: (B, N, Cp) -> NCHW, dropping the channel padding.
    # TODO(synk): for 128-aligned N a (B, C, N)-native layout would drop these
    # wrapper transposes entirely (extra full-tensor HBM passes).
    return jnp.transpose(out_bnc[:, :, :C], (0, 2, 1)).reshape(B, C, W, H)


def nonlocal_block_reference(x_nchw, params):
    """Pure-JAX f32 reference mirroring the PyTorch forward exactly."""
    B, C, W, H = x_nchw.shape
    N = W * H
    x_flat = x_nchw.reshape(B, C, N)
    wq, bq = params["wq"], params["bq"]
    wk, bk = params["wk"], params["bk"]
    wv, bv = params["wv"], params["bv"]
    gamma = params["gamma"][0, 0]

    q = jnp.einsum("oc,bcn->bon", wq, x_flat) + bq.reshape(1, -1, 1)     # (B, C8, N)
    k = jnp.einsum("oc,bcn->bon", wk, x_flat) + bk.reshape(1, -1, 1)     # (B, C8, N)
    v = jnp.einsum("oc,bcn->bon", wv, x_flat) + bv.reshape(1, -1, 1)     # (B, C, N)

    energy = jnp.einsum("bci,bcj->bij", q, k)                            # (B, N, N)
    attention = jax.nn.softmax(energy, axis=-1)
    out = jnp.einsum("bcj,bij->bci", v, attention)                       # (B, C, N)
    out = out.reshape(B, C, W, H)
    return gamma * out + x_nchw


def make_params(key, C):
    """Deterministic parameter init (shapes from NonlocalBlock.__init__)."""
    C8 = C // 8
    ks = jax.random.split(key, 6)
    params = {
        # Conv2d(C, C//8, 1).weight is (C//8, C, 1, 1) -> stored as (C//8, C)
        "wq": jax.random.normal(ks[0], (C8, C), jnp.float32) * 0.1,
        "bq": jax.random.normal(ks[1], (1, C8), jnp.float32) * 0.1,
        "wk": jax.random.normal(ks[2], (C8, C), jnp.float32) * 0.1,
        "bk": jax.random.normal(ks[3], (1, C8), jnp.float32) * 0.1,
        "wv": jax.random.normal(ks[4], (C, C), jnp.float32) * 0.1,
        "bv": jax.random.normal(ks[5], (1, C), jnp.float32) * 0.1,
        # PyTorch inits gamma to 0 (output == input); use 0.5 so the
        # attention path is actually exercised / checked.
        "gamma": jnp.full((1, 1), 0.5, jnp.float32),
    }
    return params


if __name__ == "__main__":
    B, C, W, H = 2, 32, 16, 16   # C divisible by 8; N = 256 (128-aligned)
    key = jax.random.PRNGKey(0)
    kx, kp = jax.random.split(key)

    x = jax.random.normal(kx, (B, C, W, H), jnp.float32)
    params = make_params(kp, C)

    out = nonlocal_block(x, params)
    out = jax.block_until_ready(out)

    ref = nonlocal_block_reference(x, params)
    assert out.shape == (B, C, W, H)
    # bf16 MXU operands (f32 accumulation / f32 softmax stats) -> looser
    # tolerance than the pure-f32 reference.
    assert jnp.allclose(out, ref, atol=5e-2, rtol=5e-2), "mismatch vs reference"

    print("KERNEL_OK")
</pallas_src>

<mosaic_0001>
module attributes {stable_mosaic.version = 11 : i64} {
  func.func @_nonlocal_flash_kernel(%arg0: i32, %arg1: i32, %arg2: i32, %arg3: memref<1x256x128xf32, #tpu.memory_space<vmem>>, %arg4: memref<1x256x128xbf16, #tpu.memory_space<vmem>>, %arg5: memref<128x128xbf16, #tpu.memory_space<vmem>>, %arg6: memref<1x128xf32, #tpu.memory_space<vmem>>, %arg7: memref<128x128xbf16, #tpu.memory_space<vmem>>, %arg8: memref<1x128xf32, #tpu.memory_space<vmem>>, %arg9: memref<128x128xbf16, #tpu.memory_space<vmem>>, %arg10: memref<1x128xf32, #tpu.memory_space<vmem>>, %arg11: memref<1xf32, #tpu.memory_space<smem>>, %arg12: memref<1x256x128xf32, #tpu.memory_space<vmem>>, %arg13: memref<256x128xbf16, #tpu.memory_space<vmem>>, %arg14: memref<256x1xf32, #tpu.memory_space<vmem>>, %arg15: memref<256x1xf32, #tpu.memory_space<vmem>>, %arg16: memref<256x128xf32, #tpu.memory_space<vmem>>) attributes {dimension_semantics = [#tpu.dimension_semantics<parallel>, #tpu.dimension_semantics<parallel>, #tpu.dimension_semantics<arbitrary>], iteration_bounds = array<i64: 2, 1, 1>, scalar_prefetch = 0 : i64, scratch_operands = 4 : i64, tpu.core_type = #tpu.core_type<tc>, window_params = [{transform_indices = @transform_0, window_bounds = array<i64: 1, 256, 128>}, {transform_indices = @transform_1, window_bounds = array<i64: 1, 256, 128>}, {pipeline_mode = #tpu.pipeline_mode<synchronous>, transform_indices = @transform_2, window_bounds = array<i64: 128, 128>}, {pipeline_mode = #tpu.pipeline_mode<synchronous>, transform_indices = @transform_3, window_bounds = array<i64: 1, 128>}, {pipeline_mode = #tpu.pipeline_mode<synchronous>, transform_indices = @transform_4, window_bounds = array<i64: 128, 128>}, {pipeline_mode = #tpu.pipeline_mode<synchronous>, transform_indices = @transform_5, window_bounds = array<i64: 1, 128>}, {pipeline_mode = #tpu.pipeline_mode<synchronous>, transform_indices = @transform_6, window_bounds = array<i64: 128, 128>}, {pipeline_mode = #tpu.pipeline_mode<synchronous>, transform_indices = @transform_7, window_bounds = array<i64: 1, 128>}, {transform_indices = @transform_8, window_bounds = array<i64: 1>}, {transform_indices = @transform_9, window_bounds = array<i64: 1, 256, 128>}]} {
    %c0_i32 = arith.constant 0 : i32
    %0 = arith.cmpi eq, %arg2, %c0_i32 : i32
    %1 = arith.extui %0 : i1 to i32
    %c0_i32_0 = arith.constant 0 : i32
    %2 = arith.cmpi ne, %1, %c0_i32_0 : i32
    scf.if %2 {
      %c0_32 = arith.constant 0 : index
      %c0_33 = arith.constant 0 : index
      %c0_34 = arith.constant 0 : index
      %45 = vector.load %arg3[%c0_32, %c0_33, %c0_34] : memref<1x256x128xf32, #tpu.memory_space<vmem>>, vector<1x256x128xf32>
      %46 = vector.shape_cast %45 : vector<1x256x128xf32> to vector<256x128xf32>
      %47 = arith.truncf %46 : vector<256x128xf32> to vector<256x128xbf16>
      %c0_35 = arith.constant 0 : index
      %c0_36 = arith.constant 0 : index
      %48 = vector.load %arg5[%c0_35, %c0_36] : memref<128x128xbf16, #tpu.memory_space<vmem>>, vector<128x128xbf16>
      %cst_37 = arith.constant dense<0.000000e+00> : vector<256x128xf32>
      %49 = tpu.matmul %47, %48, %cst_37 {dimension_numbers = #tpu.dot_dimension_numbers<[1], [0], [0], [1], [0, 0, 1, 1], [], []>} : vector<256x128xbf16>, vector<128x128xbf16>, vector<256x128xf32> -> vector<256x128xf32>
      %c0_38 = arith.constant 0 : index
      %c0_39 = arith.constant 0 : index
      %50 = vector.load %arg6[%c0_38, %c0_39] : memref<1x128xf32, #tpu.memory_space<vmem>>, vector<1x128xf32>
      %51 = vector.broadcast %50 : vector<1x128xf32> to vector<256x128xf32>
      %52 = arith.addf %49, %51 : vector<256x128xf32>
      %53 = arith.truncf %52 : vector<256x128xf32> to vector<256x128xbf16>
      %c0_40 = arith.constant 0 : index
      %c0_41 = arith.constant 0 : index
      %54 = vector.load %arg13[%c0_40, %c0_41] : memref<256x128xbf16, #tpu.memory_space<vmem>>, vector<256x128xbf16>
      tpu.vector_store %arg13[%c0_40, %c0_41], %53 {strides = array<i32>} : memref<256x128xbf16, #tpu.memory_space<vmem>>, vector<256x128xbf16>,
      %cst_42 = arith.constant 0xFF800000 : f32
      %55 = vector.broadcast %cst_42 : f32 to vector<256x1xf32>
      %c0_43 = arith.constant 0 : index
      %c0_44 = arith.constant 0 : index
      %56 = vector.load %arg14[%c0_43, %c0_44] : memref<256x1xf32, #tpu.memory_space<vmem>>, vector<256x1xf32>
      tpu.vector_store %arg14[%c0_43, %c0_44], %55 {strides = array<i32>} : memref<256x1xf32, #tpu.memory_space<vmem>>, vector<256x1xf32>,
      %cst_45 = arith.constant 0.000000e+00 : f32
      %57 = vector.broadcast %cst_45 : f32 to vector<256x1xf32>
      %c0_46 = arith.constant 0 : index
      %c0_47 = arith.constant 0 : index
      %58 = vector.load %arg15[%c0_46, %c0_47] : memref<256x1xf32, #tpu.memory_space<vmem>>, vector<256x1xf32>
      tpu.vector_store %arg15[%c0_46, %c0_47], %57 {strides = array<i32>} : memref<256x1xf32, #tpu.memory_space<vmem>>, vector<256x1xf32>,
      %cst_48 = arith.constant 0.000000e+00 : f32
      %59 = vector.broadcast %cst_48 : f32 to vector<256x128xf32>
      %c0_49 = arith.constant 0 : index
      %c0_50 = arith.constant 0 : index
      %60 = vector.load %arg16[%c0_49, %c0_50] : memref<256x128xf32, #tpu.memory_space<vmem>>, vector<256x128xf32>
      tpu.vector_store %arg16[%c0_49, %c0_50], %59 {strides = array<i32>} : memref<256x128xf32, #tpu.memory_space<vmem>>, vector<256x128xf32>,
    } else {
    }
    %c0 = arith.constant 0 : index
    %c0_1 = arith.constant 0 : index
    %c0_2 = arith.constant 0 : index
    %3 = vector.load %arg4[%c0, %c0_1, %c0_2] : memref<1x256x128xbf16, #tpu.memory_space<vmem>>, vector<1x256x128xbf16>
    %4 = vector.shape_cast %3 : vector<1x256x128xbf16> to vector<256x128xbf16>
    %c0_3 = arith.constant 0 : index
    %c0_4 = arith.constant 0 : index
    %5 = vector.load %arg7[%c0_3, %c0_4] : memref<128x128xbf16, #tpu.memory_space<vmem>>, vector<128x128xbf16>
    %cst = arith.constant dense<0.000000e+00> : vector<256x128xf32>
    %6 = tpu.matmul %4, %5, %cst {dimension_numbers = #tpu.dot_dimension_numbers<[1], [0], [0], [1], [0, 0, 1, 1], [], []>} : vector<256x128xbf16>, vector<128x128xbf16>, vector<256x128xf32> -> vector<256x128xf32>
    %c0_5 = arith.constant 0 : index
    %c0_6 = arith.constant 0 : index
    %7 = vector.load %arg8[%c0_5, %c0_6] : memref<1x128xf32, #tpu.memory_space<vmem>>, vector<1x128xf32>
    %8 = vector.broadcast %7 : vector<1x128xf32> to vector<256x128xf32>
    %9 = arith.addf %6, %8 : vector<256x128xf32>
    %c0_7 = arith.constant 0 : index
    %c0_8 = arith.constant 0 : index
    %10 = vector.load %arg9[%c0_7, %c0_8] : memref<128x128xbf16, #tpu.memory_space<vmem>>, vector<128x128xbf16>
    %cst_9 = arith.constant dense<0.000000e+00> : vector<256x128xf32>
    %11 = tpu.matmul %4, %10, %cst_9 {dimension_numbers = #tpu.dot_dimension_numbers<[1], [0], [0], [1], [0, 0, 1, 1], [], []>} : vector<256x128xbf16>, vector<128x128xbf16>, vector<256x128xf32> -> vector<256x128xf32>
    %c0_10 = arith.constant 0 : index
    %c0_11 = arith.constant 0 : index
    %12 = vector.load %arg10[%c0_10, %c0_11] : memref<1x128xf32, #tpu.memory_space<vmem>>, vector<1x128xf32>
    %13 = vector.broadcast %12 : vector<1x128xf32> to vector<256x128xf32>
    %14 = arith.addf %11, %13 : vector<256x128xf32>
    %c0_12 = arith.constant 0 : index
    %c0_13 = arith.constant 0 : index
    %15 = vector.load %arg13[%c0_12, %c0_13] : memref<256x128xbf16, #tpu.memory_space<vmem>>, vector<256x128xbf16>
    %16 = arith.truncf %9 : vector<256x128xf32> to vector<256x128xbf16>
    %cst_14 = arith.constant dense<0.000000e+00> : vector<256x256xf32>
    %17 = tpu.matmul %15, %16, %cst_14 {dimension_numbers = #tpu.dot_dimension_numbers<[1], [1], [0], [0], [0, 0, 1, 0], [], []>} : vector<256x128xbf16>, vector<256x128xbf16>, vector<256x256xf32> -> vector<256x256xf32>
    %c0_15 = arith.constant 0 : index
    %c0_16 = arith.constant 0 : index
    %18 = vector.load %arg14[%c0_15, %c0_16] : memref<256x1xf32, #tpu.memory_space<vmem>>, vector<256x1xf32>
    %cst_17 = arith.constant dense<0xFF800000> : vector<256xf32>
    %19 = vector.multi_reduction <maximumf>, %17, %cst_17 [1] : vector<256x256xf32> to vector<256xf32>
    %20 = vector.shape_cast %19 : vector<256xf32> to vector<256x1xf32>
    %21 = arith.maximumf %18, %20 : vector<256x1xf32>
    %22 = arith.subf %18, %21 : vector<256x1xf32>
    %23 = math.exp %22 : vector<256x1xf32>
    %24 = vector.broadcast %21 : vector<256x1xf32> to vector<256x256xf32>
    %25 = arith.subf %17, %24 : vector<256x256xf32>
    %26 = math.exp %25 : vector<256x256xf32>
    %c0_18 = arith.constant 0 : index
    %c0_19 = arith.constant 0 : index
    %27 = vector.load %arg15[%c0_18, %c0_19] : memref<256x1xf32, #tpu.memory_space<vmem>>, vector<256x1xf32>
    %28 = arith.mulf %23, %27 : vector<256x1xf32>
    %cst_20 = arith.constant dense<0.000000e+00> : vector<256xf32>
    %29 = vector.multi_reduction <add>, %26, %cst_20 [1] : vector<256x256xf32> to vector<256xf32>
    %30 = vector.shape_cast %29 : vector<256xf32> to vector<256x1xf32>
    %31 = arith.addf %28, %30 : vector<256x1xf32>
    %c0_21 = arith.constant 0 : index
    %c0_22 = arith.constant 0 : index
    %32 = vector.load %arg15[%c0_21, %c0_22] : memref<256x1xf32, #tpu.memory_space<vmem>>, vector<256x1xf32>
    tpu.vector_store %arg15[%c0_21, %c0_22], %31 {strides = array<i32>} : memref<256x1xf32, #tpu.memory_space<vmem>>, vector<256x1xf32>,
    %c0_23 = arith.constant 0 : index
    %c0_24 = arith.constant 0 : index
    %33 = vector.load %arg16[%c0_23, %c0_24] : memref<256x128xf32, #tpu.memory_space<vmem>>, vector<256x128xf32>
    %34 = vector.broadcast %23 : vector<256x1xf32> to vector<256x128xf32>
    %35 = arith.mulf %34, %33 : vector<256x128xf32>
    %36 = arith.truncf %26 : vector<256x256xf32> to vector<256x256xbf16>
    %37 = arith.truncf %14 : vector<256x128xf32> to vector<256x128xbf16>
    %cst_25 = arith.constant dense<0.000000e+00> : vector<256x128xf32>
    %38 = tpu.matmul %36, %37, %cst_25 {dimension_numbers = #tpu.dot_dimension_numbers<[1], [0], [0], [1], [0, 0, 1, 1], [], []>} : vector<256x256xbf16>, vector<256x128xbf16>, vector<256x128xf32> -> vector<256x128xf32>
    %39 = arith.addf %35, %38 : vector<256x128xf32>
    %c0_26 = arith.constant 0 : index
    %c0_27 = arith.constant 0 : index
    %40 = vector.load %arg16[%c0_26, %c0_27] : memref<256x128xf32, #tpu.memory_space<vmem>>, vector<256x128xf32>
    tpu.vector_store %arg16[%c0_26, %c0_27], %39 {strides = array<i32>} : memref<256x128xf32, #tpu.memory_space<vmem>>, vector<256x128xf32>,
    %c0_28 = arith.constant 0 : index
    %c0_29 = arith.constant 0 : index
    %41 = vector.load %arg14[%c0_28, %c0_29] : memref<256x1xf32, #tpu.memory_space<vmem>>, vector<256x1xf32>
    tpu.vector_store %arg14[%c0_28, %c0_29], %21 {strides = array<i32>} : memref<256x1xf32, #tpu.memory_space<vmem>>, vector<256x1xf32>,
    %c0_i32_30 = arith.constant 0 : i32
    %42 = arith.cmpi eq, %arg2, %c0_i32_30 : i32
    %43 = arith.extui %42 : i1 to i32
    %c0_i32_31 = arith.constant 0 : i32
    %44 = arith.cmpi ne, %43, %c0_i32_31 : i32
    scf.if %44 {
      %c0_32 = arith.constant 0 : index
      %c0_33 = arith.constant 0 : index
      %45 = vector.load %arg15[%c0_32, %c0_33] : memref<256x1xf32, #tpu.memory_space<vmem>>, vector<256x1xf32>
      %46 = tpu.reciprocal %45 {approx = true} : vector<256x1xf32> -> vector<256x1xf32>
      %c0_34 = arith.constant 0 : index
      %c0_35 = arith.constant 0 : index
      %47 = vector.load %arg16[%c0_34, %c0_35] : memref<256x128xf32, #tpu.memory_space<vmem>>, vector<256x128xf32>
      %48 = vector.broadcast %46 : vector<256x1xf32> to vector<256x128xf32>
      %49 = arith.mulf %47, %48 : vector<256x128xf32>
      %c0_36 = arith.constant 0 : index
      %50 = memref.load %arg11[%c0_36] : memref<1xf32, #tpu.memory_space<smem>>
      %51 = vector.broadcast %50 : f32 to vector<256x128xf32>
      %52 = arith.mulf %51, %49 : vector<256x128xf32>
      %c0_37 = arith.constant 0 : index
      %c0_38 = arith.constant 0 : index
      %c0_39 = arith.constant 0 : index
      %53 = vector.load %arg3[%c0_37, %c0_38, %c0_39] : memref<1x256x128xf32, #tpu.memory_space<vmem>>, vector<1x256x128xf32>
      %54 = vector.shape_cast %53 : vector<1x256x128xf32> to vector<256x128xf32>
      %55 = arith.addf %52, %54 : vector<256x128xf32>
      %c0_40 = arith.constant 0 : index
      %c0_41 = arith.constant 0 : index
      %c0_42 = arith.constant 0 : index
      %56 = vector.load %arg12[%c0_40, %c0_41, %c0_42] : memref<1x256x128xf32, #tpu.memory_space<vmem>>, vector<1x256x128xf32>
      %57 = vector.shape_cast %56 : vector<1x256x128xf32> to vector<256x128xf32>
      %58 = vector.shape_cast %55 : vector<256x128xf32> to vector<1x256x128xf32>
      tpu.vector_store %arg12[%c0_40, %c0_41, %c0_42], %58 {strides = array<i32>} : memref<1x256x128xf32, #tpu.memory_space<vmem>>, vector<1x256x128xf32>,
    } else {
    }
    return
  }
  func.func @transform_0(%arg0: i32, %arg1: i32, %arg2: i32) -> (i32, i32, i32) {
    %c0_i32 = arith.constant 0 : i32
    %c0_i32_0 = arith.constant 0 : i32
    return %arg0, %arg1, %c0_i32 : i32, i32, i32
  }
  func.func @transform_1(%arg0: i32, %arg1: i32, %arg2: i32) -> (i32, i32, i32) {
    %c0_i32 = arith.constant 0 : i32
    %c0_i32_0 = arith.constant 0 : i32
    return %arg0, %arg2, %c0_i32 : i32, i32, i32
  }
  func.func @transform_2(%arg0: i32, %arg1: i32, %arg2: i32) -> (i32, i32) {
    %c0_i32 = arith.constant 0 : i32
    %c0_i32_0 = arith.constant 0 : i32
    %c0_i32_1 = arith.constant 0 : i32
    return %c0_i32, %c0_i32_0 : i32, i32
  }
  func.func @transform_3(%arg0: i32, %arg1: i32, %arg2: i32) -> (i32, i32) {
    %c0_i32 = arith.constant 0 : i32
    %c0_i32_0 = arith.constant 0 : i32
    %c0_i32_1 = arith.constant 0 : i32
    return %c0_i32, %c0_i32_0 : i32, i32
  }
  func.func @transform_4(%arg0: i32, %arg1: i32, %arg2: i32) -> (i32, i32) {
    %c0_i32 = arith.constant 0 : i32
    %c0_i32_0 = arith.constant 0 : i32
    %c0_i32_1 = arith.constant 0 : i32
    return %c0_i32, %c0_i32_0 : i32, i32
  }
  func.func @transform_5(%arg0: i32, %arg1: i32, %arg2: i32) -> (i32, i32) {
    %c0_i32 = arith.constant 0 : i32
    %c0_i32_0 = arith.constant 0 : i32
    %c0_i32_1 = arith.constant 0 : i32
    return %c0_i32, %c0_i32_0 : i32, i32
  }
  func.func @transform_6(%arg0: i32, %arg1: i32, %arg2: i32) -> (i32, i32) {
    %c0_i32 = arith.constant 0 : i32
    %c0_i32_0 = arith.constant 0 : i32
    %c0_i32_1 = arith.constant 0 : i32
    return %c0_i32, %c0_i32_0 : i32, i32
  }
  func.func @transform_7(%arg0: i32, %arg1: i32, %arg2: i32) -> (i32, i32) {
    %c0_i32 = arith.constant 0 : i32
    %c0_i32_0 = arith.constant 0 : i32
    %c0_i32_1 = arith.constant 0 : i32
    return %c0_i32, %c0_i32_0 : i32, i32
  }
  func.func @transform_8(%arg0: i32, %arg1: i32, %arg2: i32) -> i32 {
    %c0_i32 = arith.constant 0 : i32
    %c0_i32_0 = arith.constant 0 : i32
    return %c0_i32 : i32
  }
  func.func @transform_9(%arg0: i32, %arg1: i32, %arg2: i32) -> (i32, i32, i32) {
    %c0_i32 = arith.constant 0 : i32
    %c0_i32_0 = arith.constant 0 : i32
    return %arg0, %arg1, %c0_i32 : i32, i32, i32
  }
}

</mosaic_0001>

<bundles_post_ra>
// kernel: tpu_custom_call.1
= control target key start
LH: loop header
LB: loop body
LE: loop exit
PB: predicated region body
PF: predicated region fallthrough
CT: control target
= control target key end

     0   :  { %s6764_s0 = inlined_call_operand.hbm [shape: f32[2,256,128], index: 0, kind: input, shape index: {}]   ;;  %s6765_s1 = inlined_call_operand.hbm [shape: bf16[2,256,128], index: 1, kind: input, shape index: {}]   ;;  %s6766_s2 = inlined_call_operand.hbm [shape: bf16[128,128], index: 2, kind: input, shape index: {}]   ;;  %s6767_s3 = inlined_call_operand.vmem [shape: f32[1,128], index: 3, kind: input, shape index: {}]   ;;  %s6768_s4 = inlined_call_operand.hbm [shape: bf16[128,128], index: 4, kind: input, shape index: {}]   ;;  %s6769_s5 = inlined_call_operand.vmem [shape: f32[1,128], index: 5, kind: input, shape index: {}]   ;;  %s6770_s6 = inlined_call_operand.hbm [shape: bf16[128,128], index: 6, kind: input, shape index: {}]   ;;  %s6771_s7 = inlined_call_operand.vmem [shape: f32[1,128], index: 7, kind: input, shape index: {}]   ;;  %s6772_s8 = inlined_call_operand.<no memory space> [shape: f32[1], index: 8, kind: input, shape index: {}]   ;;  %s6773_s9 = inlined_call_operand.hbm [shape: f32[2,256,128], index: 9, kind: output, shape index: {}]  }
   0x1   :  { %6855 = sst [smem:[#allocation91_spill]] %s6764_s0 }
   0x2   :  { %6856 = sst [smem:[#allocation92_spill]] %s6766_s2 }
   0x3   :  { %6857 = sst [smem:[#allocation93_spill]] %s6768_s4 }
   0x4   :  { %6858 = sst [smem:[#allocation94_spill]] %s6770_s6 }
   0x5   :  { %6859 = sst [smem:[#allocation95_spill]] %s6773_s9 }
   0x6   :  { %14 = sst [smem:[#allocation6]] %s6772_s8 }
   0x7   :  { %15 = vsyncpa [#allocation8], 0 }
   0x8   :  { %17 = vsyncpa [#allocation8 + $0x1], 0 }
   0x9   :  { %18 = vsyncpa [#allocation11], 0 }
   0xa   :  { %20 = vsyncpa [#allocation11 + $0x1], 0 }
   0xb   :  { %21 = vsyncpa [#allocation14], 0 }
   0xc   :  { %22 = vsyncpa [#allocation9], 0 }
   0xd   :  { %24 = vsyncpa [#allocation9 + $0x1], 0  ;;  %s4817_s11 = smov 0   ;;  %s4819_s12 = smov 0  }
   0xe   :  { %s4821_s13 = smov 0   ;;  %s4823_s14 = smov 0  }
   0xf   :  { %s4825_s15 = smov 0   ;;  %s4827_s16 = smov 0  }
  0x10 LB: > { %6860 = sst [smem:[#allocation22_spill]] %s4727_s11  ;;  %s4848_s8 = sadd.s32 4294967295, %s4747_s16   ;;  %s4747_s16 = sphi %s4827_s16, %s30_s16   ;;  %s4743_s15 = sphi %s4825_s15, %s7086_s15   ;;  %s4739_s14 = sphi %s4823_s14, %s7085_s14   ;;  %s4735_s13 = sphi %s4821_s13, %s7084_s13   ;;  %s4731_s12 = sphi %s4819_s12, %s7083_s12   ;;  %s4727_s11 = sphi %s4817_s11, %s7082_s11  }
  0x11   : > { %6861 = sst [smem:[#allocation23_spill]] %s4739_s14  ;;  %s3642_s17 = sadd.s32 4294967294, %s4747_s16  }
  0x12   : > { %p71_p0 = scmp.ne.s32.totalorder %s4731_s12, %s4727_s11  ;;  %p6774_p1 = scmp.eq.s32.totalorder %s4848_s8, 0 }
  0x13   : > { %p278_p3 = scmp.eq.s32.totalorder %s3642_s17, 1  ;;  %p3643_p5 = scmp.ge.s32.totalorder %s4747_s16, 1 }
  0x14   : > { %p4857_p4 = por %p6774_p1, %p71_p0  ;;  %p285_p7 = scmp.lt.s32.totalorder %s4747_s16, 3 }
  0x15   : > { %p4862_p6 = por %p278_p3, %p71_p0  ;;  %s4749_s21 = smov [#allocation12]  }
  0x16   : > { %s6862_s18 = scalar_select %p4857_p4, 1, 0 }
  0x17   : > { %s6863_s19 = scalar_select %p4862_p6, 1, 0 }
  0x18   : > { %p4867_p8 = pnand %p3643_p5, %p285_p7  ;;  %s297_s22 = sshll.u32 %s4749_s21, 4  ;;  %s4871_s22 = int_to_ptr.vmem [resolvable:$true] %s297_s22 }
  0x19   : > { %6864 = sst [smem:[#allocation24_spill]] %s6863_s19  ;;  %s4750_s24 = smov [#allocation13]  }
  0x1a   : > { %s6865_s20 = scalar_select %p4867_p8, 1, 0 }
  0x1b   : > { %p4122_p9 = pneg %p4867_p8  ;;  %s313_s25 = sshll.u32 %s4750_s24, 4  ;;  %s4882_s25 = int_to_ptr.vmem [resolvable:$true] %s313_s25 }
  0x1c   : > { %s4751_s26 = smov [#allocation15]   ;;  %s6867_s2 = sld [smem:[#allocation92_spill]] }
  0x1d   : > { %p4878_p11 = pnand %p4122_p9, %p6774_p1  ;;  %s4884_s27 = sshll.u32 %s4751_s26, 4  ;;  %s330_s27 = int_to_ptr.vmem [resolvable:$true] %s4884_s27 }
  0x1f   : > { %p4894_p13 = pneg %p4878_p11 }
  0x22   : > { %s4509_s30 = scalar_lea.hbm %s6867_s2, 1024 }
  0x23   : > { %p4510_p12 = scmp.ne.s32.totalorder %s6867_s2, %s4509_s30  ;;  %p4516_p5 = scmp.lt.u32.totalorder %s4509_s30, %s6867_s2 }
  0x25   : > { %p4512_p0 = pnand %p4894_p13, %p4510_p12 }
  0x27   : > { %p4513_p3 = pneg %p4512_p0 }
  0x29   : > { %p4518_p7 = pnand %p4516_p5, %p4513_p3 }
  0x2b   : > { %4521 = shalt.err (!%p4518_p7)
}
  0x2c   : > { %s4522_s28 = scalar_lea.vmem %s4871_s22, 1024  ;;  %p4530_p2 = scmp.lt.s32.totalorder %s4871_s22, %s4871_s22 }
  0x2d   : > { %p4523_p9 = scmp.ne.s32.totalorder %s4871_s22, %s4522_s28  ;;  %p4531_p6 = scmp.lt.s32.totalorder %s4522_s28, %s4522_s28 }
  0x2f   : > { %p4525_p10 = pnand %p4523_p9, %p4894_p13  ;;  %p4532_p12 = por %p4531_p6, %p4530_p2 }
  0x31   : > { %p4526_p1 = pneg %p4525_p10 }
  0x33   : > { %p4533_p0 = pnand %p4532_p12, %p4526_p1 }
  0x35   : > { %4536 = shalt.err (!%p4533_p0)
}
  0x36   : > { %s6780_s29 = smov 64   ;;  %s6781_s30 = smov 4  }
  0x37   : > { %4125 = dma.hbm_to_vmem [thread:$0]  (!%p4878_p11), %s6867_s2, 1024, %s4871_s22, [#allocation11], %s6780_s29, %s6780_s29, %s6781_s30  }
  0x38   : > { %s6869_s4 = sld [smem:[#allocation93_spill]] }
  0x3e   : > { %s4537_s28 = scalar_lea.hbm %s6869_s4, 1024 }
  0x3f   : > { %p4538_p1 = scmp.ne.s32.totalorder %s6869_s4, %s4537_s28  ;;  %p4544_p10 = scmp.lt.u32.totalorder %s4537_s28, %s6869_s4 }
  0x41   : > { %p4540_p2 = pnand %p4538_p1, %p4894_p13 }
  0x43   : > { %p4541_p6 = pneg %p4540_p2 }
  0x45   : > { %p4546_p3 = pnand %p4544_p10, %p4541_p6 }
  0x47   : > { %4549 = shalt.err (!%p4546_p3)
}
  0x48   : > { %s4550_s22 = scalar_lea.vmem %s4882_s25, 1024  ;;  %p4558_p12 = scmp.lt.s32.totalorder %s4882_s25, %s4882_s25 }
  0x49   : > { %p4551_p5 = scmp.ne.s32.totalorder %s4882_s25, %s4550_s22  ;;  %p4559_p0 = scmp.lt.s32.totalorder %s4550_s22, %s4550_s22 }
  0x4b   : > { %p4553_p7 = pnand %p4551_p5, %p4894_p13  ;;  %p4560_p1 = por %p4559_p0, %p4558_p12 }
  0x4d   : > { %p4554_p9 = pneg %p4553_p7 }
  0x4f   : > { %p4561_p2 = pnand %p4560_p1, %p4554_p9 }
  0x51   : > { %4564 = shalt.err (!%p4561_p2)
}
  0x52   : > { %4128 = dma.hbm_to_vmem [thread:$0]  (!%p4878_p11), %s6869_s4, 1024, %s4882_s25, [#allocation14], %s6780_s29, %s6780_s29, %s6781_s30  }
  0x53   : > { %s6870_s6 = sld [smem:[#allocation94_spill]] }
  0x59   : > { %s4565_s10 = scalar_lea.hbm %s6870_s6, 1024 }
  0x5a   : > { %p4566_p6 = scmp.ne.s32.totalorder %s6870_s6, %s4565_s10  ;;  %p4572_p5 = scmp.lt.u32.totalorder %s4565_s10, %s6870_s6 }
  0x5c   : > { %p4568_p10 = pnand %p4566_p6, %p4894_p13 }
  0x5e   : > { %p4569_p3 = pneg %p4568_p10 }
  0x60   : > { %p4574_p7 = pnand %p4572_p5, %p4569_p3 }
  0x62   : > { %4577 = shalt.err (!%p4574_p7)
}
  0x63   : > { %s4578_s22 = scalar_lea.vmem %s330_s27, 1024  ;;  %p4586_p1 = scmp.lt.s32.totalorder %s330_s27, %s330_s27 }
  0x64   : > { %p4579_p9 = scmp.ne.s32.totalorder %s330_s27, %s4578_s22  ;;  %p4587_p2 = scmp.lt.s32.totalorder %s4578_s22, %s4578_s22 }
  0x66   : > { %p4581_p12 = pnand %p4579_p9, %p4894_p13  ;;  %p4588_p4 = por %p4587_p2, %p4586_p1 }
  0x68   : > { %p4582_p0 = pneg %p4581_p12 }
  0x6a   : > { %p4589_p8 = pnand %p4588_p4, %p4582_p0 }
  0x6c   : > { %4592 = shalt.err (!%p4589_p8)
}
  0x6d   : > { %4131 = dma.hbm_to_vmem [thread:$0]  (!%p4878_p11), %s6870_s6, 1024, %s330_s27, [#allocation14], %s6780_s29, %s6780_s29, %s6781_s30  }
  0x6e   : > { %s58_s21 = sadd.s32 1, %s4735_s13  ;;  %s49_s23 = sadd.s32 1, %s4743_s15 }
  0x6f   : > { %p65_p4 = scmp.ne.s32.totalorder %s4735_s13, %s4731_s12  ;;  %p51_p8 = scmp.ge.s32.totalorder %s49_s23, 2 }
  0x70   : > { %p66_p13 = scmp.eq.s32.totalorder %s4747_s16, 0  ;;  %p6871_p6 = scmp.eq.s32.totalorder %s4848_s8, 1 }
  0x71   : > { %p4146_p3 = scmp.lt.s32.totalorder %s4747_s16, 2  ;;  %s7088_s23 = smov (%p51_p8, %s49_s23), 0 }
  0x72   : > { %p4973_p10 = por %p6871_p6, %p65_p4  ;;  %p67_p5 = por %p66_p13, %p65_p4 }
  0x73   : > { %s4981_s14 = sand.u32 1, %s4735_s13   ;;  %s53_s27 = ssub.s32 %s4743_s15, %s7088_s23 }
  0x74   : > { %p56_p11 = scmp.eq.s32.totalorder %s53_s27, 0  ;;  %s3648_s19 = sshll.u32 %s4981_s14, 8 }
  0x75   : > { %s3709_s10 = sshll.u32 %s4743_s15, 12  ;;  %s6873_s0 = sld [smem:[#allocation91_spill]] }
  0x76   : > { %s4988_s17 = scalar_select %p56_p11, %s4735_s13, %s58_s21  }
  0x77   : > { %s353_s22 = scalar_lea.vmem [#allocation7], %s3648_s19  ;;  %p4999_p7 = pnand %p4146_p3, %p67_p5 }
  0x78   : > { %s362_s25 = sshll.u32 %s353_s22, 4  ;;  %s350_s27 = scalar_lea.sflag [#allocation8], %s4981_s14  ;;  %s4995_s25 = int_to_ptr.vmem [resolvable:$true] %s362_s25 }
  0x79   : > { %p4595_p12 = pneg %p4999_p7 }
  0x7b   : > { %s4993_s28 = scalar_lea.hbm %s6873_s0, %s3709_s10  ;;  %s4598_s26 = scalar_lea.hbm %s6873_s0, 8192 }
  0x7c   : > { %s4593_s24 = scalar_lea.hbm %s4993_s28, 4096  ;;  %p4599_p2 = scmp.lt.u32.totalorder %s4993_s28, %s6873_s0 }
  0x7d   : > { %p4594_p9 = scmp.ne.s32.totalorder %s4993_s28, %s4593_s24  ;;  %p4600_p4 = scmp.lt.u32.totalorder %s4598_s26, %s4593_s24 }
  0x7e   : > { %p4602_p13 = scmp.lt.u32.totalorder %s4593_s24, %s4993_s28 }
  0x7f   : > { %p4596_p0 = pnand %p4595_p12, %p4594_p9  ;;  %p4601_p8 = por %p4600_p4, %p4599_p2 }
  0x81   : > { %p4597_p1 = pneg %p4596_p0  ;;  %p4603_p6 = por %p4602_p13, %p4601_p8 }
  0x83   : > { %p4604_p3 = pnand %p4603_p6, %p4597_p1 }
  0x85   : > { %4607 = shalt.err (!%p4604_p3)
}
  0x86   : > { %s4608_s30 = scalar_lea.vmem %s4995_s25, 4096  ;;  %s4754_s19 = smov [#allocation7]  }
  0x87   : > { %p4609_p5 = scmp.ne.s32.totalorder %s4995_s25, %s4608_s30  ;;  %s4613_s10 = sshll.u32 %s4754_s19, 4  ;;  %s4614_s10 = int_to_ptr.vmem [resolvable:$false] %s4613_s10 }
  0x88   : > { %s4615_s29 = scalar_lea.vmem %s4614_s10, 8192  ;;  %p4616_p0 = scmp.lt.s32.totalorder %s4995_s25, %s4614_s10 }
  0x89   : > { %p4611_p11 = pnand %p4609_p5, %p4595_p12  ;;  %p4617_p2 = scmp.lt.s32.totalorder %s4615_s29, %s4608_s30 }
  0x8b   : > { %p4612_p9 = pneg %p4611_p11  ;;  %p4618_p4 = por %p4617_p2, %p4616_p0 }
  0x8d   : > { %p4619_p8 = pnand %p4618_p4, %p4612_p9 }
  0x8f   : > { %4622 = shalt.err (!%p4619_p8)
}
  0x90   : > { %s4755_s24 = smov 128   ;;  %s4756_s26 = smov 8  }
  0x91   : > { %4135 = dma.hbm_to_vmem [thread:$0]  (!%p4999_p7), %s4993_s28, 4096, %s4995_s25, %s350_s27, %s4755_s24, %s4755_s24, %s4756_s26  }
  0x92   : > { %s3651_s22 = sshll.u32 %s4981_s14, 7  ;;  %s3710_s19 = sshll.u32 %s4743_s15, 11 }
  0x93   : > { %s5037_s29 = scalar_lea.hbm %s6765_s1, %s3710_s19  ;;  %s376_s21 = scalar_lea.vmem [#allocation10], %s3651_s22 }
  0x94   : > { %s385_s0 = sshll.u32 %s376_s21, 4  ;;  %s6875_s2 = sand.u32 1, %s4747_s16   ;;  %s5039_s0 = int_to_ptr.vmem [resolvable:$true] %s385_s0 }
  0x95   : > { %s5043_s4 = scalar_lea.sflag [#allocation11], %s6875_s2  ;;  %s4623_s6 = scalar_lea.hbm %s5037_s29, 2048 }
  0x96   : > { %p4624_p1 = scmp.ne.s32.totalorder %s5037_s29, %s4623_s6  ;;  %s4628_s25 = scalar_lea.hbm %s6765_s1, 4096 }
  0x97   : > { %p4629_p3 = scmp.lt.u32.totalorder %s5037_s29, %s6765_s1  ;;  %p4630_p5 = scmp.lt.u32.totalorder %s4628_s25, %s4623_s6 }
  0x98   : > { %p4626_p13 = pnand %p4624_p1, %p4595_p12  ;;  %p4632_p9 = scmp.lt.u32.totalorder %s4623_s6, %s5037_s29 }
  0x99   : > { %p4631_p11 = por %p4630_p5, %p4629_p3 }
  0x9a   : > { %p4627_p6 = pneg %p4626_p13 }
  0x9b   : > { %p4633_p0 = por %p4632_p9, %p4631_p11 }
  0x9d   : > { %p4634_p2 = pnand %p4633_p0, %p4627_p6 }
  0x9f   : > { %4637 = shalt.err (!%p4634_p2)
}
  0xa0   : > { %s4638_s2 = scalar_lea.vmem %s5039_s0, 2048  ;;  %s4757_s21 = smov [#allocation10]  }
  0xa1   : > { %p4639_p4 = scmp.ne.s32.totalorder %s5039_s0, %s4638_s2  ;;  %s4643_s26 = sshll.u32 %s4757_s21, 4  ;;  %s4644_s26 = int_to_ptr.vmem [resolvable:$false] %s4643_s26 }
  0xa2   : > { %s4645_s22 = scalar_lea.vmem %s4644_s26, 4096  ;;  %p4646_p13 = scmp.lt.s32.totalorder %s5039_s0, %s4644_s26 }
  0xa3   : > { %p4641_p8 = pnand %p4639_p4, %p4595_p12  ;;  %p4647_p3 = scmp.lt.s32.totalorder %s4645_s22, %s4638_s2 }
  0xa5   : > { %p4642_p1 = pneg %p4641_p8  ;;  %p4648_p5 = por %p4647_p3, %p4646_p13 }
  0xa7   : > { %p4649_p11 = pnand %p4648_p5, %p4642_p1 }
  0xa9   : > { %4652 = shalt.err (!%p4649_p11)
}
  0xaa   : > { %s6876_s6 = smov 4   ;;  %s6877_s19 = smov 64  }
  0xab   : > { %4138 = dma.hbm_to_vmem [thread:$0]  (!%p4999_p7), %s5037_s29, 2048, %s5039_s0, %s5043_s4, %s6877_s19, %s6877_s19, %s6876_s6  }
  0xac   : > { %p6878_p12 = scmp.ne.s32.totalorder %s6865_s20, 0 }
  0xae   : > { %397 = sbr.rel (%p6878_p12) target bundleno = 1525 (0x5f5), region = 56 }
  0xb5   : > { %s5075_s10 = sand.u32 1, %s4731_s12   ;;  %p6879_p6 = scmp.ne.s32.totalorder %s6862_s18, 0 }
  0xb6   : > { %s3655_s30 = sshll.u32 %s5075_s10, 8  ;;  %s400_s14 = scalar_lea.sflag [#allocation8], %s5075_s10 }
  0xb7   : > { %s5081_s9 = scalar_lea.vmem [#allocation7], %s3655_s30 }
  0xb8   : > { %4706 = dma.done.wait (%p6879_p6), %s400_s14, 4096  }
  0xb9   : > { %4708 = vsyncadd (%p6879_p6), %s400_s14, 4294963200  ;;  %s408_s0 = sand.u32 1, %s4848_s8   ;;  %s3656_s4 = sshll.u32 %s5075_s10, 7 }
  0xba   : > { %s409_s20 = scalar_lea.sflag [#allocation11], %s408_s0  ;;  %s5089_s29 = scalar_lea.vmem [#allocation10], %s3656_s4 }
  0xbb   : > { %4710 = dma.done.wait (%p6879_p6), %s409_s20, 2048  }
  0xbc   : > { %4712 = vsyncadd (%p6879_p6), %s409_s20, 4294965248  ;;  %p6880_p7 = scmp.eq.s32.totalorder %s4848_s8, 0 }
  0xbe   : > { %4714 = dma.done.wait (%p6880_p7), [#allocation11], 1024   ;;  %p6881_p9 = pmov %p6880_p7 }
  0xbf   : > { %p6882_p0 = pmov %p6880_p7 }
  0xc0   : > { %4716 = vsyncadd (%p6881_p9), [#allocation11], 4294966272 }
  0xc1   : > { %4718 = dma.done.wait (%p6882_p0), [#allocation14], 2048   ;;  %p6883_p2 = pmov %p6882_p0 }
  0xc2   : > { %v4213_v0 = vld [vmem:[#allocation12] sm:$0xff]   ;;  %v4214_v1 = vld [vmem:[#allocation12 + $0x8] sm:$0xff]   ;;  %v4215_v2 = vld [vmem:[#allocation12 + $0x10] sm:$0xff]   ;;  %vm784_vm0 = vcmask 7168   ;;  %s3351_s2 = sld [smem:[#allocation6]]  ;;  %s6581_s21 = scalar_lea.vmem [#allocation16], %s3655_s30 }
  0xc3   : > { %4720 = vsyncadd (%p6883_p2), [#allocation14], 4294965248  ;;  %4088 = vmatprep.subr.bf16.mxu1 %v4213_v0  ;;  %3944 = vmatprep.subr.bf16.mxu0 %v4213_v0  ;;  %v4216_v3 = vld [vmem:[#allocation12 + $0x18] sm:$0xff]   ;;  %v488_v4 = vld [vmem:[%s5081_s9 + $0x80] sm:$0xff]  ;;  %s7075_s26 = sld [smem:[#allocation23_spill]]  ;;  %s3497_s6 = sshll.u32 %s6581_s21, 4  ;;  %s6713_s6 = int_to_ptr.vmem [resolvable:$true] %s3497_s6 }
  0xc4   : > { %4096 = vmatpush3.bf16.msra.mxu1 %v4213_v0  ;;  %3945 = vmatpush3.bf16.msra.mxu0 %v4213_v0  ;;  %v489_v5 = vld [vmem:[%s5081_s9 + $0x88] sm:$0xff]  ;;  %v4217_v7 = vld [vmem:[#allocation12 + $0x20] sm:$0xff]   ;;  %v4219_v9 = vld [vmem:[#allocation12 + $0x30] sm:$0xff]   ;;  %s7076_s14 = sld [smem:[#allocation95_spill]]  ;;  %s4653_s20 = scalar_lea.vmem %s6713_s6, 4096 }
  0xc5   : > { %4089 = vmatprep.subr.bf16.mxu1 %v4214_v1  ;;  %3946 = vmatprep.subr.bf16.mxu0 %v4214_v1  ;;  %v512_v6 = vpack.c.bf16 %v489_v5, %v488_v4  ;;  %v4218_v8 = vld [vmem:[#allocation12 + $0x28] sm:$0xff]   ;;  %v4220_v10 = vld [vmem:[#allocation12 + $0x38] sm:$0xff]   ;;  %v490_v11 = vld [vmem:[%s5081_s9 + $0x90] sm:$0xff]  ;;  %p4654_p4 = scmp.ne.s32.totalorder %s6713_s6, %s4653_s20 }
  0xc6   : > { %v491_v12 = vld [vmem:[%s5081_s9 + $0x98] sm:$0xff]  ;;  %v4221_v13 = vld [vmem:[#allocation13] sm:$0xff]   ;;  %v493_v15 = vld [vmem:[%s5081_s9 + $0xa8] sm:$0xff] }
  0xc7   : > { %3976 = vmatprep.mubr.bf16.mxu1 %v512_v6  ;;  %v492_v14 = vld [vmem:[%s5081_s9 + $0xa0] sm:$0xff]  ;;  %v513_v16 = vpack.c.bf16 %v491_v12, %v490_v11  ;;  %v4222_v18 = vld [vmem:[#allocation13 + $0x8] sm:$0xff]   ;;  %v494_v19 = vld [vmem:[%s5081_s9 + $0xb0] sm:$0xff]  ;;  %p4655_p8 = pnand %p4654_p4, %p4973_p10 }
  0xc8   : > { %4097 = vmatpush3.bf16.msra.mxu1 %v4214_v1  ;;  %3947 = vmatpush3.bf16.msra.mxu0 %v4214_v1  ;;  %v514_v17 = vpack.c.bf16 %v493_v15, %v492_v14  ;;  %v495_v20 = vld [vmem:[%s5081_s9 + $0xb8] sm:$0xff]  ;;  %v4223_v21 = vld [vmem:[#allocation13 + $0x10] sm:$0xff]   ;;  %v496_v22 = vld [vmem:[%s5081_s9 + $0xc0] sm:$0xff] }
  0xc9   : > { %4090 = vmatprep.subr.bf16.mxu1 %v4215_v2  ;;  %3948 = vmatprep.subr.bf16.mxu0 %v4215_v2  ;;  %v497_v23 = vld [vmem:[%s5081_s9 + $0xc8] sm:$0xff]  ;;  %v472_v24 = vld [vmem:[%s5081_s9] sm:$0xff]  ;;  %v515_v26 = vpack.c.bf16 %v495_v20, %v494_v19  ;;  %v474_v28 = vld [vmem:[%s5081_s9 + $0x10] sm:$0xff]  ;;  %s3711_s22 = sshll.u32 %s7075_s26, 12  ;;  %p4656_p1 = pneg %p4655_p8 }
  0xca   : > { %v473_v25 = vld [vmem:[%s5081_s9 + $0x8] sm:$0xff]  ;;  %v475_v29 = vld [vmem:[%s5081_s9 + $0x18] sm:$0xff]  ;;  %v476_v30 = vld [vmem:[%s5081_s9 + $0x20] sm:$0xff]  ;;  %v516_v31 = vpack.c.bf16 %v497_v23, %v496_v22  ;;  %s7077_s0 = smov %s7076_s14  ;;  %s6711_s4 = scalar_lea.hbm %s7076_s14, %s3711_s22 }
  0xcb   : > { %v504_v27 = vpack.c.bf16 %v473_v25, %v472_v24  ;;  %v505_v32 = vpack.c.bf16 %v475_v29, %v474_v28  ;;  %v477_v33 = vld [vmem:[%s5081_s9 + $0x28] sm:$0xff]  ;;  %v4224_v34 = vld [vmem:[#allocation13 + $0x18] sm:$0xff]   ;;  %v498_v36 = vld [vmem:[%s5081_s9 + $0xd0] sm:$0xff] }
  0xcc   : > { %4098 = vmatpush3.bf16.msra.mxu1 %v4215_v2  ;;  %3949 = vmatpush3.bf16.msra.mxu0 %v4215_v2  ;;  %v506_v35 = vpack.c.bf16 %v477_v33, %v476_v30  ;;  %v499_v37 = vld [vmem:[%s5081_s9 + $0xd8] sm:$0xff]  ;;  %v478_v38 = vld [vmem:[%s5081_s9 + $0x30] sm:$0xff]  ;;  %v4225_v39 = vld [vmem:[#allocation13 + $0x20] sm:$0xff]  }
  0xcd   : > { %4091 = vmatprep.subr.bf16.mxu1 %v4216_v3  ;;  %3950 = vmatprep.subr.bf16.mxu0 %v4216_v3  ;;  %v500_v40 = vld [vmem:[%s5081_s9 + $0xe0] sm:$0xff]  ;;  %v501_v41 = vld [vmem:[%s5081_s9 + $0xe8] sm:$0xff]  ;;  %v479_v42 = vld [vmem:[%s5081_s9 + $0x38] sm:$0xff]  ;;  %v517_v46 = vpack.c.bf16 %v499_v37, %v498_v36 }
  0xce   : > { %3960 = vmatprep.mubr.bf16.mxu0 %v504_v27  ;;  %v480_v43 = vld [vmem:[%s5081_s9 + $0x40] sm:$0xff]  ;;  %v481_v44 = vld [vmem:[%s5081_s9 + $0x48] sm:$0xff]  ;;  %v507_v45 = vpack.c.bf16 %v479_v42, %v478_v38  ;;  %v518_v48 = vpack.c.bf16 %v501_v41, %v500_v40  ;;  %v502_v50 = vld [vmem:[%s5081_s9 + $0xf0] sm:$0xff] }
  0xcf   : > { %v508_v47 = vpack.c.bf16 %v481_v44, %v480_v43  ;;  %v4226_v49 = vld [vmem:[#allocation13 + $0x28] sm:$0xff]   ;;  %v482_v51 = vld [vmem:[%s5081_s9 + $0x50] sm:$0xff]  ;;  %v483_v52 = vld [vmem:[%s5081_s9 + $0x58] sm:$0xff] }
  0xd0   : > { %4099 = vmatpush3.bf16.msra.mxu1 %v4216_v3  ;;  %3951 = vmatpush3.bf16.msra.mxu0 %v4216_v3  ;;  %v503_v53 = vld [vmem:[%s5081_s9 + $0xf8] sm:$0xff]  ;;  %v484_v54 = vld [vmem:[%s5081_s9 + $0x60] sm:$0xff]  ;;  %v485_v55 = vld [vmem:[%s5081_s9 + $0x68] sm:$0xff]  ;;  %v509_v57 = vpack.c.bf16 %v483_v52, %v482_v51 }
  0xd1   : > { %4092 = vmatprep.subr.bf16.mxu1 %v4217_v7  ;;  %3952 = vmatprep.subr.bf16.mxu0 %v4217_v7  ;;  %v4227_v56 = vld [vmem:[#allocation13 + $0x30] sm:$0xff]   ;;  %v519_v58 = vpack.c.bf16 %v503_v53, %v502_v50  ;;  %v510_v59 = vpack.c.bf16 %v485_v55, %v484_v54  ;;  %v4229_v60 = vld [vmem:[%s5089_s29] sm:$0xff]   ;;  %v4228_v61 = vld [vmem:[#allocation13 + $0x38] sm:$0xff]  }
  0xd2   : > { %v486_v62 = vld [vmem:[%s5081_s9 + $0x70] sm:$0xff]  ;;  %v487_v63 = vld [vmem:[%s5081_s9 + $0x78] sm:$0xff]  ;;  %v5137_v1 = vld [vmem:[%s5089_s29 + $0x8] sm:$0xff]  }
  0xd3   : > { %v511_v0 = vpack.c.bf16 %v487_v63, %v486_v62  ;;  %v5140_v2 = vld [vmem:[%s5089_s29 + $0x10] sm:$0xff]   ;;  %v5145_v3 = vld [vmem:[%s5089_s29 + $0x18] sm:$0xff]   ;;  %v5148_v4 = vld [vmem:[%s5089_s29 + $0x20] sm:$0xff]  }
  0xd4   : > { %4100 = vmatpush3.bf16.msra.mxu1 %v4217_v7  ;;  %3953 = vmatpush3.bf16.msra.mxu0 %v4217_v7  ;;  %v5153_v5 = vld [vmem:[%s5089_s29 + $0x28] sm:$0xff]   ;;  %v5156_v6 = vld [vmem:[%s5089_s29 + $0x30] sm:$0xff]   ;;  %v5161_v7 = vld [vmem:[%s5089_s29 + $0x38] sm:$0xff]  }
  0xd5   : > { %4093 = vmatprep.subr.bf16.mxu1 %v4218_v8  ;;  %3954 = vmatprep.subr.bf16.mxu0 %v4218_v8  ;;  %v5177_v11 = vld [vmem:[%s5089_s29 + $0x58] sm:$0xff]   ;;  %v5180_v12 = vld [vmem:[%s5089_s29 + $0x60] sm:$0xff]   ;;  %v5188_v14 = vld [vmem:[%s5089_s29 + $0x70] sm:$0xff]  }
  0xd6   : > { %v5193_v15 = vld [vmem:[%s5089_s29 + $0x78] sm:$0xff]  }
  0xd8   : > { %4101 = vmatpush3.bf16.msra.mxu1 %v4218_v8  ;;  %3955 = vmatpush3.bf16.msra.mxu0 %v4218_v8  ;;  %v5164_v8 = vld [vmem:[%s5089_s29 + $0x40] sm:$0xff]  }
  0xd9   : > { %4094 = vmatprep.subr.bf16.mxu1 %v4219_v9  ;;  %3956 = vmatprep.subr.bf16.mxu0 %v4219_v9 }
  0xdc   : > { %4102 = vmatpush3.bf16.msra.mxu1 %v4219_v9  ;;  %3957 = vmatpush3.bf16.msra.mxu0 %v4219_v9  ;;  %v5169_v9 = vld [vmem:[%s5089_s29 + $0x48] sm:$0xff]  }
  0xdd   : > { %4095 = vmatprep.subr.bf16.mxu1 %v4220_v10  ;;  %3958 = vmatprep.subr.bf16.mxu0 %v4220_v10 }
  0xe0   : > { %4103 = vmatpush3.bf16.msra.mxu1 %v4220_v10  ;;  %3959 = vmatpush3.bf16.msra.mxu0 %v4220_v10  ;;  %v5172_v10 = vld [vmem:[%s5089_s29 + $0x50] sm:$0xff]  }
  0xe1   : > { %3992 = vmatprep.subr.bf16.mxu1 %v4221_v13 }
  0xe3   : > { %3977 = vmatmul.mubr.bf16.vlgmr.msra.gmra.mrb[0].mxu1 %v513_v16  ;;  %3961 = vmatmul.mubr.bf16.vlgmr.msra.gmra.mrb[0].mxu0 %v505_v32  ;;  %v5199_v16 = vld [vmem:[%s6767_s3] ss:$0 sm:$0xff] }
  0xe4   : > { %3993 = vmatpush3.bf16.msra.mxu1 %v4221_v13  ;;  %3980 = vmatprep.mubr.bf16.mxu1 %v514_v17  ;;  %v5185_v13 = vld [vmem:[%s5089_s29 + $0x68] sm:$0xff]   ;;  %s4761_s29 = smov [#allocation16]  }
  0xe5   : > { %3994 = vmatprep.subr.bf16.mxu1 %v4222_v18  ;;  %3964 = vmatprep.mubr.bf16.mxu0 %v506_v35  ;;  %s4657_s8 = sshll.u32 %s4761_s29, 4  ;;  %s4658_s8 = int_to_ptr.vmem [resolvable:$false] %s4657_s8 }
  0xe6   : > { %s4659_s18 = scalar_lea.vmem %s4658_s8, 8192  ;;  %p4660_p13 = scmp.lt.s32.totalorder %s6713_s6, %s4658_s8 }
  0xe7   : > { %p4661_p3 = scmp.lt.s32.totalorder %s4659_s18, %s4653_s20 }
  0xe8   : > { %3995 = vmatpush3.bf16.msra.mxu1 %v4222_v18 }
  0xe9   : > { %3996 = vmatprep.subr.bf16.mxu1 %v4223_v21  ;;  %p4662_p5 = por %p4661_p3, %p4660_p13 }
  0xeb   : > { %3981 = vmatmul.mubr.bf16.gmra.mrb[4].mxu1 %v515_v26  ;;  %3965 = vmatmul.mubr.bf16.gmra.mrb[4].mxu0 %v507_v45  ;;  %p4663_p11 = pnand %p4662_p5, %p4656_p1 }
  0xec   : > { %3997 = vmatpush3.bf16.msra.mxu1 %v4223_v21  ;;  %3984 = vmatprep.mubr.bf16.mxu1 %v516_v31 }
  0xed   : > { %3998 = vmatprep.subr.bf16.mxu1 %v4224_v34  ;;  %3968 = vmatprep.mubr.bf16.mxu0 %v508_v47 }
  0xf0   : > { %3999 = vmatpush3.bf16.msra.mxu1 %v4224_v34 }
  0xf1   : > { %4000 = vmatprep.subr.bf16.mxu1 %v4225_v39 }
  0xf3   : > { %3985 = vmatmul.mubr.bf16.gmra.mrb[8].mxu1 %v517_v46  ;;  %3969 = vmatmul.mubr.bf16.gmra.mrb[8].mxu0 %v509_v57 }
  0xf4   : > { %4001 = vmatpush3.bf16.msra.mxu1 %v4225_v39  ;;  %3988 = vmatprep.mubr.bf16.mxu1 %v518_v48 }
  0xf5   : > { %4002 = vmatprep.subr.bf16.mxu1 %v4226_v49  ;;  %3972 = vmatprep.mubr.bf16.mxu0 %v510_v59 }
  0xf8   : > { %4003 = vmatpush3.bf16.msra.mxu1 %v4226_v49 }
  0xf9   : > { %4004 = vmatprep.subr.bf16.mxu1 %v4227_v56 }
  0xfb   : > { %3989 = vmatmul.mubr.bf16.gmra.mrb[12].mxu1 %v519_v58  ;;  %3973 = vmatmul.mubr.bf16.gmra.mrb[12].mxu0 %v511_v0 }
  0xfc   : > { %4005 = vmatpush3.bf16.msra.mxu1 %v4227_v56  ;;  %4008 = vmatprep.mubr.bf16.mxu1 %v4229_v60 }
  0xfd   : > { %4006 = vmatprep.subr.bf16.mxu1 %v4228_v61  ;;  %4056 = vmatprep.mubr.bf16.mxu0 %v4229_v60 }
 0x100   : > { %4007 = vmatpush3.bf16.msra.mxu1 %v4228_v61 }
 0x103   : > { %4009 = vmatmul.mubr.bf16.vlgmr.msra.gmra.mrb[16].mxu1 %v5137_v1 }
 0x104   : > { %4012 = vmatprep.mubr.bf16.mxu1 %v5140_v2 }
 0x10b   : > { %4013 = vmatmul.mubr.bf16.gmra.mrb[20].mxu1 %v5145_v3 }
 0x10c   : > { %4016 = vmatprep.mubr.bf16.mxu1 %v5148_v4 }
 0x113   : > { %4017 = vmatmul.mubr.bf16.gmra.mrb[24].mxu1 %v5153_v5 }
 0x114   : > { %4020 = vmatprep.mubr.bf16.mxu1 %v5156_v6 }
 0x11b   : > { %4021 = vmatmul.mubr.bf16.gmra.mrb[28].mxu1 %v5161_v7 }
 0x11c   : > { %4024 = vmatprep.mubr.bf16.mxu1 %v5164_v8 }
 0x123   : > { %4025 = vmatmul.mubr.bf16.gmra.mrb[32].mxu1 %v5169_v9 }
 0x124   : > { %4028 = vmatprep.mubr.bf16.mxu1 %v5172_v10 }
 0x12b   : > { %4029 = vmatmul.mubr.bf16.gmra.mrb[36].mxu1 %v5177_v11 }
 0x12c   : > { %4032 = vmatprep.mubr.bf16.mxu1 %v5180_v12 }
 0x133   : > { %4033 = vmatmul.mubr.bf16.gmra.mrb[40].mxu1 %v5185_v13 }
 0x134   : > { %4036 = vmatprep.mubr.bf16.mxu1 %v5188_v14 }
 0x13b   : > { %4037 = vmatmul.mubr.bf16.gmra.mrb[44].mxu1 %v5193_v15 }
 0x1b6   : > { %v3978_v17 = vpop.f32.mrb[0].mxu1  ;;  %v3962_v27 = vpop.f32.mrb[0].mxu0 }
 0x1b7   : > { %v698_v18 = vadd.f32 %v3978_v17, %v5199_v16  ;;  %v689_v19 = vpop.f32.mrb[1].mxu1  ;;  %v634_v29 = vadd.f32 %v3962_v27, %v5199_v16  ;;  %v625_v30 = vpop.f32.mrb[1].mxu0 }
 0x1b8   : > { %v690_v20 = vadd.f32 %v5199_v16, %v689_v19  ;;  %v3979_v21 = vpop.f32.mrb[2].mxu1  ;;  %v626_v33 = vadd.f32 %v5199_v16, %v625_v30  ;;  %v3963_v34 = vpop.f32.mrb[2].mxu0 }
 0x1b9   : > { %v701_v22 = vadd.f32 %v3979_v21, %v5199_v16  ;;  %v692_v23 = vpop.f32.mrb[3].mxu1  ;;  %v637_v37 = vadd.f32 %v3963_v34, %v5199_v16  ;;  %v628_v38 = vpop.f32.mrb[3].mxu0 }
 0x1ba   : > { %v693_v24 = vadd.f32 %v5199_v16, %v692_v23  ;;  %v629_v41 = vadd.f32 %v5199_v16, %v628_v38 }
 0x1bb   : > { %v5205_v25 = vpack.c.bf16 %v701_v22, %v698_v18  ;;  %v5217_v43 = vpack.c.bf16 %v637_v37, %v634_v29 }
 0x1bc   : > { %v5207_v26 = vpack.c.bf16 %v693_v24, %v690_v20  ;;  %v5221_v45 = vpack.c.bf16 %v629_v41, %v626_v33 }
 0x1be   : > { %v3982_v28 = vpop.f32.mrb[4].mxu1  ;;  %3800 = vmatprep.mubr.bf16.mxu1 %v5221_v45  ;;  %v3966_v47 = vpop.f32.mrb[4].mxu0 }
 0x1bf   : > { %v714_v31 = vadd.f32 %v3982_v28, %v5199_v16  ;;  %v705_v32 = vpop.f32.mrb[5].mxu1  ;;  %v650_v49 = vadd.f32 %v3966_v47, %v5199_v16  ;;  %v641_v50 = vpop.f32.mrb[5].mxu0 }
 0x1c0   : > { %v706_v35 = vadd.f32 %v5199_v16, %v705_v32  ;;  %v3983_v36 = vpop.f32.mrb[6].mxu1  ;;  %v642_v53 = vadd.f32 %v5199_v16, %v641_v50  ;;  %v3967_v54 = vpop.f32.mrb[6].mxu0 }
 0x1c1   : > { %v717_v39 = vadd.f32 %v3983_v36, %v5199_v16  ;;  %v708_v40 = vpop.f32.mrb[7].mxu1  ;;  %v653_v57 = vadd.f32 %v3967_v54, %v5199_v16  ;;  %v644_v58 = vpop.f32.mrb[7].mxu0 }
 0x1c2   : > { %v709_v42 = vadd.f32 %v5199_v16, %v708_v40  ;;  %v645_v61 = vadd.f32 %v5199_v16, %v644_v58 }
 0x1c3   : > { %v5219_v44 = vpack.c.bf16 %v717_v39, %v714_v31  ;;  %v5234_v63 = vpack.c.bf16 %v653_v57, %v650_v49 }
 0x1c4   : > { %v5223_v46 = vpack.c.bf16 %v709_v42, %v706_v35  ;;  %v5238_v17 = vpack.c.bf16 %v645_v61, %v642_v53  ;;  %v5261_v42 = vld [vmem:[%s6769_s5] ss:$0 sm:$0xff] }
 0x1c6   : > { %v3986_v48 = vpop.f32.mrb[8].mxu1  ;;  %v3970_v22 = vpop.f32.mrb[8].mxu0 }
 0x1c7   : > { %v730_v51 = vadd.f32 %v3986_v48, %v5199_v16  ;;  %v721_v52 = vpop.f32.mrb[9].mxu1  ;;  %v666_v27 = vadd.f32 %v3970_v22, %v5199_v16  ;;  %v657_v28 = vpop.f32.mrb[9].mxu0 }
 0x1c8   : > { %v722_v55 = vadd.f32 %v5199_v16, %v721_v52  ;;  %v3987_v56 = vpop.f32.mrb[10].mxu1  ;;  %v658_v31 = vadd.f32 %v5199_v16, %v657_v28  ;;  %v3971_v32 = vpop.f32.mrb[10].mxu0 }
 0x1c9   : > { %v733_v59 = vadd.f32 %v3987_v56, %v5199_v16  ;;  %v724_v60 = vpop.f32.mrb[11].mxu1  ;;  %v669_v34 = vadd.f32 %v3971_v32, %v5199_v16  ;;  %v660_v35 = vpop.f32.mrb[11].mxu0 }
 0x1ca   : > { %v725_v62 = vadd.f32 %v5199_v16, %v724_v60  ;;  %v661_v37 = vadd.f32 %v5199_v16, %v660_v35 }
 0x1cb   : > { %v5236_v0 = vpack.c.bf16 %v733_v59, %v730_v51  ;;  %v5254_v39 = vpack.c.bf16 %v669_v34, %v666_v27 }
 0x1cc   : > { %v5240_v18 = vpack.c.bf16 %v725_v62, %v722_v55  ;;  %v5256_v40 = vpack.c.bf16 %v661_v37, %v658_v31 }
 0x1ce   : > { %v3990_v19 = vpop.f32.mrb[12].mxu1  ;;  %v3974_v58 = vpop.f32.mrb[12].mxu0 }
 0x1cf   : > { %v746_v20 = vadd.f32 %v3990_v19, %v5199_v16  ;;  %v737_v21 = vpop.f32.mrb[13].mxu1  ;;  %v682_v60 = vadd.f32 %v3974_v58, %v5199_v16  ;;  %v673_v61 = vpop.f32.mrb[13].mxu0 }
 0x1d0   : > { %v738_v23 = vadd.f32 %v5199_v16, %v737_v21  ;;  %v3991_v24 = vpop.f32.mrb[14].mxu1  ;;  %v674_v21 = vadd.f32 %v5199_v16, %v673_v61  ;;  %v3975_v22 = vpop.f32.mrb[14].mxu0 }
 0x1d1   : > { %v749_v29 = vadd.f32 %v3991_v24, %v5199_v16  ;;  %v740_v30 = vpop.f32.mrb[15].mxu1  ;;  %v685_v27 = vadd.f32 %v3975_v22, %v5199_v16  ;;  %v676_v28 = vpop.f32.mrb[15].mxu0 }
 0x1d2   : > { %v741_v33 = vadd.f32 %v5199_v16, %v740_v30  ;;  %v677_v30 = vadd.f32 %v5199_v16, %v676_v28 }
 0x1d3   : > { %v5249_v36 = vpack.c.bf16 %v749_v29, %v746_v20  ;;  %v5293_v32 = vpack.c.bf16 %v685_v27, %v682_v60 }
 0x1d4   : > { %v5252_v38 = vpack.c.bf16 %v741_v33, %v738_v23  ;;  %v5295_v33 = vpack.c.bf16 %v677_v30, %v674_v21 }
 0x1d6   : > { %v4010_v41 = vpop.f32.mrb[16].mxu1 }
 0x1d7   : > { %v1114_v47 = vpop.f32.mrb[17].mxu1  ;;  %v5264_v49 = vadd.f32 %v4010_v41, %v5261_v42 }
 0x1d8   : > { %v4011_v48 = vpop.f32.mrb[18].mxu1  ;;  %v1115_v52 = vadd.f32 %v5261_v42, %v1114_v47 }
 0x1d9   : > { %v5267_v50 = vadd.f32 %v4011_v48, %v5261_v42  ;;  %v1117_v51 = vpop.f32.mrb[19].mxu1 }
 0x1da   : > { %v1118_v53 = vadd.f32 %v5261_v42, %v1117_v51 }
 0x1db   : > { %v1490_v54 = vpack.c.bf16 %v5267_v50, %v5264_v49 }
 0x1dc   : > { %v1489_v55 = vpack.c.bf16 %v1118_v53, %v1115_v52 }
 0x1de   : > { %v4014_v56 = vpop.f32.mrb[20].mxu1 }
 0x1df   : > { %v1130_v57 = vpop.f32.mrb[21].mxu1  ;;  %v5275_v62 = vadd.f32 %v4014_v56, %v5261_v42 }
 0x1e0   : > { %v4015_v59 = vpop.f32.mrb[22].mxu1  ;;  %v5282_v23 = vadd.f32 %v5261_v42, %v1130_v57 }
 0x1e1   : > { %v5278_v19 = vadd.f32 %v4015_v59, %v5261_v42  ;;  %v1133_v20 = vpop.f32.mrb[23].mxu1 }
 0x1e2   : > { %v5285_v24 = vadd.f32 %v5261_v42, %v1133_v20 }
 0x1e3   : > { %v1492_v29 = vpack.c.bf16 %v5278_v19, %v5275_v62  ;;  %v4248_v62 = vld [vmem:[#allocation15 + $0x18] sm:$0xff]   ;;  %v4249_v19 = vld [vmem:[#allocation15 + $0x20] sm:$0xff]  }
 0x1e4   : > { %v1491_v31 = vpack.c.bf16 %v5285_v24, %v5282_v23 }
 0x1e6   : > { %v4018_v34 = vpop.f32.mrb[24].mxu1 }
 0x1e7   : > { %v1146_v35 = vpop.f32.mrb[25].mxu1  ;;  %v5298_v41 = vadd.f32 %v4018_v34, %v5261_v42 }
 0x1e8   : > { %v4019_v37 = vpop.f32.mrb[26].mxu1  ;;  %v5304_v51 = vadd.f32 %v5261_v42, %v1146_v35 }
 0x1e9   : > { %v5301_v47 = vadd.f32 %v4019_v37, %v5261_v42  ;;  %v1149_v48 = vpop.f32.mrb[27].mxu1 }
 0x1ea   : > { %v1150_v16 = vadd.f32 %v5261_v42, %v1149_v48 }
 0x1eb   : > { %v1494_v52 = vpack.c.bf16 %v5301_v47, %v5298_v41 }
 0x1ec   : > { %v1493_v53 = vpack.c.bf16 %v1150_v16, %v5304_v51 }
 0x1ee   : > { %v4022_v56 = vpop.f32.mrb[28].mxu1 }
 0x1ef   : > { %v1162_v57 = vpop.f32.mrb[29].mxu1  ;;  %v5311_v59 = vadd.f32 %v4022_v56, %v5261_v42 }
 0x1f0   : > { %v4023_v58 = vpop.f32.mrb[30].mxu1  ;;  %v1163_v20 = vadd.f32 %v5261_v42, %v1162_v57 }
 0x1f1   : > { %v5314_v60 = vadd.f32 %v4023_v58, %v5261_v42  ;;  %v1165_v61 = vpop.f32.mrb[31].mxu1 }
 0x1f2   : > { %v1166_v21 = vadd.f32 %v5261_v42, %v1165_v61 }
 0x1f3   : > { %v1496_v22 = vpack.c.bf16 %v5314_v60, %v5311_v59 }
 0x1f4   : > { %v1495_v23 = vpack.c.bf16 %v1166_v21, %v1163_v20 }
 0x1f6   : > { %v4026_v24 = vpop.f32.mrb[32].mxu1 }
 0x1f7   : > { %v1178_v27 = vpop.f32.mrb[33].mxu1  ;;  %v1187_v30 = vadd.f32 %v4026_v24, %v5261_v42 }
 0x1f8   : > { %v4027_v28 = vpop.f32.mrb[34].mxu1  ;;  %v1179_v37 = vadd.f32 %v5261_v42, %v1178_v27 }
 0x1f9   : > { %v1190_v34 = vadd.f32 %v4027_v28, %v5261_v42  ;;  %v1181_v35 = vpop.f32.mrb[35].mxu1 }
 0x1fa   : > { %v1182_v41 = vadd.f32 %v5261_v42, %v1181_v35 }
 0x1fb   : > { %v1498_v47 = vpack.c.bf16 %v1190_v34, %v1187_v30 }
 0x1fc   : > { %v1497_v48 = vpack.c.bf16 %v1182_v41, %v1179_v37 }
 0x1fe   : > { %3784 = vmatprep.subr.bf16.mxu1 %v1497_v48  ;;  %v4030_v51 = vpop.f32.mrb[36].mxu1 }
 0x1ff   : > { %3785 = vmatpush3.bf16.xpose.msra.mxu1 %v1489_v55  ;;  %v1203_v16 = vadd.f32 %v4030_v51, %v5261_v42  ;;  %v1194_v56 = vpop.f32.mrb[37].mxu1 }
 0x200   : > { %3786 = vmatprep.subr.bf16.mxu1 %v1498_v47  ;;  %v1195_v57 = vadd.f32 %v5261_v42, %v1194_v56  ;;  %v4031_v58 = vpop.f32.mrb[38].mxu1 }
 0x201   : > { %v1206_v59 = vadd.f32 %v4031_v58, %v5261_v42  ;;  %v1197_v60 = vpop.f32.mrb[39].mxu1 }
 0x202   : > { %v1198_v61 = vadd.f32 %v5261_v42, %v1197_v60  ;;  %v4246_v60 = vld [vmem:[#allocation15 + $0x8] sm:$0xff]  }
 0x203   : > { %v1500_v20 = vpack.c.bf16 %v1206_v59, %v1203_v16 }
 0x204   : > { %v1499_v21 = vpack.c.bf16 %v1198_v61, %v1195_v57 }
 0x206   : > { %v4034_v24 = vpop.f32.mrb[40].mxu1 }
 0x207   : > { %3787 = vmatpush3.bf16.xpose.msra.mxu1 %v1490_v54  ;;  %v1219_v55 = vadd.f32 %v4034_v24, %v5261_v42  ;;  %v1210_v27 = vpop.f32.mrb[41].mxu1 }
 0x208   : > { %3788 = vmatprep.subr.bf16.mxu1 %v1499_v21  ;;  %v1211_v28 = vadd.f32 %v5261_v42, %v1210_v27  ;;  %v4035_v30 = vpop.f32.mrb[42].mxu1 }
 0x209   : > { %v1222_v34 = vadd.f32 %v4035_v30, %v5261_v42  ;;  %v1213_v35 = vpop.f32.mrb[43].mxu1 }
 0x20a   : > { %v1214_v37 = vadd.f32 %v5261_v42, %v1213_v35 }
 0x20b   : > { %v1502_v41 = vpack.c.bf16 %v1222_v34, %v1219_v55 }
 0x20c   : > { %v1501_v47 = vpack.c.bf16 %v1214_v37, %v1211_v28 }
 0x20e   : > { %v4038_v48 = vpop.f32.mrb[44].mxu1 }
 0x20f   : > { %3789 = vmatpush3.bf16.xpose.msra.mxu1 %v1491_v31  ;;  %v1235_v51 = vadd.f32 %v4038_v48, %v5261_v42  ;;  %v1226_v49 = vpop.f32.mrb[45].mxu1  ;;  %v4245_v31 = vld [vmem:[#allocation15] sm:$0xff]  }
 0x210   : > { %3790 = vmatprep.subr.bf16.mxu1 %v1500_v20  ;;  %v1227_v50 = vadd.f32 %v5261_v42, %v1226_v49  ;;  %v4039_v54 = vpop.f32.mrb[46].mxu1  ;;  %4040 = vmatprep.subr.bf16.mxu0 %v4245_v31 }
 0x211   : > { %v1238_v16 = vadd.f32 %v4039_v54, %v5261_v42  ;;  %v1229_v56 = vpop.f32.mrb[47].mxu1  ;;  %4041 = vmatpush3.bf16.msra.mxu0 %v4245_v31 }
 0x212   : > { %v1230_v57 = vadd.f32 %v5261_v42, %v1229_v56  ;;  %4042 = vmatprep.subr.bf16.mxu0 %v4246_v60  ;;  %v4247_v42 = vld [vmem:[#allocation15 + $0x10] sm:$0xff]  }
 0x213   : > { %v1504_v58 = vpack.c.bf16 %v1238_v16, %v1235_v51 }
 0x214   : > { %v1503_v59 = vpack.c.bf16 %v1230_v57, %v1227_v50 }
 0x215   : > { %4043 = vmatpush3.bf16.msra.mxu0 %v4246_v60 }
 0x216   : > { %4044 = vmatprep.subr.bf16.mxu0 %v4247_v42 }
 0x217   : > { %3791 = vmatpush3.bf16.xpose.msra.mxu1 %v1492_v29  ;;  %v4760_v29 = vmov 0.0  }
 0x218   : > { %3792 = vmatprep.subr.bf16.mxu1 %v1501_v47  ;;  %818 = vst.msk [vmem:[#allocation4 + $0x8] sm:$0xff] %vm784_vm0, %v4760_v29  ;;  %817 = vst.msk [vmem:[#allocation4] sm:$0xff] %vm784_vm0, %v4760_v29 }
 0x219   : > { %4045 = vmatpush3.bf16.msra.mxu0 %v4247_v42  ;;  %819 = vst.msk [vmem:[#allocation4 + $0x10] sm:$0xff] %vm784_vm0, %v4760_v29  ;;  %820 = vst.msk [vmem:[#allocation4 + $0x18] sm:$0xff] %vm784_vm0, %v4760_v29 }
 0x21a   : > { %4046 = vmatprep.subr.bf16.mxu0 %v4248_v62  ;;  %821 = vst.msk [vmem:[#allocation4 + $0x20] sm:$0xff] %vm784_vm0, %v4760_v29  ;;  %822 = vst.msk [vmem:[#allocation4 + $0x28] sm:$0xff] %vm784_vm0, %v4760_v29 }
 0x21b   : > { %823 = vst.msk [vmem:[#allocation4 + $0x30] sm:$0xff] %vm784_vm0, %v4760_v29  ;;  %824 = vst.msk [vmem:[#allocation4 + $0x38] sm:$0xff] %vm784_vm0, %v4760_v29 }
 0x21c   : > { %825 = vst.msk [vmem:[#allocation4 + $0x40] sm:$0xff] %vm784_vm0, %v4760_v29  ;;  %826 = vst.msk [vmem:[#allocation4 + $0x48] sm:$0xff] %vm784_vm0, %v4760_v29 }
 0x21d   : > { %4047 = vmatpush3.bf16.msra.mxu0 %v4248_v62  ;;  %827 = vst.msk [vmem:[#allocation4 + $0x50] sm:$0xff] %vm784_vm0, %v4760_v29  ;;  %828 = vst.msk [vmem:[#allocation4 + $0x58] sm:$0xff] %vm784_vm0, %v4760_v29 }
 0x21e   : > { %4048 = vmatprep.subr.bf16.mxu0 %v4249_v19  ;;  %829 = vst.msk [vmem:[#allocation4 + $0x60] sm:$0xff] %vm784_vm0, %v4760_v29  ;;  %830 = vst.msk [vmem:[#allocation4 + $0x68] sm:$0xff] %vm784_vm0, %v4760_v29 }
 0x21f   : > { %3793 = vmatpush3.bf16.xpose.msra.mxu1 %v1493_v53  ;;  %831 = vst.msk [vmem:[#allocation4 + $0x70] sm:$0xff] %vm784_vm0, %v4760_v29  ;;  %832 = vst.msk [vmem:[#allocation4 + $0x78] sm:$0xff] %vm784_vm0, %v4760_v29 }
 0x220   : > { %3794 = vmatprep.subr.bf16.mxu1 %v1502_v41  ;;  %833 = vst.msk [vmem:[#allocation4 + $0x80] sm:$0xff] %vm784_vm0, %v4760_v29  ;;  %834 = vst.msk [vmem:[#allocation4 + $0x88] sm:$0xff] %vm784_vm0, %v4760_v29 }
 0x221   : > { %4049 = vmatpush3.bf16.msra.mxu0 %v4249_v19  ;;  %835 = vst.msk [vmem:[#allocation4 + $0x90] sm:$0xff] %vm784_vm0, %v4760_v29  ;;  %836 = vst.msk [vmem:[#allocation4 + $0x98] sm:$0xff] %vm784_vm0, %v4760_v29 }
 0x222   : > { %837 = vst.msk [vmem:[#allocation4 + $0xa0] sm:$0xff] %vm784_vm0, %v4760_v29  ;;  %838 = vst.msk [vmem:[#allocation4 + $0xa8] sm:$0xff] %vm784_vm0, %v4760_v29 }
 0x223   : > { %839 = vst.msk [vmem:[#allocation4 + $0xb0] sm:$0xff] %vm784_vm0, %v4760_v29  ;;  %840 = vst.msk [vmem:[#allocation4 + $0xb8] sm:$0xff] %vm784_vm0, %v4760_v29 }
 0x224   : > { %841 = vst.msk [vmem:[#allocation4 + $0xc0] sm:$0xff] %vm784_vm0, %v4760_v29  ;;  %842 = vst.msk [vmem:[#allocation4 + $0xc8] sm:$0xff] %vm784_vm0, %v4760_v29 }
 0x225   : > { %843 = vst.msk [vmem:[#allocation4 + $0xd0] sm:$0xff] %vm784_vm0, %v4760_v29  ;;  %844 = vst.msk [vmem:[#allocation4 + $0xd8] sm:$0xff] %vm784_vm0, %v4760_v29 }
 0x226   : > { %845 = vst.msk [vmem:[#allocation4 + $0xe0] sm:$0xff] %vm784_vm0, %v4760_v29  ;;  %846 = vst.msk [vmem:[#allocation4 + $0xe8] sm:$0xff] %vm784_vm0, %v4760_v29 }
 0x227   : > { %3795 = vmatpush3.bf16.xpose.msra.mxu1 %v1494_v52  ;;  %847 = vst.msk [vmem:[#allocation4 + $0xf0] sm:$0xff] %vm784_vm0, %v4760_v29  ;;  %848 = vst.msk [vmem:[#allocation4 + $0xf8] sm:$0xff] %vm784_vm0, %v4760_v29 }
 0x228   : > { %3796 = vmatprep.subr.bf16.mxu1 %v1503_v59 }
 0x22f   : > { %3797 = vmatpush3.bf16.xpose.msra.mxu1 %v1495_v23 }
 0x230   : > { %3798 = vmatprep.subr.bf16.mxu1 %v1504_v58 }
 0x237   : > { %3799 = vmatpush3.bf16.xpose.msra.mxu1 %v1496_v22 }
 0x23e   : > { %3801 = vmatmul.mubr.bf16.vlgmr.msra.gmra.mrb[48].mxu1 %v5221_v45  ;;  %v4251_v45 = vld [vmem:[#allocation15 + $0x30] sm:$0xff]  }
 0x23f   : > { %3802 = vmatprep.mubr.bf16.mxu1 %v5217_v43 }
 0x246   : > { %3803 = vmatmul.mubr.bf16.gmra.mrb[52].mxu1 %v5217_v43  ;;  %v4250_v43 = vld [vmem:[#allocation15 + $0x28] sm:$0xff]  }
 0x247   : > { %3804 = vmatprep.mubr.bf16.mxu1 %v5238_v17  ;;  %4050 = vmatprep.subr.bf16.mxu0 %v4250_v43 }
 0x248   : > { %4051 = vmatpush3.bf16.msra.mxu0 %v4250_v43 }
 0x249   : > { %4052 = vmatprep.subr.bf16.mxu0 %v4251_v45 }
 0x24c   : > { %4053 = vmatpush3.bf16.msra.mxu0 %v4251_v45 }
 0x24e   : > { %3805 = vmatmul.mubr.bf16.gmra.mrb[56].mxu1 %v5238_v17 }
 0x24f   : > { %3806 = vmatprep.mubr.bf16.mxu1 %v5234_v63 }
 0x256   : > { %3807 = vmatmul.mubr.bf16.gmra.mrb[60].mxu1 %v5234_v63  ;;  %v4759_v63 = vmov 0  }
 0x257   : > { %3808 = vmatprep.mubr.bf16.mxu1 %v5256_v40  ;;  %4211 = vset.pattern.permute.xlu0 %v4759_v63 }
 0x258   : > { %4212 = vset.pattern.permute.xlu1 %v4759_v63 }
 0x25e   : > { %3809 = vmatmul.mubr.bf16.gmra.mrb[64].mxu1 %v5256_v40 }
 0x25f   : > { %3810 = vmatprep.mubr.bf16.mxu1 %v5254_v39 }
 0x266   : > { %3811 = vmatmul.mubr.bf16.gmra.mrb[68].mxu1 %v5254_v39 }
 0x267   : > { %3812 = vmatprep.mubr.bf16.mxu1 %v5295_v33 }
 0x26e   : > { %3813 = vmatmul.mubr.bf16.gmra.mrb[72].mxu1 %v5295_v33 }
 0x26f   : > { %3814 = vmatprep.mubr.bf16.mxu1 %v5293_v32 }
 0x276   : > { %3815 = vmatmul.mubr.bf16.gmra.mrb[76].mxu1 %v5293_v32 }
 0x277   : > { %3816 = vmatprep.mubr.bf16.mxu1 %v5207_v26 }
 0x27e   : > { %3817 = vmatmul.mubr.bf16.gmra.mrb[80].mxu1 %v5207_v26  ;;  %v4252_v26 = vld [vmem:[#allocation15 + $0x38] sm:$0xff]  }
 0x27f   : > { %3818 = vmatprep.mubr.bf16.mxu1 %v5205_v25  ;;  %4054 = vmatprep.subr.bf16.mxu0 %v4252_v26 }
 0x280   : > { %4055 = vmatpush3.bf16.msra.mxu0 %v4252_v26 }
 0x283   : > { %4057 = vmatmul.mubr.bf16.vlgmr.msra.gmra.mrb[16].mxu0 %v5137_v1  ;;  %v4758_v1 = vmov -inf  }
 0x284   : > { %4060 = vmatprep.mubr.bf16.mxu0 %v5140_v2  ;;  %785 = vst.msk [vmem:[#allocation3] sm:$0xff] %vm784_vm0, %v4758_v1  ;;  %786 = vst.msk [vmem:[#allocation3 + $0x8] sm:$0xff] %vm784_vm0, %v4758_v1 }
 0x285   : > { %787 = vst.msk [vmem:[#allocation3 + $0x10] sm:$0xff] %vm784_vm0, %v4758_v1  ;;  %788 = vst.msk [vmem:[#allocation3 + $0x18] sm:$0xff] %vm784_vm0, %v4758_v1 }
 0x286   : > { %3819 = vmatmul.mubr.bf16.gmra.mrb[84].mxu1 %v5205_v25  ;;  %789 = vst.msk [vmem:[#allocation3 + $0x20] sm:$0xff] %vm784_vm0, %v4758_v1  ;;  %790 = vst.msk [vmem:[#allocation3 + $0x28] sm:$0xff] %vm784_vm0, %v4758_v1 }
 0x287   : > { %3820 = vmatprep.mubr.bf16.mxu1 %v5223_v46  ;;  %791 = vst.msk [vmem:[#allocation3 + $0x30] sm:$0xff] %vm784_vm0, %v4758_v1  ;;  %792 = vst.msk [vmem:[#allocation3 + $0x38] sm:$0xff] %vm784_vm0, %v4758_v1 }
 0x288   : > { %793 = vst.msk [vmem:[#allocation3 + $0x40] sm:$0xff] %vm784_vm0, %v4758_v1  ;;  %794 = vst.msk [vmem:[#allocation3 + $0x48] sm:$0xff] %vm784_vm0, %v4758_v1 }
 0x289   : > { %795 = vst.msk [vmem:[#allocation3 + $0x50] sm:$0xff] %vm784_vm0, %v4758_v1  ;;  %796 = vst.msk [vmem:[#allocation3 + $0x58] sm:$0xff] %vm784_vm0, %v4758_v1 }
 0x28a   : > { %797 = vst.msk [vmem:[#allocation3 + $0x60] sm:$0xff] %vm784_vm0, %v4758_v1  ;;  %798 = vst.msk [vmem:[#allocation3 + $0x68] sm:$0xff] %vm784_vm0, %v4758_v1 }
 0x28b   : > { %4061 = vmatmul.mubr.bf16.gmra.mrb[20].mxu0 %v5145_v3  ;;  %799 = vst.msk [vmem:[#allocation3 + $0x70] sm:$0xff] %vm784_vm0, %v4758_v1  ;;  %800 = vst.msk [vmem:[#allocation3 + $0x78] sm:$0xff] %vm784_vm0, %v4758_v1 }
 0x28c   : > { %4064 = vmatprep.mubr.bf16.mxu0 %v5148_v4  ;;  %801 = vst.msk [vmem:[#allocation3 + $0x80] sm:$0xff] %vm784_vm0, %v4758_v1  ;;  %802 = vst.msk [vmem:[#allocation3 + $0x88] sm:$0xff] %vm784_vm0, %v4758_v1 }
 0x28d   : > { %803 = vst.msk [vmem:[#allocation3 + $0x90] sm:$0xff] %vm784_vm0, %v4758_v1  ;;  %804 = vst.msk [vmem:[#allocation3 + $0x98] sm:$0xff] %vm784_vm0, %v4758_v1 }
 0x28e   : > { %3821 = vmatmul.mubr.bf16.gmra.mrb[88].mxu1 %v5223_v46  ;;  %805 = vst.msk [vmem:[#allocation3 + $0xa0] sm:$0xff] %vm784_vm0, %v4758_v1  ;;  %806 = vst.msk [vmem:[#allocation3 + $0xa8] sm:$0xff] %vm784_vm0, %v4758_v1 }
 0x28f   : > { %3822 = vmatprep.mubr.bf16.mxu1 %v5219_v44  ;;  %807 = vst.msk [vmem:[#allocation3 + $0xb0] sm:$0xff] %vm784_vm0, %v4758_v1  ;;  %808 = vst.msk [vmem:[#allocation3 + $0xb8] sm:$0xff] %vm784_vm0, %v4758_v1 }
 0x290   : > { %809 = vst.msk [vmem:[#allocation3 + $0xc0] sm:$0xff] %vm784_vm0, %v4758_v1  ;;  %810 = vst.msk [vmem:[#allocation3 + $0xc8] sm:$0xff] %vm784_vm0, %v4758_v1 }
 0x291   : > { %811 = vst.msk [vmem:[#allocation3 + $0xd0] sm:$0xff] %vm784_vm0, %v4758_v1  ;;  %812 = vst.msk [vmem:[#allocation3 + $0xd8] sm:$0xff] %vm784_vm0, %v4758_v1 }
 0x292   : > { %813 = vst.msk [vmem:[#allocation3 + $0xe0] sm:$0xff] %vm784_vm0, %v4758_v1  ;;  %814 = vst.msk [vmem:[#allocation3 + $0xe8] sm:$0xff] %vm784_vm0, %v4758_v1 }
 0x293   : > { %4065 = vmatmul.mubr.bf16.gmra.mrb[24].mxu0 %v5153_v5  ;;  %815 = vst.msk [vmem:[#allocation3 + $0xf0] sm:$0xff] %vm784_vm0, %v4758_v1  ;;  %816 = vst.msk [vmem:[#allocation3 + $0xf8] sm:$0xff] %vm784_vm0, %v4758_v1 }
 0x294   : > { %4068 = vmatprep.mubr.bf16.mxu0 %v5156_v6 }
 0x296   : > { %3823 = vmatmul.mubr.bf16.gmra.mrb[92].mxu1 %v5219_v44 }
 0x297   : > { %3824 = vmatprep.mubr.bf16.mxu1 %v5240_v18 }
 0x29b   : > { %4069 = vmatmul.mubr.bf16.gmra.mrb[28].mxu0 %v5161_v7 }
 0x29c   : > { %4072 = vmatprep.mubr.bf16.mxu0 %v5164_v8 }
 0x29e   : > { %3825 = vmatmul.mubr.bf16.gmra.mrb[96].mxu1 %v5240_v18 }
 0x29f   : > { %3826 = vmatprep.mubr.bf16.mxu1 %v5236_v0 }
 0x2a3   : > { %4073 = vmatmul.mubr.bf16.gmra.mrb[32].mxu0 %v5169_v9 }
 0x2a4   : > { %4076 = vmatprep.mubr.bf16.mxu0 %v5172_v10 }
 0x2a6   : > { %3827 = vmatmul.mubr.bf16.gmra.mrb[100].mxu1 %v5236_v0 }
 0x2a7   : > { %3828 = vmatprep.mubr.bf16.mxu1 %v5252_v38 }
 0x2ab   : > { %4077 = vmatmul.mubr.bf16.gmra.mrb[36].mxu0 %v5177_v11 }
 0x2ac   : > { %4080 = vmatprep.mubr.bf16.mxu0 %v5180_v12 }
 0x2ae   : > { %3829 = vmatmul.mubr.bf16.gmra.mrb[104].mxu1 %v5252_v38 }
 0x2af   : > { %3830 = vmatprep.mubr.bf16.mxu1 %v5249_v36 }
 0x2b3   : > { %4081 = vmatmul.mubr.bf16.gmra.mrb[40].mxu0 %v5185_v13 }
 0x2b4   : > { %4084 = vmatprep.mubr.bf16.mxu0 %v5188_v14 }
 0x2b6   : > { %3831 = vmatmul.mubr.bf16.gmra.mrb[108].mxu1 %v5249_v36 }
 0x2bb   : > { %4085 = vmatmul.mubr.bf16.gmra.mrb[44].mxu0 %v5193_v15 }
 0x311   : > { %v5420_v2 = vpop.f32.mrb[48].mxu1 }
 0x312   : > { %v5422_v3 = vpop.f32.mrb[49].mxu1 }
 0x313   : > { %v5424_v4 = vpop.f32.mrb[50].mxu1  ;;  %v1730_v5 = vmax.f32 %v5420_v2, %v5422_v3 }
 0x314   : > { %v5428_v6 = vpop.f32.mrb[51].mxu1 }
 0x315   : > { %1731 = vmax.xlane.f32.xlu0 %v1730_v5  ;;  %v1733_v7 = vmax.f32 %v5424_v4, %v5428_v6 }
 0x319   : > { %1734 = vmax.xlane.f32.xlu0 %v1733_v7  ;;  %v5432_v8 = vpop.f32.mrb[52].mxu1 }
 0x31a   : > { %v5434_v9 = vpop.f32.mrb[53].mxu1 }
 0x31b   : > { %v5436_v10 = vpop.f32.mrb[54].mxu1  ;;  %v1736_v11 = vmax.f32 %v5432_v8, %v5434_v9 }
 0x31c   : > { %v5440_v12 = vpop.f32.mrb[55].mxu1 }
 0x31d   : > { %1737 = vmax.xlane.f32.xlu1 %v1736_v11  ;;  %v1739_v13 = vmax.f32 %v5436_v10, %v5440_v12 }
 0x321   : > { %1740 = vmax.xlane.f32.xlu1 %v1739_v13  ;;  %v5444_v14 = vpop.f32.mrb[56].mxu1 }
 0x322   : > { %v5446_v15 = vpop.f32.mrb[57].mxu1 }
 0x323   : > { %v5448_v25 = vpop.f32.mrb[58].mxu1  ;;  %v1742_v44 = vmax.f32 %v5444_v14, %v5446_v15 }
 0x324   : > { %6884 = vst [vmem:[#allocation25_spill] sm:$0xff] %v5448_v25  ;;  %v5452_v46 = vpop.f32.mrb[59].mxu1 }
 0x325   : > { %6885 = vst [vmem:[#allocation26_spill] sm:$0xff] %v5452_v46  ;;  %1743 = vmax.xlane.f32.xlu0 %v1742_v44  ;;  %v1745_v0 = vmax.f32 %v5448_v25, %v5452_v46 }
 0x327   : > { %1746 = vmax.xlane.f32.xlu1 %v1745_v0 }
 0x329   : > { %v5456_v17 = vpop.f32.mrb[60].mxu1 }
 0x32a   : > { %6886 = vst [vmem:[#allocation27_spill] sm:$0xff] %v5456_v17  ;;  %v5458_v18 = vpop.f32.mrb[61].mxu1 }
 0x32b   : > { %6887 = vst [vmem:[#allocation28_spill] sm:$0xff] %v5458_v18  ;;  %v5460_v36 = vpop.f32.mrb[62].mxu1  ;;  %v1748_v38 = vmax.f32 %v5456_v17, %v5458_v18  ;;  %v5965_v18 = vld [vmem:[#allocation3 + $0xc8] sm:$0xff]  ;;  %v5979_v17 = vld [vmem:[#allocation3 + $0xd0] sm:$0xff] }
 0x32c   : > { %6888 = vst [vmem:[#allocation29_spill] sm:$0xff] %v5460_v36  ;;  %v5464_v39 = vpop.f32.mrb[63].mxu1  ;;  %6947 = vst [vmem:[#allocation84_spill] sm:$0xff] %v5965_v18 }
 0x32d   : > { %6889 = vst [vmem:[#allocation30_spill] sm:$0xff] %v5464_v39  ;;  %1749 = vmax.xlane.f32.xlu0 %v1748_v38  ;;  %v1751_v40 = vmax.f32 %v5460_v36, %v5464_v39  ;;  %6950 = vst [vmem:[#allocation87_spill] sm:$0xff] %v5979_v17 }
 0x32f   : > { %1752 = vmax.xlane.f32.xlu1 %v1751_v40 }
 0x331   : > { %v5500_v32 = vpop.f32.mrb[64].mxu1 }
 0x332   : > { %6890 = vst [vmem:[#allocation31_spill] sm:$0xff] %v5500_v32  ;;  %v5502_v33 = vpop.f32.mrb[65].mxu1 }
 0x333   : > { %6891 = vst [vmem:[#allocation32_spill] sm:$0xff] %v5502_v33  ;;  %v5504_v52 = vpop.f32.mrb[66].mxu1  ;;  %v1754_v53 = vmax.f32 %v5500_v32, %v5502_v33  ;;  %v5945_v33 = vld [vmem:[#allocation3 + $0xb8] sm:$0xff] }
 0x334   : > { %6892 = vst [vmem:[#allocation33_spill] sm:$0xff] %v5504_v52  ;;  %v5508_v22 = vpop.f32.mrb[67].mxu1  ;;  %6943 = vst [vmem:[#allocation80_spill] sm:$0xff] %v5945_v33 }
 0x335   : > { %6893 = vst [vmem:[#allocation34_spill] sm:$0xff] %v5508_v22  ;;  %1755 = vmax.xlane.f32.xlu0 %v1754_v53  ;;  %v1757_v23 = vmax.f32 %v5504_v52, %v5508_v22 }
 0x337   : > { %1758 = vmax.xlane.f32.xlu1 %v1757_v23 }
 0x339   : > { %v5512_v61 = vpop.f32.mrb[68].mxu1 }
 0x33a   : > { %6894 = vst [vmem:[#allocation35_spill] sm:$0xff] %v5512_v61  ;;  %v5514_v20 = vpop.f32.mrb[69].mxu1 }
 0x33b   : > { %6895 = vst [vmem:[#allocation36_spill] sm:$0xff] %v5514_v20  ;;  %v5516_v21 = vpop.f32.mrb[70].mxu1  ;;  %v1760_v24 = vmax.f32 %v5512_v61, %v5514_v20  ;;  %v5925_v20 = vld [vmem:[#allocation3 + $0xa8] sm:$0xff] }
 0x33c   : > { %6896 = vst [vmem:[#allocation37_spill] sm:$0xff] %v5516_v21  ;;  %v5520_v55 = vpop.f32.mrb[71].mxu1 }
 0x33d   : > { %6897 = vst [vmem:[#allocation38_spill] sm:$0xff] %v5520_v55  ;;  %1761 = vmax.xlane.f32.xlu0 %v1760_v24  ;;  %v1763_v27 = vmax.f32 %v5516_v21, %v5520_v55 }
 0x33f   : > { %1764 = vmax.xlane.f32.xlu1 %v1763_v27 }
 0x341   : > { %v5524_v28 = vpop.f32.mrb[72].mxu1 }
 0x342   : > { %6898 = vst [vmem:[#allocation39_spill] sm:$0xff] %v5524_v28  ;;  %v5526_v30 = vpop.f32.mrb[73].mxu1 }
 0x343   : > { %6899 = vst [vmem:[#allocation40_spill] sm:$0xff] %v5526_v30  ;;  %v5528_v34 = vpop.f32.mrb[74].mxu1  ;;  %v1766_v35 = vmax.f32 %v5524_v28, %v5526_v30  ;;  %v5905_v30 = vld [vmem:[#allocation3 + $0x98] sm:$0xff] }
 0x344   : > { %6900 = vst [vmem:[#allocation41_spill] sm:$0xff] %v5528_v34  ;;  %v5532_v37 = vpop.f32.mrb[75].mxu1 }
 0x345   : > { %6901 = vst [vmem:[#allocation42_spill] sm:$0xff] %v5532_v37  ;;  %1767 = vmax.xlane.f32.xlu0 %v1766_v35  ;;  %v1769_v41 = vmax.f32 %v5528_v34, %v5532_v37 }
 0x347   : > { %1770 = vmax.xlane.f32.xlu1 %v1769_v41 }
 0x349   : > { %v5536_v47 = vpop.f32.mrb[76].mxu1 }
 0x34a   : > { %6902 = vst [vmem:[#allocation43_spill] sm:$0xff] %v5536_v47  ;;  %v5538_v48 = vpop.f32.mrb[77].mxu1 }
 0x34b   : > { %6903 = vst [vmem:[#allocation44_spill] sm:$0xff] %v5538_v48  ;;  %v5540_v51 = vpop.f32.mrb[78].mxu1  ;;  %v1772_v49 = vmax.f32 %v5536_v47, %v5538_v48  ;;  %v5885_v48 = vld [vmem:[#allocation3 + $0x88] sm:$0xff] }
 0x34c   : > { %6904 = vst [vmem:[#allocation45_spill] sm:$0xff] %v5540_v51  ;;  %v5544_v50 = vpop.f32.mrb[79].mxu1 }
 0x34d   : > { %6905 = vst [vmem:[#allocation46_spill] sm:$0xff] %v5544_v50  ;;  %1773 = vmax.xlane.f32.xlu0 %v1772_v49  ;;  %v1775_v54 = vmax.f32 %v5540_v51, %v5544_v50 }
 0x34f   : > { %1776 = vmax.xlane.f32.xlu1 %v1775_v54 }
 0x351   : > { %v5548_v16 = vpop.f32.mrb[80].mxu1 }
 0x352   : > { %6906 = vst [vmem:[#allocation47_spill] sm:$0xff] %v5548_v16  ;;  %v5550_v56 = vpop.f32.mrb[81].mxu1 }
 0x353   : > { %6907 = vst [vmem:[#allocation48_spill] sm:$0xff] %v5550_v56  ;;  %v5552_v57 = vpop.f32.mrb[82].mxu1  ;;  %v1778_v58 = vmax.f32 %v5548_v16, %v5550_v56  ;;  %v5865_v56 = vld [vmem:[#allocation3 + $0x78] sm:$0xff] }
 0x354   : > { %6908 = vst [vmem:[#allocation49_spill] sm:$0xff] %v5552_v57  ;;  %v5556_v59 = vpop.f32.mrb[83].mxu1 }
 0x355   : > { %6909 = vst [vmem:[#allocation50_spill] sm:$0xff] %v5556_v59  ;;  %1779 = vmax.xlane.f32.xlu0 %v1778_v58  ;;  %v1781_v31 = vmax.f32 %v5552_v57, %v5556_v59 }
 0x357   : > { %1782 = vmax.xlane.f32.xlu1 %v1781_v31 }
 0x359   : > { %v5560_v60 = vpop.f32.mrb[84].mxu1 }
 0x35a   : > { %6910 = vst [vmem:[#allocation51_spill] sm:$0xff] %v5560_v60  ;;  %v5562_v42 = vpop.f32.mrb[85].mxu1 }
 0x35b   : > { %6911 = vst [vmem:[#allocation52_spill] sm:$0xff] %v5562_v42  ;;  %v5564_v62 = vpop.f32.mrb[86].mxu1  ;;  %v1784_v19 = vmax.f32 %v5560_v60, %v5562_v42 }
 0x35c   : > { %6912 = vst [vmem:[#allocation53_spill] sm:$0xff] %v5564_v62  ;;  %v5568_v43 = vpop.f32.mrb[87].mxu1 }
 0x35d   : > { %6913 = vst [vmem:[#allocation54_spill] sm:$0xff] %v5568_v43  ;;  %1785 = vmax.xlane.f32.xlu0 %v1784_v19  ;;  %v1787_v45 = vmax.f32 %v5564_v62, %v5568_v43 }
 0x35f   : > { %1788 = vmax.xlane.f32.xlu1 %v1787_v45 }
 0x361   : > { %v5572_v26 = vpop.f32.mrb[88].mxu1 }
 0x362   : > { %6914 = vst [vmem:[#allocation55_spill] sm:$0xff] %v5572_v26  ;;  %v5574_v1 = vpop.f32.mrb[89].mxu1 }
 0x363   : > { %6915 = vst [vmem:[#allocation56_spill] sm:$0xff] %v5574_v1  ;;  %v5576_v5 = vpop.f32.mrb[90].mxu1  ;;  %v1790_v7 = vmax.f32 %v5572_v26, %v5574_v1 }
 0x364   : > { %6916 = vst [vmem:[#allocation57_spill] sm:$0xff] %v5576_v5  ;;  %v5580_v11 = vpop.f32.mrb[91].mxu1 }
 0x365   : > { %6917 = vst [vmem:[#allocation58_spill] sm:$0xff] %v5580_v11  ;;  %1791 = vmax.xlane.f32.xlu0 %v1790_v7  ;;  %v1793_v13 = vmax.f32 %v5576_v5, %v5580_v11 }
 0x367   : > { %1794 = vmax.xlane.f32.xlu1 %v1793_v13 }
 0x369   : > { %v5584_v44 = vpop.f32.mrb[92].mxu1 }
 0x36a   : > { %6918 = vst [vmem:[#allocation59_spill] sm:$0xff] %v5584_v44  ;;  %v5586_v63 = vpop.f32.mrb[93].mxu1 }
 0x36b   : > { %6919 = vst [vmem:[#allocation60_spill] sm:$0xff] %v5586_v63  ;;  %v5588_v0 = vpop.f32.mrb[94].mxu1  ;;  %v1796_v38 = vmax.f32 %v5584_v44, %v5586_v63 }
 0x36c   : > { %6920 = vst [vmem:[#allocation61_spill] sm:$0xff] %v5588_v0  ;;  %v5592_v40 = vpop.f32.mrb[95].mxu1 }
 0x36d   : > { %6921 = vst [vmem:[#allocation62_spill] sm:$0xff] %v5592_v40  ;;  %1797 = vmax.xlane.f32.xlu0 %v1796_v38  ;;  %v1799_v29 = vmax.f32 %v5588_v0, %v5592_v40 }
 0x36f   : > { %1800 = vmax.xlane.f32.xlu1 %v1799_v29 }
 0x371   : > { %v5596_v53 = vpop.f32.mrb[96].mxu1 }
 0x372   : > { %6922 = vst [vmem:[#allocation63_spill] sm:$0xff] %v5596_v53  ;;  %v5598_v23 = vpop.f32.mrb[97].mxu1 }
 0x373   : > { %6923 = vst [vmem:[#allocation64_spill] sm:$0xff] %v5598_v23  ;;  %v5600_v24 = vpop.f32.mrb[98].mxu1  ;;  %v1802_v27 = vmax.f32 %v5596_v53, %v5598_v23 }
 0x374   : > { %6924 = vst [vmem:[#allocation65_spill] sm:$0xff] %v5600_v24  ;;  %v5604_v35 = vpop.f32.mrb[99].mxu1 }
 0x375   : > { %6925 = vst [vmem:[#allocation66_spill] sm:$0xff] %v5604_v35  ;;  %1803 = vmax.xlane.f32.xlu0 %v1802_v27  ;;  %v1805_v41 = vmax.f32 %v5600_v24, %v5604_v35  ;;  %v4058_v27 = vpop.f32.mrb[16].mxu0  ;;  %v5637_v24 = vld [vmem:[%s6771_s7] ss:$0 sm:$0xff] }
 0x377   : > { %1806 = vmax.xlane.f32.xlu1 %v1805_v41 }
 0x379   : > { %v5608_v49 = vpop.f32.mrb[100].mxu1 }
 0x37a   : > { %6926 = vst [vmem:[#allocation67_spill] sm:$0xff] %v5608_v49  ;;  %v5610_v54 = vpop.f32.mrb[101].mxu1 }
 0x37b   : > { %6927 = vst [vmem:[#allocation68_spill] sm:$0xff] %v5610_v54  ;;  %v5612_v58 = vpop.f32.mrb[102].mxu1  ;;  %v1808_v31 = vmax.f32 %v5608_v49, %v5610_v54  ;;  %v1346_v54 = vpop.f32.mrb[17].mxu0 }
 0x37c   : > { %6928 = vst [vmem:[#allocation69_spill] sm:$0xff] %v5612_v58  ;;  %v5616_v19 = vpop.f32.mrb[103].mxu1  ;;  %v4059_v49 = vpop.f32.mrb[18].mxu0  ;;  %v1347_v23 = vadd.f32 %v5637_v24, %v1346_v54 }
 0x37d   : > { %6929 = vst [vmem:[#allocation70_spill] sm:$0xff] %v5616_v19  ;;  %1809 = vmax.xlane.f32.xlu0 %v1808_v31  ;;  %v1811_v45 = vmax.f32 %v5612_v58, %v5616_v19  ;;  %v1349_v19 = vpop.f32.mrb[19].mxu0  ;;  %v1358_v53 = vadd.f32 %v4059_v49, %v5637_v24 }
 0x37e   : > { %v1350_v40 = vadd.f32 %v5637_v24, %v1349_v19 }
 0x37f   : > { %1812 = vmax.xlane.f32.xlu1 %v1811_v45  ;;  %v4062_v45 = vpop.f32.mrb[20].mxu0 }
 0x380   : > { %v1362_v58 = vpop.f32.mrb[21].mxu0  ;;  %v5650_v0 = vadd.f32 %v4062_v45, %v5637_v24  ;;  %v2787_v19 = vpack.c.bf16 %v1350_v40, %v1347_v23 }
 0x381   : > { %v5620_v7 = vpop.f32.mrb[104].mxu1 }
 0x382   : > { %6930 = vst [vmem:[#allocation71_spill] sm:$0xff] %v5620_v7  ;;  %v5622_v13 = vpop.f32.mrb[105].mxu1 }
 0x383   : > { %6931 = vst [vmem:[#allocation72_spill] sm:$0xff] %v5622_v13  ;;  %v5624_v38 = vpop.f32.mrb[106].mxu1  ;;  %v1814_v29 = vmax.f32 %v5620_v7, %v5622_v13  ;;  %v4063_v13 = vpop.f32.mrb[22].mxu0 }
 0x384   : > { %6932 = vst [vmem:[#allocation73_spill] sm:$0xff] %v5624_v38  ;;  %v5628_v41 = vpop.f32.mrb[107].mxu1  ;;  %v5656_v54 = vadd.f32 %v4063_v13, %v5637_v24 }
 0x385   : > { %6933 = vst [vmem:[#allocation74_spill] sm:$0xff] %v5628_v41  ;;  %1815 = vmax.xlane.f32.xlu0 %v1814_v29  ;;  %v1817_v31 = vmax.f32 %v5624_v38, %v5628_v41  ;;  %v1355_v29 = vadd.f32 %v4058_v27, %v5637_v24  ;;  %v1365_v41 = vpop.f32.mrb[23].mxu0  ;;  %v1363_v27 = vadd.f32 %v5637_v24, %v1362_v58 }
 0x386   : > { %v4066_v63 = vpop.f32.mrb[24].mxu0  ;;  %v1366_v11 = vadd.f32 %v5637_v24, %v1365_v41 }
 0x387   : > { %1818 = vmax.xlane.f32.xlu1 %v1817_v31  ;;  %v1378_v5 = vpop.f32.mrb[25].mxu0  ;;  %v2788_v49 = vpack.c.bf16 %v1358_v53, %v1355_v29  ;;  %v5664_v13 = vadd.f32 %v4066_v63, %v5637_v24 }
 0x388   : > { %v2789_v1 = vpack.c.bf16 %v1366_v11, %v1363_v27  ;;  %v5667_v41 = vadd.f32 %v5637_v24, %v1378_v5 }
 0x389   : > { %v5632_v35 = vpop.f32.mrb[108].mxu1 }
 0x38a   : > { %6934 = vst [vmem:[#allocation75_spill] sm:$0xff] %v5632_v35  ;;  %v5639_v7 = vpop.f32.mrb[109].mxu1 }
 0x38b   : > { %6935 = vst [vmem:[#allocation76_spill] sm:$0xff] %v5639_v7  ;;  %v5643_v38 = vpop.f32.mrb[110].mxu1  ;;  %v1820_v31 = vmax.f32 %v5632_v35, %v5639_v7  ;;  %v4067_v35 = vpop.f32.mrb[26].mxu0 }
 0x38c   : > { %6936 = vst [vmem:[#allocation77_spill] sm:$0xff] %v5643_v38  ;;  %v5652_v44 = vpop.f32.mrb[111].mxu1  ;;  %v1381_v26 = vpop.f32.mrb[27].mxu0  ;;  %v5670_v53 = vadd.f32 %v4067_v35, %v5637_v24 }
 0x38d   : > { %6937 = vst [vmem:[#allocation78_spill] sm:$0xff] %v5652_v44  ;;  %v1823_v7 = vmax.f32 %v5643_v38, %v5652_v44  ;;  %1821 = vmax.xlane.f32.xlu0 %v1820_v31  ;;  %v4070_v58 = vpop.f32.mrb[28].mxu0  ;;  %v5673_v40 = vadd.f32 %v5637_v24, %v1381_v26 }
 0x38e   : > { %v1394_v43 = vpop.f32.mrb[29].mxu0  ;;  %v5676_v11 = vadd.f32 %v4070_v58, %v5637_v24 }
 0x38f   : > { %1824 = vmax.xlane.f32.xlu1 %v1823_v7  ;;  %v4071_v62 = vpop.f32.mrb[30].mxu0  ;;  %v5679_v23 = vadd.f32 %v5637_v24, %v1394_v43  ;;  %v2791_v26 = vpack.c.bf16 %v5673_v40, %v5667_v41 }
 0x390   : > { %v1397_v44 = vpop.f32.mrb[31].mxu0  ;;  %v5682_v63 = vadd.f32 %v4071_v62, %v5637_v24 }
 0x391   : > { %v4074_v7 = vpop.f32.mrb[32].mxu0  ;;  %v5685_v5 = vadd.f32 %v5637_v24, %v1397_v44 }
 0x392   : > { %v1410_v29 = vpop.f32.mrb[33].mxu0  ;;  %v1419_v45 = vadd.f32 %v4074_v7, %v5637_v24 }
 0x393   : > { %v4075_v31 = vpop.f32.mrb[34].mxu0  ;;  %v1411_v62 = vadd.f32 %v5637_v24, %v1410_v29  ;;  %v5701_v29 = vld [vmem:[#allocation3] sm:$0xff] }
 0x394   : > { %v1413_v58 = vpop.f32.mrb[35].mxu0  ;;  %v1422_v35 = vadd.f32 %v4075_v31, %v5637_v24 }
 0x395   : > { %v1414_v44 = vadd.f32 %v5637_v24, %v1413_v58  ;;  %v4078_v42 = vpop.f32.mrb[36].mxu0 }
 0x396   : > { %v1426_v41 = vpop.f32.mrb[37].mxu0  ;;  %v2796_v40 = vpack.c.bf16 %v1422_v35, %v1419_v45  ;;  %v1435_v7 = vadd.f32 %v4078_v42, %v5637_v24  ;;  %v5708_v45 = vld [vmem:[#allocation3 + $0x8] sm:$0xff] }
 0x397   : > { %v2795_v38 = vpack.c.bf16 %v1414_v44, %v1411_v62  ;;  %v4079_v60 = vpop.f32.mrb[38].mxu0  ;;  %v1427_v59 = vadd.f32 %v5637_v24, %v1426_v41  ;;  %v5719_v41 = vld [vmem:[#allocation3 + $0x10] sm:$0xff] }
 0x398   : > { %v1429_v27 = vpop.f32.mrb[39].mxu0 }
 0x399   : > { %3832 = vmatprep.subr.bf16.mxu0 %v2795_v38  ;;  %v1430_v43 = vadd.f32 %v5637_v24, %v1429_v27  ;;  %v1438_v38 = vadd.f32 %v4079_v60, %v5637_v24 }
 0x39a   : > { %3833 = vmatpush3.bf16.msra.mxu0 %v2787_v19  ;;  %v4082_v19 = vpop.f32.mrb[40].mxu0 }
 0x39b   : > { %3834 = vmatprep.subr.bf16.mxu0 %v2796_v40  ;;  %v2797_v58 = vpack.c.bf16 %v1430_v43, %v1427_v59  ;;  %v1442_v35 = vpop.f32.mrb[41].mxu0  ;;  %v2798_v59 = vpack.c.bf16 %v1438_v38, %v1435_v7 }
 0x39c   : > { %v4083_v43 = vpop.f32.mrb[42].mxu0 }
 0x39d   : > { %v1445_v44 = vpop.f32.mrb[43].mxu0  ;;  %v1454_v38 = vadd.f32 %v4083_v43, %v5637_v24 }
 0x39e   : > { %3835 = vmatpush3.bf16.msra.mxu0 %v2788_v49  ;;  %v1443_v49 = vadd.f32 %v5637_v24, %v1442_v35  ;;  %v1446_v40 = vadd.f32 %v5637_v24, %v1445_v44 }
 0x39f   : > { %3836 = vmatprep.subr.bf16.mxu0 %v2797_v58  ;;  %v6938_v58 = vpack.c.bf16 %v5656_v54, %v5650_v0  ;;  %v4086_v0 = vpop.f32.mrb[44].mxu0 }
 0x3a0   : > { %v2799_v35 = vpack.c.bf16 %v1446_v40, %v1443_v49  ;;  %v1458_v44 = vpop.f32.mrb[45].mxu0 }
 0x3a1   : > { %v1459_v49 = vadd.f32 %v5637_v24, %v1458_v44  ;;  %v4087_v40 = vpop.f32.mrb[46].mxu0  ;;  %v5758_v44 = vld [vmem:[#allocation3 + $0x28] sm:$0xff] }
 0x3a2   : > { %v1732_v62 = vpop.xlane.xlu0 %1731  ;;  %3837 = vmatpush3.bf16.msra.mxu0 %v2789_v1  ;;  %v1451_v1 = vadd.f32 %v4082_v19, %v5637_v24 }
 0x3a3   : > { %v5705_v31 = vmax.f32 %v5701_v29, %v1732_v62  ;;  %3838 = vmatprep.subr.bf16.mxu0 %v2798_v59  ;;  %v5735_v59 = vld [vmem:[#allocation3 + $0x18] sm:$0xff] }
 0x3a5   : > { %3028 = vst.msk [vmem:[#allocation3] sm:$0xff] %vm784_vm0, %v5705_v31  ;;  %1956 = vperm.xlu0 %4211, %v5705_v31  }
 0x3a6   : > { %v1735_v42 = vpop.xlane.xlu0 %1734  ;;  %3839 = vmatpush3.bf16.msra.mxu0 %v6938_v58 }
 0x3a7   : > { %v5717_v60 = vmax.f32 %v5708_v45, %v1735_v42  ;;  %v2800_v42 = vpack.c.bf16 %v1454_v38, %v1451_v1  ;;  %3840 = vmatprep.subr.bf16.mxu0 %v2799_v35  ;;  %v1461_v1 = vpop.f32.mrb[47].mxu0  ;;  %v1467_v38 = vadd.f32 %v4086_v0, %v5637_v24 }
 0x3a8   : > { %v1462_v35 = vadd.f32 %v5637_v24, %v1461_v1 }
 0x3a9   : > { %3029 = vst.msk [vmem:[#allocation3 + $0x8] sm:$0xff] %vm784_vm0, %v5717_v60  ;;  %1961 = vperm.xlu1 %4212, %v5717_v60  }
 0x3aa   : > { %v1738_v62 = vpop.xlane.xlu1 %1737  ;;  %3841 = vmatpush3.bf16.msra.mxu0 %v2791_v26  ;;  %v6939_v26 = vpack.c.bf16 %v5670_v53, %v5664_v13  ;;  %v2801_v0 = vpack.c.bf16 %v1462_v35, %v1459_v49  ;;  %v5779_v49 = vld [vmem:[#allocation3 + $0x30] sm:$0xff] }
 0x3ab   : > { %v5733_v19 = vmax.f32 %v5719_v41, %v1738_v62  ;;  %3842 = vmatprep.subr.bf16.mxu0 %v2800_v42  ;;  %v5746_v62 = vld [vmem:[#allocation3 + $0x20] sm:$0xff] }
 0x3ad   : > { %3030 = vst.msk [vmem:[#allocation3 + $0x10] sm:$0xff] %vm784_vm0, %v5733_v19  ;;  %1966 = vperm.xlu1 %4212, %v5733_v19  }
 0x3ae   : > { %v1741_v43 = vpop.xlane.xlu1 %1740  ;;  %3843 = vmatpush3.bf16.msra.mxu0 %v6939_v26 }
 0x3af   : > { %v5744_v58 = vmax.f32 %v5735_v59, %v1741_v43  ;;  %v1470_v43 = vadd.f32 %v4087_v40, %v5637_v24  ;;  %3844 = vmatprep.subr.bf16.mxu0 %v2801_v0  ;;  %v6940_v24 = vpack.c.bf16 %v5685_v5, %v5679_v23 }
 0x3b1   : > { %3031 = vst.msk [vmem:[#allocation3 + $0x18] sm:$0xff] %vm784_vm0, %v5744_v58  ;;  %1971 = vperm.xlu1 %4212, %v5744_v58   ;;  %v2802_v54 = vpack.c.bf16 %v1470_v43, %v1467_v38  ;;  %v5785_v38 = vld [vmem:[#allocation3 + $0x38] sm:$0xff] }
 0x3b2   : > { %v1744_v42 = vpop.xlane.xlu0 %1743  ;;  %3845 = vmatpush3.bf16.msra.mxu0 %v6940_v24  ;;  %v5825_v24 = vld [vmem:[#allocation3 + $0x58] sm:$0xff] }
 0x3b3   : > { %v5762_v1 = vmax.f32 %v5746_v62, %v1744_v42  ;;  %3846 = vmatprep.subr.bf16.mxu0 %v2802_v54  ;;  %v5805_v42 = vld [vmem:[#allocation3 + $0x48] sm:$0xff] }
 0x3b4   : > { %v1747_v27 = vpop.xlane.xlu1 %1746  ;;  %v5845_v54 = vld [vmem:[#allocation3 + $0x68] sm:$0xff] }
 0x3b5   : > { %3032 = vst.msk [vmem:[#allocation3 + $0x20] sm:$0xff] %vm784_vm0, %v5762_v1  ;;  %v5769_v13 = vmax.f32 %v5758_v44, %v1747_v27  ;;  %1976 = vperm.xlu1 %4212, %v5762_v1   ;;  %v6941_v27 = vpack.c.bf16 %v5682_v63, %v5676_v11  ;;  %v5802_v63 = vld [vmem:[#allocation3 + $0x40] sm:$0xff] }
 0x3b7   : > { %3033 = vst.msk [vmem:[#allocation3 + $0x28] sm:$0xff] %vm784_vm0, %v5769_v13  ;;  %3847 = vmatpush3.bf16.msra.mxu0 %v6941_v27 }
 0x3b9   : > { %1981 = vperm.xlu1 %4212, %v5769_v13  }
 0x3ba   : > { %v1750_v40 = vpop.xlane.xlu0 %1749 }
 0x3bb   : > { %v5788_v23 = vmax.f32 %v5779_v49, %v1750_v40 }
 0x3bc   : > { %v1753_v5 = vpop.xlane.xlu1 %1752 }
 0x3bd   : > { %3034 = vst.msk [vmem:[#allocation3 + $0x30] sm:$0xff] %vm784_vm0, %v5788_v23  ;;  %v5795_v35 = vmax.f32 %v5785_v38, %v1753_v5  ;;  %1986 = vperm.xlu1 %4212, %v5788_v23   ;;  %v5823_v5 = vld [vmem:[#allocation3 + $0x50] sm:$0xff] }
 0x3bf   : > { %3035 = vst.msk [vmem:[#allocation3 + $0x38] sm:$0xff] %vm784_vm0, %v5795_v35 }
 0x3c1   : > { %1991 = vperm.xlu1 %4212, %v5795_v35  }
 0x3c2   : > { %v1756_v26 = vpop.xlane.xlu0 %1755 }
 0x3c3   : > { %v5808_v43 = vmax.f32 %v5802_v63, %v1756_v26 }
 0x3c4   : > { %v1759_v0 = vpop.xlane.xlu1 %1758 }
 0x3c5   : > { %3036 = vst.msk [vmem:[#allocation3 + $0x40] sm:$0xff] %vm784_vm0, %v5808_v43  ;;  %v5815_v27 = vmax.f32 %v5805_v42, %v1759_v0  ;;  %1996 = vperm.xlu1 %4212, %v5808_v43  }
 0x3c7   : > { %3037 = vst.msk [vmem:[#allocation3 + $0x48] sm:$0xff] %vm784_vm0, %v5815_v27  ;;  %2001 = vperm.xlu0 %4211, %v5815_v27  }
 0x3ca   : > { %v1762_v26 = vpop.xlane.xlu0 %1761 }
 0x3cb   : > { %v5828_v11 = vmax.f32 %v5823_v5, %v1762_v26  ;;  %v5843_v26 = vld [vmem:[#allocation3 + $0x60] sm:$0xff] }
 0x3cc   : > { %v1765_v0 = vpop.xlane.xlu1 %1764 }
 0x3cd   : > { %3038 = vst.msk [vmem:[#allocation3 + $0x50] sm:$0xff] %vm784_vm0, %v5828_v11  ;;  %v5835_v40 = vmax.f32 %v5825_v24, %v1765_v0  ;;  %2006 = vperm.xlu1 %4212, %v5828_v11  }
 0x3cf   : > { %3039 = vst.msk [vmem:[#allocation3 + $0x58] sm:$0xff] %vm784_vm0, %v5835_v40  ;;  %2011 = vperm.xlu0 %4211, %v5835_v40  }
 0x3d2   : > { %v1768_v7 = vpop.xlane.xlu0 %1767 }
 0x3d3   : > { %v5848_v57 = vmax.f32 %v5843_v26, %v1768_v7  ;;  %v5863_v7 = vld [vmem:[#allocation3 + $0x70] sm:$0xff] }
 0x3d4   : > { %v1771_v0 = vpop.xlane.xlu1 %1770 }
 0x3d5   : > { %3040 = vst.msk [vmem:[#allocation3 + $0x60] sm:$0xff] %vm784_vm0, %v5848_v57  ;;  %v5855_v53 = vmax.f32 %v5845_v54, %v1771_v0  ;;  %2016 = vperm.xlu1 %4212, %v5848_v57  }
 0x3d7   : > { %3041 = vst.msk [vmem:[#allocation3 + $0x68] sm:$0xff] %vm784_vm0, %v5855_v53  ;;  %2021 = vperm.xlu0 %4211, %v5855_v53  }
 0x3da   : > { %v1774_v50 = vpop.xlane.xlu0 %1773 }
 0x3db   : > { %v5868_v51 = vmax.f32 %v5863_v7, %v1774_v50  ;;  %v5883_v50 = vld [vmem:[#allocation3 + $0x80] sm:$0xff] }
 0x3dc   : > { %v1777_v0 = vpop.xlane.xlu1 %1776 }
 0x3dd   : > { %3042 = vst.msk [vmem:[#allocation3 + $0x70] sm:$0xff] %vm784_vm0, %v5868_v51  ;;  %v5875_v16 = vmax.f32 %v5865_v56, %v1777_v0  ;;  %2026 = vperm.xlu1 %4212, %v5868_v51  }
 0x3df   : > { %3043 = vst.msk [vmem:[#allocation3 + $0x78] sm:$0xff] %vm784_vm0, %v5875_v16  ;;  %2031 = vperm.xlu0 %4211, %v5875_v16  }
 0x3e2   : > { %v1780_v37 = vpop.xlane.xlu0 %1779 }
 0x3e3   : > { %v5888_v34 = vmax.f32 %v5883_v50, %v1780_v37  ;;  %v5903_v37 = vld [vmem:[#allocation3 + $0x90] sm:$0xff] }
 0x3e4   : > { %v1783_v0 = vpop.xlane.xlu1 %1782 }
 0x3e5   : > { %3044 = vst.msk [vmem:[#allocation3 + $0x80] sm:$0xff] %vm784_vm0, %v5888_v34  ;;  %v5895_v47 = vmax.f32 %v5885_v48, %v1783_v0  ;;  %2036 = vperm.xlu1 %4212, %v5888_v34  }
 0x3e7   : > { %3045 = vst.msk [vmem:[#allocation3 + $0x88] sm:$0xff] %vm784_vm0, %v5895_v47  ;;  %2041 = vperm.xlu0 %4211, %v5895_v47  }
 0x3ea   : > { %v1786_v55 = vpop.xlane.xlu0 %1785 }
 0x3eb   : > { %v5908_v21 = vmax.f32 %v5903_v37, %v1786_v55  ;;  %v5923_v55 = vld [vmem:[#allocation3 + $0xa0] sm:$0xff] }
 0x3ec   : > { %v1789_v0 = vpop.xlane.xlu1 %1788 }
 0x3ed   : > { %3046 = vst.msk [vmem:[#allocation3 + $0x90] sm:$0xff] %vm784_vm0, %v5908_v21  ;;  %v5915_v28 = vmax.f32 %v5905_v30, %v1789_v0  ;;  %2046 = vperm.xlu1 %4212, %v5908_v21  }
 0x3ef   : > { %3047 = vst.msk [vmem:[#allocation3 + $0x98] sm:$0xff] %vm784_vm0, %v5915_v28  ;;  %2051 = vperm.xlu0 %4211, %v5915_v28  }
 0x3f2   : > { %v1792_v22 = vpop.xlane.xlu0 %1791 }
 0x3f3   : > { %v5928_v52 = vmax.f32 %v5923_v55, %v1792_v22  ;;  %v5943_v22 = vld [vmem:[#allocation3 + $0xb0] sm:$0xff] }
 0x3f4   : > { %v1795_v0 = vpop.xlane.xlu1 %1794  ;;  %6942 = vst [vmem:[#allocation79_spill] sm:$0xff] %v5943_v22 }
 0x3f5   : > { %3048 = vst.msk [vmem:[#allocation3 + $0xa0] sm:$0xff] %vm784_vm0, %v5928_v52  ;;  %v5935_v61 = vmax.f32 %v5925_v20, %v1795_v0  ;;  %2056 = vperm.xlu1 %4212, %v5928_v52  }
 0x3f7   : > { %3049 = vst.msk [vmem:[#allocation3 + $0xa8] sm:$0xff] %vm784_vm0, %v5935_v61  ;;  %2061 = vperm.xlu0 %4211, %v5935_v61  }
 0x3fa   : > { %v1798_v39 = vpop.xlane.xlu0 %1797 }
 0x3fb   : > { %v5948_v36 = vmax.f32 %v5943_v22, %v1798_v39  ;;  %v5963_v39 = vld [vmem:[#allocation3 + $0xc0] sm:$0xff] }
 0x3fc   : > { %v1801_v0 = vpop.xlane.xlu1 %1800  ;;  %6946 = vst [vmem:[#allocation83_spill] sm:$0xff] %v5963_v39 }
 0x3fd   : > { %6944 = vst [vmem:[#allocation81_spill] sm:$0xff] %v5948_v36  ;;  %3050 = vst.msk [vmem:[#allocation3 + $0xb0] sm:$0xff] %vm784_vm0, %v5948_v36  ;;  %v5955_v32 = vmax.f32 %v5945_v33, %v1801_v0  ;;  %2066 = vperm.xlu1 %4212, %v5948_v36   ;;  %v5981_v33 = vld [vmem:[#allocation3 + $0xd8] sm:$0xff] }
 0x3fe   : > { %6951 = vst [vmem:[#allocation88_spill] sm:$0xff] %v5981_v33 }
 0x3ff   : > { %6945 = vst [vmem:[#allocation82_spill] sm:$0xff] %v5955_v32  ;;  %3051 = vst.msk [vmem:[#allocation3 + $0xb8] sm:$0xff] %vm784_vm0, %v5955_v32  ;;  %2071 = vperm.xlu0 %4211, %v5955_v32  }
 0x402   : > { %v1804_v46 = vpop.xlane.xlu0 %1803 }
 0x403   : > { %v5968_v25 = vmax.f32 %v5963_v39, %v1804_v46 }
 0x404   : > { %v1807_v0 = vpop.xlane.xlu1 %1806 }
 0x405   : > { %6948 = vst [vmem:[#allocation85_spill] sm:$0xff] %v5968_v25  ;;  %3052 = vst.msk [vmem:[#allocation3 + $0xc0] sm:$0xff] %vm784_vm0, %v5968_v25  ;;  %v5973_v36 = vmax.f32 %v5965_v18, %v1807_v0  ;;  %2076 = vperm.xlu1 %4212, %v5968_v25   ;;  %v5995_v18 = vld [vmem:[#allocation3 + $0xe0] sm:$0xff]  ;;  %v6000_v25 = vld [vmem:[#allocation3 + $0xe8] sm:$0xff] }
 0x407   : > { %6949 = vst [vmem:[#allocation86_spill] sm:$0xff] %v5973_v36  ;;  %3053 = vst.msk [vmem:[#allocation3 + $0xc8] sm:$0xff] %vm784_vm0, %v5973_v36  ;;  %2081 = vperm.xlu0 %4211, %v5973_v36  }
 0x40a   : > { %v1810_v32 = vpop.xlane.xlu0 %1809 }
 0x40b   : > { %v5984_v46 = vmax.f32 %v5979_v17, %v1810_v32  ;;  %v6954_v32 = vsub.f32 %v5708_v45, %v5717_v60  ;;  %v6956_v45 = vsub.f32 %v5719_v41, %v5733_v19  ;;  %v6028_v41 = vld [vmem:[#allocation3 + $0xf8] sm:$0xff] }
 0x40c   : > { %v1813_v39 = vpop.xlane.xlu1 %1812 }
 0x40d   : > { %6952 = vst [vmem:[#allocation89_spill] sm:$0xff] %v5984_v46  ;;  %3054 = vst.msk [vmem:[#allocation3 + $0xd0] sm:$0xff] %vm784_vm0, %v5984_v46  ;;  %v5989_v0 = vmax.f32 %v5981_v33, %v1813_v39  ;;  %2086 = vperm.xlu1 %4212, %v5984_v46   ;;  %v1892_v17 = vmul.f32 1.442695, %v6954_v32  ;;  %v6955_v39 = vsub.f32 %v5701_v29, %v5705_v31  ;;  %v1894_v60 = vmul.f32 1.442695, %v6956_v45 }
 0x40e   : > { %v6023_v31 = vld [vmem:[#allocation3 + $0xf0] sm:$0xff] }
 0x40f   : > { %6953 = vst [vmem:[#allocation90_spill] sm:$0xff] %v5989_v0  ;;  %3055 = vst.msk [vmem:[#allocation3 + $0xd8] sm:$0xff] %vm784_vm0, %v5989_v0  ;;  %2091 = vperm.xlu0 %4211, %v5989_v0   ;;  %v1890_v33 = vmul.f32 1.442695, %v6955_v39  ;;  %4253 = vpow2.f32 %v1892_v17  ;;  %v6958_v17 = vsub.f32 %v5746_v62, %v5762_v1  ;;  %v6961_v1 = vsub.f32 %v5785_v38, %v5795_v35 }
 0x410   : > { %v6964_v35 = vsub.f32 %v5823_v5, %v5828_v11  ;;  %v6967_v11 = vsub.f32 %v5845_v54, %v5855_v53 }
 0x411   : > { %4255 = vpow2.f32 %v1890_v33  ;;  %v6959_v33 = vsub.f32 %v5758_v44, %v5769_v13  ;;  %v6962_v44 = vsub.f32 %v5802_v63, %v5808_v43 }
 0x412   : > { %v1816_v36 = vpop.xlane.xlu0 %1815  ;;  %4257 = vpow2.f32 %v1894_v60  ;;  %v1904_v60 = vmul.f32 1.442695, %v6961_v1  ;;  %v1910_v63 = vmul.f32 1.442695, %v6964_v35  ;;  %v1916_v5 = vmul.f32 1.442695, %v6967_v11 }
 0x413   : > { %v6003_v22 = vmax.f32 %v5995_v18, %v1816_v36  ;;  %v6957_v36 = vsub.f32 %v5735_v59, %v5744_v58  ;;  %v1900_v39 = vmul.f32 1.442695, %v6959_v33  ;;  %v6960_v58 = vsub.f32 %v5779_v49, %v5788_v23 }
 0x414   : > { %v1819_v46 = vpop.xlane.xlu1 %1818  ;;  %v1906_v13 = vmul.f32 1.442695, %v6962_v44  ;;  %v6970_v1 = vsub.f32 %v5883_v50, %v5888_v34 }
 0x415   : > { %3056 = vst.msk [vmem:[#allocation3 + $0xe0] sm:$0xff] %vm784_vm0, %v6003_v22  ;;  %v6011_v0 = vmax.f32 %v6000_v25, %v1819_v46  ;;  %2096 = vperm.xlu1 %4212, %v6003_v22   ;;  %v1896_v29 = vmul.f32 1.442695, %v6957_v36  ;;  %v1898_v46 = vmul.f32 1.442695, %v6958_v17  ;;  %v6963_v36 = vsub.f32 %v5805_v42, %v5815_v27 }
 0x416   : > { %v1902_v45 = vmul.f32 1.442695, %v6960_v58 }
 0x417   : > { %3057 = vst.msk [vmem:[#allocation3 + $0xe8] sm:$0xff] %vm784_vm0, %v6011_v0  ;;  %2101 = vperm.xlu0 %4211, %v6011_v0   ;;  %4259 = vpow2.f32 %v1896_v29  ;;  %v1908_v38 = vmul.f32 1.442695, %v6963_v36  ;;  %v6965_v29 = vsub.f32 %v5825_v24, %v5835_v40 }
 0x418   : > { %4261 = vpow2.f32 %v1898_v46  ;;  %v6966_v46 = vsub.f32 %v5843_v26, %v5848_v57  ;;  %v6968_v57 = vsub.f32 %v5863_v7, %v5868_v51 }
 0x419   : > { %v6056_v23 = vpop.eup %4253  ;;  %4263 = vpow2.f32 %v1900_v39  ;;  %v1912_v17 = vmul.f32 1.442695, %v6965_v29 }
 0x41a   : > { %v1822_v32 = vpop.xlane.xlu0 %1821  ;;  %4265 = vpow2.f32 %v1902_v45  ;;  %v1914_v42 = vmul.f32 1.442695, %v6966_v46  ;;  %v1918_v26 = vmul.f32 1.442695, %v6968_v57 }
 0x41b   : > { %v6031_v19 = vmax.f32 %v6023_v31, %v1822_v32  ;;  %v6065_v43 = vpop.eup %4255  ;;  %4267 = vpow2.f32 %v1904_v60  ;;  %v1922_v60 = vmul.f32 1.442695, %v6970_v1  ;;  %v6980_v1 = vld [vmem:[#allocation83_spill] sm:$0xff] }
 0x41c   : > { %v1825_v59 = vpop.xlane.xlu1 %1824  ;;  %4269 = vpow2.f32 %v1906_v13  ;;  %v6074_v27 = vpop.eup %4257 }
 0x41d   : > { %3058 = vst.msk [vmem:[#allocation3 + $0xf0] sm:$0xff] %vm784_vm0, %v6031_v19  ;;  %v6042_v62 = vmax.f32 %v6028_v41, %v1825_v59  ;;  %2106 = vperm.xlu1 %4212, %v6031_v19   ;;  %4271 = vpow2.f32 %v1908_v38 }
 0x41e   : > { %4273 = vpow2.f32 %v1910_v63 }
 0x41f   : > { %3059 = vst.msk [vmem:[#allocation3 + $0xf8] sm:$0xff] %vm784_vm0, %v6042_v62  ;;  %2111 = vperm.xlu0 %4211, %v6042_v62   ;;  %4275 = vpow2.f32 %v1912_v17 }
 0x420   : > { %4277 = vpow2.f32 %v1914_v42 }
 0x421   : > { %2570 = vperm.xlu1 %4212, %v6056_v23   ;;  %v6082_v40 = vpop.eup %4259  ;;  %4279 = vpow2.f32 %v1916_v5 }
 0x422   : > { %v6088_v53 = vpop.eup %4261 }
 0x423   : > { %2565 = vperm.xlu0 %4211, %v6065_v43   ;;  %v6096_v51 = vpop.eup %4263 }
 0x424   : > { %v1957_v32 = vpop.permute.xlu0 %1956  ;;  %v6098_v7 = vpop.eup %4265 }
 0x425   : > { %v2114_v33 = vsub.f32 %v5420_v2, %v1957_v32  ;;  %v2115_v24 = vsub.f32 %v5422_v3, %v1957_v32  ;;  %2575 = vperm.xlu1 %4212, %v6074_v27   ;;  %v6969_v2 = vsub.f32 %v5865_v56, %v5875_v16  ;;  %v6104_v44 = vpop.eup %4267  ;;  %v6974_v32 = vsub.f32 %v5923_v55, %v5928_v52 }
 0x426   : > { %v6109_v36 = vpop.eup %4269 }
 0x427   : > { %v2178_v39 = vmul.f32 1.442695, %v2114_v33  ;;  %v2180_v59 = vmul.f32 1.442695, %v2115_v24  ;;  %2580 = vperm.xlu0 %4211, %v6082_v40   ;;  %v1920_v3 = vmul.f32 1.442695, %v6969_v2  ;;  %v6114_v50 = vpop.eup %4271 }
 0x428   : > { %v1962_v54 = vpop.permute.xlu1 %1961  ;;  %v6116_v35 = vpop.eup %4273 }
 0x429   : > { %4281 = vpow2.f32 %v2178_v39  ;;  %v2116_v58 = vsub.f32 %v5424_v4, %v1962_v54  ;;  %v2117_v45 = vsub.f32 %v5428_v6, %v1962_v54  ;;  %2585 = vperm.xlu1 %4212, %v6088_v53   ;;  %v6971_v4 = vsub.f32 %v5885_v48, %v5895_v47  ;;  %v6122_v17 = vpop.eup %4275  ;;  %v6976_v54 = vld [vmem:[#allocation79_spill] sm:$0xff] }
 0x42a   : > { %4283 = vpow2.f32 %v2180_v59  ;;  %v6972_v47 = vsub.f32 %v5903_v37, %v5908_v21  ;;  %v6127_v42 = vpop.eup %4277 }
 0x42b   : > { %4285 = vpow2.f32 %v1918_v26  ;;  %v2182_v16 = vmul.f32 1.442695, %v2116_v58  ;;  %v2184_v56 = vmul.f32 1.442695, %v2117_v45  ;;  %2590 = vperm.xlu0 %4211, %v6096_v51   ;;  %v1924_v6 = vmul.f32 1.442695, %v6971_v4  ;;  %v6132_v37 = vpop.eup %4279 }
 0x42c   : > { %4287 = vpow2.f32 %v1920_v3  ;;  %v1967_v13 = vpop.permute.xlu1 %1966  ;;  %v1926_v48 = vmul.f32 1.442695, %v6972_v47  ;;  %v6977_v58 = vld [vmem:[#allocation81_spill] sm:$0xff] }
 0x42d   : > { %4289 = vpow2.f32 %v2182_v16  ;;  %v2118_v38 = vsub.f32 %v5432_v8, %v1967_v13  ;;  %v2119_v34 = vsub.f32 %v5434_v9, %v1967_v13  ;;  %2595 = vperm.xlu1 %4212, %v6098_v7   ;;  %v6973_v8 = vsub.f32 %v5905_v30, %v5915_v28 }
 0x42e   : > { %4291 = vpow2.f32 %v2184_v56  ;;  %v1930_v28 = vmul.f32 1.442695, %v6974_v32 }
 0x42f   : > { %4293 = vpow2.f32 %v1922_v60  ;;  %v2186_v63 = vmul.f32 1.442695, %v2118_v38  ;;  %v2188_v29 = vmul.f32 1.442695, %v2119_v34  ;;  %2600 = vperm.xlu0 %4211, %v6104_v44   ;;  %v1928_v9 = vmul.f32 1.442695, %v6973_v8 }
 0x430   : > { %4295 = vpow2.f32 %v1924_v6  ;;  %v1972_v46 = vpop.permute.xlu1 %1971  ;;  %v6981_v6 = vld [vmem:[#allocation25_spill] sm:$0xff]  ;;  %v6982_v38 = vld [vmem:[#allocation26_spill] sm:$0xff]  ;;  %v6983_v8 = vld [vmem:[#allocation80_spill] sm:$0xff] }
 0x431   : > { %4297 = vpow2.f32 %v2186_v63  ;;  %v2120_v11 = vsub.f32 %v5436_v10, %v1972_v46  ;;  %v2121_v21 = vsub.f32 %v5440_v12, %v1972_v46  ;;  %2605 = vperm.xlu1 %4212, %v6109_v36   ;;  %v6975_v10 = vsub.f32 %v5925_v20, %v5935_v61 }
 0x432   : > { %4299 = vpow2.f32 %v2188_v29 }
 0x433   : > { %v4282_v5 = vpop.eup %4281  ;;  %4301 = vpow2.f32 %v1926_v48  ;;  %v2190_v30 = vmul.f32 1.442695, %v2120_v11  ;;  %v2192_v33 = vmul.f32 1.442695, %v2121_v21  ;;  %2610 = vperm.xlu0 %4211, %v6114_v50   ;;  %v1932_v12 = vmul.f32 1.442695, %v6975_v10 }
 0x434   : > { %v4284_v24 = vpop.eup %4283  ;;  %4303 = vpow2.f32 %v1928_v9  ;;  %v1977_v57 = vpop.permute.xlu1 %1976  ;;  %v6984_v9 = vld [vmem:[#allocation82_spill] sm:$0xff]  ;;  %v6988_v10 = vld [vmem:[#allocation89_spill] sm:$0xff] }
 0x435   : > { %v6141_v26 = vpop.eup %4285  ;;  %4305 = vpow2.f32 %v2190_v30  ;;  %v2122_v39 = vsub.f32 %v5444_v14, %v1977_v57  ;;  %v2123_v59 = vsub.f32 %v5446_v15, %v1977_v57  ;;  %2615 = vperm.xlu1 %4212, %v6116_v35   ;;  %v6146_v52 = vadd.f32 %v4284_v24, %v4282_v5  ;;  %v6979_v15 = vld [vmem:[#allocation85_spill] sm:$0xff]  ;;  %v6986_v21 = vld [vmem:[#allocation86_spill] sm:$0xff] }
 0x436   : > { %v6148_v55 = vpop.eup %4287  ;;  %4307 = vpow2.f32 %v2192_v33  ;;  %v6978_v14 = vsub.f32 %v6976_v54, %v6977_v58  ;;  %v1882_v60 = vsub.f32 %v6980_v1, %v6979_v15  ;;  %v6985_v46 = vsub.f32 %v6983_v8, %v6984_v9  ;;  %v6994_v8 = vld [vmem:[#allocation29_spill] sm:$0xff] }
 0x437   : > { %v4290_v2 = vpop.eup %4289  ;;  %4309 = vpow2.f32 %v1930_v28  ;;  %v2194_v3 = vmul.f32 1.442695, %v2122_v39  ;;  %v2196_v61 = vmul.f32 1.442695, %v2123_v59  ;;  %2620 = vperm.xlu0 %4211, %v6122_v17  }
 0x438   : > { %v4292_v20 = vpop.eup %4291  ;;  %4311 = vpow2.f32 %v1932_v12  ;;  %v1934_v45 = vmul.f32 1.442695, %v6978_v14  ;;  %v1982_v16 = vpop.permute.xlu1 %1981  ;;  %v2755_v56 = vpack.c.bf16 %v4290_v2, %v4282_v5  ;;  %v1936_v11 = vmul.f32 1.442695, %v6985_v46  ;;  %v6987_v5 = vld [vmem:[#allocation84_spill] sm:$0xff]  ;;  %v6989_v12 = vld [vmem:[#allocation87_spill] sm:$0xff] }
 0x439   : > { %v6156_v4 = vpop.eup %4293  ;;  %4313 = vpow2.f32 %v2194_v3  ;;  %v2124_v13 = vsub.f32 %v6981_v6, %v1982_v16  ;;  %v2125_v34 = vsub.f32 %v6982_v38, %v1982_v16  ;;  %2625 = vperm.xlu1 %4212, %v6127_v42   ;;  %v2756_v47 = vpack.c.bf16 %v4292_v20, %v4284_v24  ;;  %v6993_v6 = vld [vmem:[#allocation88_spill] sm:$0xff]  ;;  %v6995_v46 = vld [vmem:[#allocation30_spill] sm:$0xff] }
 0x43a   : > { %v6161_v48 = vpop.eup %4295  ;;  %4315 = vpow2.f32 %v2196_v61  ;;  %v6163_v63 = vadd.f32 %v4292_v20, %v4290_v2  ;;  %v1883_v32 = vsub.f32 %v6987_v5, %v6986_v21  ;;  %v1938_v24 = vmul.f32 1.442695, %v1882_v60  ;;  %v6990_v2 = vld [vmem:[#allocation27_spill] sm:$0xff]  ;;  %v6991_v61 = vld [vmem:[#allocation28_spill] sm:$0xff] }
 0x43b   : > { %v4298_v29 = vpop.eup %4297  ;;  %v2198_v28 = vmul.f32 1.442695, %v2124_v13  ;;  %v2200_v30 = vmul.f32 1.442695, %v2125_v34  ;;  %2835 = vmatprep.mubr.bf16.mxu0 %v2756_v47  ;;  %2630 = vperm.xlu0 %4211, %v6132_v37   ;;  %4317 = vpow2.f32 %v1934_v45  ;;  %v1884_v57 = vsub.f32 %v6989_v12, %v6988_v10 }
 0x43c   : > { %v4300_v33 = vpop.eup %4299  ;;  %2836 = vmatmul.mubr.bf16.vlgmr.msra.gmra.mrb[48].mxu0 %v2755_v56  ;;  %v1987_v39 = vpop.permute.xlu1 %1986  ;;  %v1940_v45 = vmul.f32 1.442695, %v1883_v32  ;;  %v6992_v56 = vld [vmem:[#allocation90_spill] sm:$0xff]  ;;  %v1886_v12 = vsub.f32 %v5995_v18, %v6003_v22 }
 0x43d   : > { %v6173_v59 = vpop.eup %4301  ;;  %4319 = vpow2.f32 %v2198_v28  ;;  %v2126_v3 = vsub.f32 %v6990_v2, %v1987_v39  ;;  %v2127_v20 = vsub.f32 %v6991_v61, %v1987_v39  ;;  %2635 = vperm.xlu1 %4212, %v6141_v26   ;;  %v6178_v54 = vadd.f32 %v4300_v33, %v4298_v29  ;;  %v6997_v2 = vld [vmem:[#allocation32_spill] sm:$0xff] }
 0x43e   : > { %v6180_v58 = vpop.eup %4303  ;;  %4321 = vpow2.f32 %v2200_v30  ;;  %v1942_v16 = vmul.f32 1.442695, %v1884_v57  ;;  %v1885_v13 = vsub.f32 %v6993_v6, %v6992_v56  ;;  %v6996_v57 = vld [vmem:[#allocation31_spill] sm:$0xff] }
 0x43f   : > { %v4306_v14 = vpop.eup %4305  ;;  %4323 = vpow2.f32 %v1936_v11  ;;  %v2202_v15 = vmul.f32 1.442695, %v2126_v3  ;;  %v2204_v1 = vmul.f32 1.442695, %v2127_v20  ;;  %2640 = vperm.xlu0 %4211, %v6148_v55  }
 0x440   : > { %v4308_v60 = vpop.eup %4307  ;;  %4325 = vpow2.f32 %v1938_v24  ;;  %v1992_v38 = vpop.permute.xlu1 %1991  ;;  %v2757_v34 = vpack.c.bf16 %v4306_v14, %v4298_v29  ;;  %v1944_v10 = vmul.f32 1.442695, %v1885_v13  ;;  %v1946_v13 = vmul.f32 1.442695, %v1886_v12  ;;  %v7003_v12 = vld [vmem:[#allocation36_spill] sm:$0xff] }
 0x441   : > { %v6185_v47 = vpop.eup %4309  ;;  %4327 = vpow2.f32 %v2202_v15  ;;  %v2128_v9 = vsub.f32 %v6994_v8, %v1992_v38  ;;  %v2129_v11 = vsub.f32 %v6995_v46, %v1992_v38  ;;  %2645 = vperm.xlu1 %4212, %v6156_v4   ;;  %v2758_v21 = vpack.c.bf16 %v4308_v60, %v4300_v33 }
 0x442   : > { %v6190_v5 = vpop.eup %4311  ;;  %4329 = vpow2.f32 %v2204_v1  ;;  %v6192_v32 = vadd.f32 %v4308_v60, %v4306_v14  ;;  %v1887_v14 = vsub.f32 %v6000_v25, %v6011_v0  ;;  %v6998_v1 = vld [vmem:[#allocation33_spill] sm:$0xff]  ;;  %v1888_v38 = vsub.f32 %v6023_v31, %v6031_v19 }
 0x443   : > { %v4314_v28 = vpop.eup %4313  ;;  %4331 = vpow2.f32 %v1940_v45  ;;  %v2206_v30 = vmul.f32 1.442695, %v2128_v9  ;;  %v2208_v24 = vmul.f32 1.442695, %v2129_v11  ;;  %2843 = vmatprep.mubr.bf16.mxu0 %v2758_v21  ;;  %2650 = vperm.xlu0 %4211, %v6161_v48  }
 0x444   : > { %v4316_v29 = vpop.eup %4315  ;;  %4333 = vpow2.f32 %v1942_v16  ;;  %2844 = vmatmul.mubr.bf16.gmra.mrb[52].mxu0 %v2757_v34  ;;  %v1997_v33 = vpop.permute.xlu1 %1996  ;;  %v6999_v16 = vld [vmem:[#allocation34_spill] sm:$0xff]  ;;  %v1948_v11 = vmul.f32 1.442695, %v1887_v14  ;;  %v1950_v19 = vmul.f32 1.442695, %v1888_v38 }
 0x445   : > { %4335 = vpow2.f32 %v2206_v30  ;;  %v2130_v39 = vsub.f32 %v6996_v57, %v1997_v33  ;;  %v2131_v3 = vsub.f32 %v6997_v2, %v1997_v33  ;;  %2655 = vperm.xlu1 %4212, %v6173_v59   ;;  %v6200_v61 = vadd.f32 %v4316_v29, %v4314_v28  ;;  %v6202_v20 = vpop.eup %4317 }
 0x446   : > { %4337 = vpow2.f32 %v2208_v24  ;;  %v2002_v45 = vpop.permute.xlu0 %2001 }
 0x447   : > { %v4320_v15 = vpop.eup %4319  ;;  %v2210_v18 = vmul.f32 1.442695, %v2130_v39  ;;  %v2212_v22 = vmul.f32 1.442695, %v2131_v3  ;;  %v2132_v60 = vsub.f32 %v6998_v1, %v2002_v45  ;;  %v2133_v56 = vsub.f32 %v6999_v16, %v2002_v45  ;;  %2660 = vperm.xlu0 %4211, %v6180_v58  }
 0x448   : > { %v4322_v6 = vpop.eup %4321  ;;  %4339 = vpow2.f32 %v1944_v10  ;;  %v2759_v34 = vpack.c.bf16 %v4320_v15, %v4314_v28 }
 0x449   : > { %v6211_v8 = vpop.eup %4323  ;;  %4341 = vpow2.f32 %v2210_v18  ;;  %v2214_v25 = vmul.f32 1.442695, %v2132_v60  ;;  %v2216_v0 = vmul.f32 1.442695, %v2133_v56  ;;  %2665 = vperm.xlu1 %4212, %v6185_v47   ;;  %v2760_v9 = vpack.c.bf16 %v4322_v6, %v4316_v29  ;;  %v7002_v29 = vld [vmem:[#allocation35_spill] sm:$0xff] }
 0x44a   : > { %7000 = vst [vmem:[#allocation79_spill] sm:$0xff] %v6211_v8  ;;  %v6214_v46 = vpop.eup %4325  ;;  %4343 = vpow2.f32 %v2212_v22  ;;  %v6216_v21 = vadd.f32 %v4322_v6, %v4320_v15  ;;  %v7005_v15 = vld [vmem:[#allocation37_spill] sm:$0xff]  ;;  %v7006_v22 = vld [vmem:[#allocation38_spill] sm:$0xff] }
 0x44b   : > { %v4328_v30 = vpop.eup %4327  ;;  %4345 = vpow2.f32 %v2214_v25  ;;  %2851 = vmatprep.mubr.bf16.mxu0 %v2760_v9  ;;  %2670 = vperm.xlu0 %4211, %v6190_v5  }
 0x44c   : > { %v4330_v31 = vpop.eup %4329  ;;  %4347 = vpow2.f32 %v2216_v0  ;;  %2852 = vmatmul.mubr.bf16.gmra.mrb[56].mxu0 %v2759_v34  ;;  %v2007_v28 = vpop.permute.xlu1 %2006 }
 0x44d   : > { %v6219_v24 = vpop.eup %4331  ;;  %4349 = vpow2.f32 %v1946_v13  ;;  %v2134_v10 = vsub.f32 %v7002_v29, %v2007_v28  ;;  %v2135_v33 = vsub.f32 %v7003_v12, %v2007_v28  ;;  %2675 = vperm.xlu1 %4212, %v6202_v20   ;;  %v6224_v57 = vadd.f32 %v4330_v31, %v4328_v30  ;;  %v7009_v28 = vld [vmem:[#allocation40_spill] sm:$0xff] }
 0x44e   : > { %7001 = vst [vmem:[#allocation81_spill] sm:$0xff] %v6219_v24  ;;  %v6226_v39 = vpop.eup %4333  ;;  %4351 = vpow2.f32 %v1948_v11  ;;  %v2012_v2 = vpop.permute.xlu0 %2011 }
 0x44f   : > { %7004 = vst [vmem:[#allocation85_spill] sm:$0xff] %v6226_v39  ;;  %v4336_v3 = vpop.eup %4335  ;;  %v2218_v14 = vmul.f32 1.442695, %v2134_v10  ;;  %v2220_v45 = vmul.f32 1.442695, %v2135_v33  ;;  %v2136_v18 = vsub.f32 %v7005_v15, %v2012_v2  ;;  %v2137_v1 = vsub.f32 %v7006_v22, %v2012_v2  ;;  %2680 = vperm.xlu0 %4211, %v6211_v8  }
 0x450   : > { %v4338_v60 = vpop.eup %4337  ;;  %4353 = vpow2.f32 %v1950_v19  ;;  %v2761_v16 = vpack.c.bf16 %v4336_v3, %v4328_v30  ;;  %v7008_v30 = vld [vmem:[#allocation39_spill] sm:$0xff] }
 0x451   : > { %4355 = vpow2.f32 %v2218_v14  ;;  %v2222_v56 = vmul.f32 1.442695, %v2136_v18  ;;  %v2224_v6 = vmul.f32 1.442695, %v2137_v1  ;;  %2685 = vperm.xlu1 %4212, %v6214_v46   ;;  %v2762_v13 = vpack.c.bf16 %v4338_v60, %v4330_v31  ;;  %v7012_v18 = vld [vmem:[#allocation42_spill] sm:$0xff] }
 0x452   : > { %v6232_v38 = vpop.eup %4339  ;;  %4357 = vpow2.f32 %v2220_v45  ;;  %v6234_v34 = vadd.f32 %v4338_v60, %v4336_v3  ;;  %v7011_v45 = vld [vmem:[#allocation41_spill] sm:$0xff] }
 0x453   : > { %7007 = vst [vmem:[#allocation83_spill] sm:$0xff] %v6232_v38  ;;  %v4342_v25 = vpop.eup %4341  ;;  %4359 = vpow2.f32 %v2222_v56  ;;  %2859 = vmatprep.mubr.bf16.mxu0 %v2762_v13  ;;  %2690 = vperm.xlu0 %4211, %v6219_v24  }
 0x454   : > { %v4344_v0 = vpop.eup %4343  ;;  %4361 = vpow2.f32 %v2224_v6  ;;  %2860 = vmatmul.mubr.bf16.gmra.mrb[60].mxu0 %v2761_v16  ;;  %v2017_v9 = vpop.permute.xlu1 %2016 }
 0x455   : > { %v4346_v11 = vpop.eup %4345  ;;  %v2138_v19 = vsub.f32 %v7008_v30, %v2017_v9  ;;  %v2139_v29 = vsub.f32 %v7009_v28, %v2017_v9  ;;  %2695 = vperm.xlu1 %4212, %v6226_v39   ;;  %v6240_v31 = vadd.f32 %v4344_v0, %v4342_v25  ;;  %v7016_v28 = vld [vmem:[#allocation44_spill] sm:$0xff] }
 0x456   : > { %v4348_v10 = vpop.eup %4347  ;;  %v2022_v12 = vpop.permute.xlu0 %2021  ;;  %v2763_v33 = vpack.c.bf16 %v4346_v11, %v4342_v25 }
 0x457   : > { %v6242_v2 = vpop.eup %4349  ;;  %v2226_v3 = vmul.f32 1.442695, %v2138_v19  ;;  %v2228_v14 = vmul.f32 1.442695, %v2139_v29  ;;  %v2140_v15 = vsub.f32 %v7011_v45, %v2022_v12  ;;  %v2141_v22 = vsub.f32 %v7012_v18, %v2022_v12  ;;  %2700 = vperm.xlu0 %4211, %v6232_v38   ;;  %v7017_v18 = vld [vmem:[#allocation45_spill] sm:$0xff] }
 0x458   : > { %7010 = vst [vmem:[#allocation25_spill] sm:$0xff] %v6242_v2  ;;  %v6247_v1 = vpop.eup %4351  ;;  %v2764_v60 = vpack.c.bf16 %v4348_v10, %v4344_v0  ;;  %v6249_v16 = vadd.f32 %v4348_v10, %v4346_v11  ;;  %v7015_v11 = vld [vmem:[#allocation43_spill] sm:$0xff] }
 0x459   : > { %7013 = vst [vmem:[#allocation26_spill] sm:$0xff] %v6247_v1  ;;  %4363 = vpow2.f32 %v2226_v3  ;;  %v2230_v56 = vmul.f32 1.442695, %v2140_v15  ;;  %v2232_v6 = vmul.f32 1.442695, %v2141_v22  ;;  %2705 = vperm.xlu1 %4212, %v6242_v2  }
 0x45a   : > { %v6252_v13 = vpop.eup %4353  ;;  %4365 = vpow2.f32 %v2228_v14  ;;  %2867 = vmatprep.mubr.bf16.mxu0 %v2764_v60  ;;  %v7018_v60 = vld [vmem:[#allocation46_spill] sm:$0xff] }
 0x45b   : > { %7014 = vst [vmem:[#allocation80_spill] sm:$0xff] %v6252_v13  ;;  %v4356_v25 = vpop.eup %4355  ;;  %4367 = vpow2.f32 %v2230_v56  ;;  %2710 = vperm.xlu0 %4211, %v6247_v1  }
 0x45c   : > { %v4358_v9 = vpop.eup %4357  ;;  %4369 = vpow2.f32 %v2232_v6  ;;  %2868 = vmatmul.mubr.bf16.gmra.mrb[64].mxu0 %v2763_v33  ;;  %v2027_v30 = vpop.permute.xlu1 %2026 }
 0x45d   : > { %v4360_v0 = vpop.eup %4359  ;;  %v2142_v19 = vsub.f32 %v7015_v11, %v2027_v30  ;;  %v2143_v29 = vsub.f32 %v7016_v28, %v2027_v30  ;;  %2715 = vperm.xlu1 %4212, %v6252_v13   ;;  %v6258_v10 = vadd.f32 %v4358_v9, %v4356_v25 }
 0x45e   : > { %v4362_v12 = vpop.eup %4361  ;;  %v2032_v3 = vpop.permute.xlu0 %2031  ;;  %v2765_v14 = vpack.c.bf16 %v4360_v0, %v4356_v25 }
 0x45f   : > { %v2234_v45 = vmul.f32 1.442695, %v2142_v19  ;;  %v2236_v15 = vmul.f32 1.442695, %v2143_v29  ;;  %v2144_v22 = vsub.f32 %v7017_v18, %v2032_v3  ;;  %v2145_v56 = vsub.f32 %v7018_v60, %v2032_v3  ;;  %v7019_v29 = vld [vmem:[#allocation47_spill] sm:$0xff]  ;;  %v7020_v18 = vld [vmem:[#allocation48_spill] sm:$0xff] }
 0x460   : > { %v2766_v33 = vpack.c.bf16 %v4362_v12, %v4358_v9  ;;  %v6262_v6 = vadd.f32 %v4362_v12, %v4360_v0 }
 0x461   : > { %4371 = vpow2.f32 %v2234_v45  ;;  %v2238_v11 = vmul.f32 1.442695, %v2144_v22  ;;  %v2240_v49 = vmul.f32 1.442695, %v2145_v56  ;;  %v7022_v56 = vld [vmem:[#allocation50_spill] sm:$0xff] }
 0x462   : > { %4373 = vpow2.f32 %v2236_v15  ;;  %2875 = vmatprep.mubr.bf16.mxu0 %v2766_v33  ;;  %v7021_v15 = vld [vmem:[#allocation49_spill] sm:$0xff] }
 0x463   : > { %v4364_v30 = vpop.eup %4363  ;;  %4375 = vpow2.f32 %v2238_v11 }
 0x464   : > { %v4366_v28 = vpop.eup %4365  ;;  %4377 = vpow2.f32 %v2240_v49  ;;  %2876 = vmatmul.mubr.bf16.gmra.mrb[68].mxu0 %v2765_v14  ;;  %v2037_v25 = vpop.permute.xlu1 %2036 }
 0x465   : > { %v4368_v19 = vpop.eup %4367  ;;  %v2146_v1 = vsub.f32 %v7019_v29, %v2037_v25  ;;  %v2147_v13 = vsub.f32 %v7020_v18, %v2037_v25  ;;  %v6266_v3 = vadd.f32 %v4366_v28, %v4364_v30 }
 0x466   : > { %v4370_v9 = vpop.eup %4369  ;;  %v2042_v0 = vpop.permute.xlu0 %2041  ;;  %v2767_v12 = vpack.c.bf16 %v4368_v19, %v4364_v30 }
 0x467   : > { %v2242_v45 = vmul.f32 1.442695, %v2146_v1  ;;  %v2244_v22 = vmul.f32 1.442695, %v2147_v13  ;;  %v2148_v60 = vsub.f32 %v7021_v15, %v2042_v0  ;;  %v2149_v33 = vsub.f32 %v7022_v56, %v2042_v0  ;;  %v7023_v13 = vld [vmem:[#allocation51_spill] sm:$0xff]  ;;  %v7024_v15 = vld [vmem:[#allocation52_spill] sm:$0xff] }
 0x468   : > { %v2768_v11 = vpack.c.bf16 %v4370_v9, %v4366_v28  ;;  %v6270_v49 = vadd.f32 %v4370_v9, %v4368_v19 }
 0x469   : > { %4379 = vpow2.f32 %v2242_v45  ;;  %v2246_v14 = vmul.f32 1.442695, %v2148_v60  ;;  %v2248_v38 = vmul.f32 1.442695, %v2149_v33  ;;  %v7026_v33 = vld [vmem:[#allocation54_spill] sm:$0xff] }
 0x46a   : > { %4381 = vpow2.f32 %v2244_v22  ;;  %2883 = vmatprep.mubr.bf16.mxu0 %v2768_v11  ;;  %v7025_v22 = vld [vmem:[#allocation53_spill] sm:$0xff] }
 0x46b   : > { %v4372_v25 = vpop.eup %4371  ;;  %4383 = vpow2.f32 %v2246_v14 }
 0x46c   : > { %v4374_v29 = vpop.eup %4373  ;;  %4385 = vpow2.f32 %v2248_v38  ;;  %2884 = vmatmul.mubr.bf16.gmra.mrb[72].mxu0 %v2767_v12  ;;  %v2047_v30 = vpop.permute.xlu1 %2046 }
 0x46d   : > { %v4376_v1 = vpop.eup %4375  ;;  %v2150_v18 = vsub.f32 %v7023_v13, %v2047_v30  ;;  %v2151_v2 = vsub.f32 %v7024_v15, %v2047_v30  ;;  %v6274_v0 = vadd.f32 %v4374_v29, %v4372_v25 }
 0x46e   : > { %v4378_v28 = vpop.eup %4377  ;;  %v2052_v19 = vpop.permute.xlu0 %2051  ;;  %v2769_v9 = vpack.c.bf16 %v4376_v1, %v4372_v25 }
 0x46f   : > { %v2250_v45 = vmul.f32 1.442695, %v2150_v18  ;;  %v2252_v60 = vmul.f32 1.442695, %v2151_v2  ;;  %v2152_v56 = vsub.f32 %v7025_v22, %v2052_v19  ;;  %v2153_v11 = vsub.f32 %v7026_v33, %v2052_v19  ;;  %v7027_v2 = vld [vmem:[#allocation55_spill] sm:$0xff]  ;;  %v7028_v22 = vld [vmem:[#allocation56_spill] sm:$0xff] }
 0x470   : > { %v2770_v14 = vpack.c.bf16 %v4378_v28, %v4374_v29  ;;  %v6278_v38 = vadd.f32 %v4378_v28, %v4376_v1 }
 0x471   : > { %4387 = vpow2.f32 %v2250_v45  ;;  %v2254_v12 = vmul.f32 1.442695, %v2152_v56  ;;  %v2256_v24 = vmul.f32 1.442695, %v2153_v11  ;;  %v7030_v11 = vld [vmem:[#allocation58_spill] sm:$0xff] }
 0x472   : > { %4389 = vpow2.f32 %v2252_v60  ;;  %2891 = vmatprep.mubr.bf16.mxu0 %v2770_v14  ;;  %v7029_v60 = vld [vmem:[#allocation57_spill] sm:$0xff] }
 0x473   : > { %v4380_v30 = vpop.eup %4379  ;;  %4391 = vpow2.f32 %v2254_v12 }
 0x474   : > { %v4382_v13 = vpop.eup %4381  ;;  %4393 = vpow2.f32 %v2256_v24  ;;  %2892 = vmatmul.mubr.bf16.gmra.mrb[76].mxu0 %v2769_v9  ;;  %v2057_v25 = vpop.permute.xlu1 %2056 }
 0x475   : > { %v4384_v18 = vpop.eup %4383  ;;  %v2154_v15 = vsub.f32 %v7027_v2, %v2057_v25  ;;  %v2155_v39 = vsub.f32 %v7028_v22, %v2057_v25  ;;  %v6282_v19 = vadd.f32 %v4382_v13, %v4380_v30 }
 0x476   : > { %v4386_v29 = vpop.eup %4385  ;;  %v2062_v1 = vpop.permute.xlu0 %2061  ;;  %v2771_v28 = vpack.c.bf16 %v4384_v18, %v4380_v30 }
 0x477   : > { %v2258_v45 = vmul.f32 1.442695, %v2154_v15  ;;  %v2260_v56 = vmul.f32 1.442695, %v2155_v39  ;;  %v2156_v33 = vsub.f32 %v7029_v60, %v2062_v1  ;;  %v2157_v14 = vsub.f32 %v7030_v11, %v2062_v1  ;;  %v7031_v15 = vld [vmem:[#allocation59_spill] sm:$0xff]  ;;  %v7032_v1 = vld [vmem:[#allocation60_spill] sm:$0xff] }
 0x478   : > { %v2772_v12 = vpack.c.bf16 %v4386_v29, %v4382_v13  ;;  %v6286_v24 = vadd.f32 %v4386_v29, %v4384_v18 }
 0x479   : > { %4395 = vpow2.f32 %v2258_v45  ;;  %v2262_v9 = vmul.f32 1.442695, %v2156_v33  ;;  %v2264_v8 = vmul.f32 1.442695, %v2157_v14  ;;  %v7033_v33 = vld [vmem:[#allocation61_spill] sm:$0xff]  ;;  %v7034_v14 = vld [vmem:[#allocation62_spill] sm:$0xff] }
 0x47a   : > { %4397 = vpow2.f32 %v2260_v56  ;;  %2899 = vmatprep.mubr.bf16.mxu0 %v2772_v12  ;;  %2374 = vadd.xlane.f32.xlu0 %v6163_v63 }
 0x47b   : > { %v4388_v25 = vpop.eup %4387  ;;  %4399 = vpow2.f32 %v2262_v9 }
 0x47c   : > { %v4390_v2 = vpop.eup %4389  ;;  %4401 = vpow2.f32 %v2264_v8  ;;  %2900 = vmatmul.mubr.bf16.gmra.mrb[80].mxu0 %v2771_v28  ;;  %v2067_v39 = vpop.permute.xlu1 %2066 }
 0x47d   : > { %v4392_v30 = vpop.eup %4391  ;;  %v2158_v22 = vsub.f32 %v7031_v15, %v2067_v39  ;;  %v2159_v13 = vsub.f32 %v7032_v1, %v2067_v39  ;;  %v6291_v18 = vadd.f32 %v4390_v2, %v4388_v25  ;;  %v7035_v1 = vld [vmem:[#allocation63_spill] sm:$0xff] }
 0x47e   : > { %v4394_v29 = vpop.eup %4393  ;;  %v2072_v45 = vpop.permute.xlu0 %2071  ;;  %2377 = vadd.xlane.f32.xlu0 %v6178_v54  ;;  %v2773_v56 = vpack.c.bf16 %v4392_v30, %v4388_v25 }
 0x47f   : > { %v2266_v60 = vmul.f32 1.442695, %v2158_v22  ;;  %v2268_v63 = vmul.f32 1.442695, %v2159_v13  ;;  %v2160_v11 = vsub.f32 %v7033_v33, %v2072_v45  ;;  %v2161_v8 = vsub.f32 %v7034_v14, %v2072_v45  ;;  %v7037_v33 = vld [vmem:[#allocation65_spill] sm:$0xff] }
 0x480   : > { %v2774_v28 = vpack.c.bf16 %v4394_v29, %v4390_v2  ;;  %v6296_v12 = vadd.f32 %v4394_v29, %v4392_v30  ;;  %v7036_v30 = vld [vmem:[#allocation64_spill] sm:$0xff] }
 0x481   : > { %4403 = vpow2.f32 %v2266_v60  ;;  %v2270_v9 = vmul.f32 1.442695, %v2160_v11  ;;  %v2272_v15 = vmul.f32 1.442695, %v2161_v8  ;;  %2371 = vadd.xlane.f32.xlu1 %v6146_v52 }
 0x482   : > { %4405 = vpow2.f32 %v2268_v63  ;;  %2907 = vmatprep.mubr.bf16.mxu0 %v2774_v28  ;;  %2383 = vadd.xlane.f32.xlu0 %v6200_v61 }
 0x483   : > { %v4396_v54 = vpop.eup %4395  ;;  %4407 = vpow2.f32 %v2270_v9 }
 0x484   : > { %v4398_v25 = vpop.eup %4397  ;;  %4409 = vpow2.f32 %v2272_v15  ;;  %2908 = vmatmul.mubr.bf16.gmra.mrb[84].mxu0 %v2773_v56  ;;  %v2077_v39 = vpop.permute.xlu1 %2076  ;;  %v7038_v56 = vld [vmem:[#allocation66_spill] sm:$0xff] }
 0x485   : > { %v4400_v22 = vpop.eup %4399  ;;  %v2162_v2 = vsub.f32 %v7035_v1, %v2077_v39  ;;  %v2163_v13 = vsub.f32 %v7036_v30, %v2077_v39  ;;  %2380 = vadd.xlane.f32.xlu1 %v6192_v32  ;;  %v6303_v29 = vadd.f32 %v4398_v25, %v4396_v54  ;;  %v7039_v1 = vld [vmem:[#allocation67_spill] sm:$0xff] }
 0x486   : > { %v4402_v52 = vpop.eup %4401  ;;  %v2082_v45 = vpop.permute.xlu0 %2081  ;;  %2389 = vadd.xlane.f32.xlu0 %v6224_v57  ;;  %v2775_v61 = vpack.c.bf16 %v4400_v22, %v4396_v54 }
 0x487   : > { %v2274_v60 = vmul.f32 1.442695, %v2162_v2  ;;  %v2276_v63 = vmul.f32 1.442695, %v2163_v13  ;;  %v2164_v11 = vsub.f32 %v7037_v33, %v2082_v45  ;;  %v2165_v14 = vsub.f32 %v7038_v56, %v2082_v45 }
 0x488   : > { %v2776_v8 = vpack.c.bf16 %v4402_v52, %v4398_v25  ;;  %v6308_v28 = vadd.f32 %v4402_v52, %v4400_v22  ;;  %v7040_v22 = vld [vmem:[#allocation68_spill] sm:$0xff] }
 0x489   : > { %4411 = vpow2.f32 %v2274_v60  ;;  %v2278_v9 = vmul.f32 1.442695, %v2164_v11  ;;  %v2280_v15 = vmul.f32 1.442695, %v2165_v14  ;;  %2386 = vadd.xlane.f32.xlu1 %v6216_v21  ;;  %v7041_v60 = vld [vmem:[#allocation69_spill] sm:$0xff] }
 0x48a   : > { %4413 = vpow2.f32 %v2276_v63  ;;  %2915 = vmatprep.mubr.bf16.mxu0 %v2776_v8  ;;  %2395 = vadd.xlane.f32.xlu0 %v6240_v31 }
 0x48b   : > { %v4404_v32 = vpop.eup %4403  ;;  %4415 = vpow2.f32 %v2278_v9 }
 0x48c   : > { %v4406_v57 = vpop.eup %4405  ;;  %4417 = vpow2.f32 %v2280_v15  ;;  %2916 = vmatmul.mubr.bf16.gmra.mrb[88].mxu0 %v2775_v61  ;;  %v2087_v54 = vpop.permute.xlu1 %2086  ;;  %v7042_v61 = vld [vmem:[#allocation70_spill] sm:$0xff] }
 0x48d   : > { %v4408_v39 = vpop.eup %4407  ;;  %v2166_v25 = vsub.f32 %v7039_v1, %v2087_v54  ;;  %v2167_v2 = vsub.f32 %v7040_v22, %v2087_v54  ;;  %2392 = vadd.xlane.f32.xlu1 %v6234_v34  ;;  %v6315_v30 = vadd.f32 %v4406_v57, %v4404_v32  ;;  %v7044_v54 = vld [vmem:[#allocation72_spill] sm:$0xff] }
 0x48e   : > { %v4410_v21 = vpop.eup %4409  ;;  %v2092_v13 = vpop.permute.xlu0 %2091  ;;  %2401 = vadd.xlane.f32.xlu0 %v6258_v10  ;;  %v2777_v31 = vpack.c.bf16 %v4408_v39, %v4404_v32  ;;  %v7043_v32 = vld [vmem:[#allocation71_spill] sm:$0xff] }
 0x48f   : > { %v2282_v52 = vmul.f32 1.442695, %v2166_v25  ;;  %v2284_v45 = vmul.f32 1.442695, %v2167_v2  ;;  %v2168_v63 = vsub.f32 %v7041_v60, %v2092_v13  ;;  %v2169_v33 = vsub.f32 %v7042_v61, %v2092_v13 }
 0x490   : > { %v2778_v11 = vpack.c.bf16 %v4410_v21, %v4406_v57  ;;  %v6320_v56 = vadd.f32 %v4410_v21, %v4408_v39  ;;  %v7045_v21 = vld [vmem:[#allocation73_spill] sm:$0xff] }
 0x491   : > { %4419 = vpow2.f32 %v2282_v52  ;;  %v2286_v14 = vmul.f32 1.442695, %v2168_v63  ;;  %v2288_v8 = vmul.f32 1.442695, %v2169_v33  ;;  %2398 = vadd.xlane.f32.xlu1 %v6249_v16  ;;  %v7046_v52 = vld [vmem:[#allocation74_spill] sm:$0xff] }
 0x492   : > { %4421 = vpow2.f32 %v2284_v45  ;;  %2923 = vmatprep.mubr.bf16.mxu0 %v2778_v11  ;;  %2407 = vadd.xlane.f32.xlu0 %v6266_v3 }
 0x493   : > { %v4412_v34 = vpop.eup %4411  ;;  %4423 = vpow2.f32 %v2286_v14  ;;  %v7047_v14 = vld [vmem:[#allocation75_spill] sm:$0xff] }
 0x494   : > { %v4414_v10 = vpop.eup %4413  ;;  %4425 = vpow2.f32 %v2288_v8  ;;  %2924 = vmatmul.mubr.bf16.gmra.mrb[92].mxu0 %v2777_v31  ;;  %v2097_v9 = vpop.permute.xlu1 %2096 }
 0x495   : > { %v4416_v15 = vpop.eup %4415  ;;  %v2170_v57 = vsub.f32 %v7043_v32, %v2097_v9  ;;  %v2171_v39 = vsub.f32 %v7044_v54, %v2097_v9  ;;  %2404 = vadd.xlane.f32.xlu1 %v6262_v6  ;;  %v2442_v1 = vadd.f32 %v4414_v10, %v4412_v34  ;;  %v7049_v54 = vld [vmem:[#allocation77_spill] sm:$0xff] }
 0x496   : > { %v4418_v25 = vpop.eup %4417  ;;  %v2102_v16 = vpop.permute.xlu0 %2101  ;;  %2413 = vadd.xlane.f32.xlu0 %v6274_v0  ;;  %v2779_v22 = vpack.c.bf16 %v4416_v15, %v4412_v34  ;;  %v7048_v34 = vld [vmem:[#allocation76_spill] sm:$0xff] }
 0x497   : > { %v2290_v3 = vmul.f32 1.442695, %v2170_v57  ;;  %v2292_v2 = vmul.f32 1.442695, %v2171_v39  ;;  %v2172_v13 = vsub.f32 %v7045_v21, %v2102_v16  ;;  %v2173_v31 = vsub.f32 %v7046_v52, %v2102_v16 }
 0x498   : > { %v2780_v45 = vpack.c.bf16 %v4418_v25, %v4414_v10  ;;  %v6330_v60 = vadd.f32 %v4418_v25, %v4416_v15  ;;  %v7050_v25 = vld [vmem:[#allocation78_spill] sm:$0xff] }
 0x499   : > { %4427 = vpow2.f32 %v2290_v3  ;;  %v2294_v63 = vmul.f32 1.442695, %v2172_v13  ;;  %v2296_v61 = vmul.f32 1.442695, %v2173_v31  ;;  %2410 = vadd.xlane.f32.xlu1 %v6270_v49 }
 0x49a   : > { %4429 = vpow2.f32 %v2292_v2  ;;  %2931 = vmatprep.mubr.bf16.mxu0 %v2780_v45  ;;  %2419 = vadd.xlane.f32.xlu0 %v6282_v19 }
 0x49b   : > { %v4420_v6 = vpop.eup %4419  ;;  %4431 = vpow2.f32 %v2294_v63 }
 0x49c   : > { %v4422_v0 = vpop.eup %4421  ;;  %4433 = vpow2.f32 %v2296_v61  ;;  %2932 = vmatmul.mubr.bf16.gmra.mrb[96].mxu0 %v2779_v22  ;;  %v2107_v33 = vpop.permute.xlu1 %2106 }
 0x49d   : > { %v4424_v11 = vpop.eup %4423  ;;  %v2174_v8 = vsub.f32 %v7047_v14, %v2107_v33  ;;  %v2175_v10 = vsub.f32 %v7048_v34, %v2107_v33  ;;  %2416 = vadd.xlane.f32.xlu1 %v6278_v38  ;;  %v2448_v9 = vadd.f32 %v4422_v0, %v4420_v6 }
 0x49e   : > { %v4426_v15 = vpop.eup %4425  ;;  %v2112_v49 = vpop.permute.xlu0 %2111  ;;  %2425 = vadd.xlane.f32.xlu0 %v6291_v18  ;;  %v2781_v32 = vpack.c.bf16 %v4424_v11, %v4420_v6 }
 0x49f   : > { %v2298_v19 = vmul.f32 1.442695, %v2174_v8  ;;  %v2300_v57 = vmul.f32 1.442695, %v2175_v10  ;;  %v2176_v39 = vsub.f32 %v7049_v54, %v2112_v49  ;;  %v2177_v16 = vsub.f32 %v7050_v25, %v2112_v49 }
 0x4a0   : > { %v2782_v22 = vpack.c.bf16 %v4426_v15, %v4422_v0  ;;  %v2451_v3 = vadd.f32 %v4426_v15, %v4424_v11  ;;  %v6348_v8 = vpop.permute.xlu1 %2570  ;;  %v7051_v10 = vsub.f32 %v6028_v41, %v6042_v62 }
 0x4a1   : > { %4435 = vpow2.f32 %v2298_v19  ;;  %v2302_v2 = vmul.f32 1.442695, %v2176_v39  ;;  %v2304_v21 = vmul.f32 1.442695, %v2177_v16  ;;  %2422 = vadd.xlane.f32.xlu1 %v6286_v24 }
 0x4a2   : > { %4437 = vpow2.f32 %v2300_v57  ;;  %2939 = vmatprep.mubr.bf16.mxu0 %v2782_v22  ;;  %2431 = vadd.xlane.f32.xlu0 %v6303_v29  ;;  %v6346_v11 = vpop.permute.xlu0 %2565 }
 0x4a3   : > { %v4428_v38 = vpop.eup %4427  ;;  %4439 = vpow2.f32 %v2302_v2 }
 0x4a4   : > { %v4430_v18 = vpop.eup %4429  ;;  %4441 = vpow2.f32 %v2304_v21  ;;  %2940 = vmatmul.mubr.bf16.gmra.mrb[100].mxu0 %v2781_v32 }
 0x4a5   : > { %v4432_v13 = vpop.eup %4431  ;;  %2428 = vadd.xlane.f32.xlu1 %v6296_v12  ;;  %v2454_v52 = vadd.f32 %v4430_v18, %v4428_v38 }
 0x4a6   : > { %v4434_v31 = vpop.eup %4433  ;;  %2437 = vadd.xlane.f32.xlu0 %v6315_v30  ;;  %v2783_v45 = vpack.c.bf16 %v4432_v13, %v4428_v38 }
 0x4a7   : > { %v2784_v63 = vpack.c.bf16 %v4434_v31, %v4430_v18  ;;  %v2457_v61 = vadd.f32 %v4434_v31, %v4432_v13 }
 0x4a9   : > { %2947 = vmatprep.mubr.bf16.mxu0 %v2784_v63  ;;  %2434 = vadd.xlane.f32.xlu1 %v6308_v28  ;;  %v6351_v28 = vpop.permute.xlu0 %2580 }
 0x4aa   : > { %2443 = vadd.xlane.f32.xlu0 %v2442_v1  ;;  %v6353_v1 = vpop.permute.xlu1 %2575 }
 0x4ab   : > { %v4436_v24 = vpop.eup %4435 }
 0x4ac   : > { %v4438_v29 = vpop.eup %4437  ;;  %2948 = vmatmul.mubr.bf16.gmra.mrb[104].mxu0 %v2783_v45 }
 0x4ad   : > { %v4440_v6 = vpop.eup %4439  ;;  %2440 = vadd.xlane.f32.xlu1 %v6320_v56  ;;  %v2460_v0 = vadd.f32 %v4438_v29, %v4436_v24  ;;  %v6355_v56 = vpop.permute.xlu0 %2590 }
 0x4ae   : > { %v4442_v33 = vpop.eup %4441  ;;  %2449 = vadd.xlane.f32.xlu0 %v2448_v9  ;;  %v2785_v12 = vpack.c.bf16 %v4440_v6, %v4436_v24  ;;  %v6357_v34 = vpop.permute.xlu1 %2585  ;;  %v1952_v9 = vmul.f32 1.442695, %v7051_v10  ;;  %v2307_v24 = vld [vmem:[#allocation4 + $0x8] sm:$0xff]  ;;  %v2306_v10 = vld [vmem:[#allocation4] sm:$0xff] }
 0x4af   : > { %v2786_v30 = vpack.c.bf16 %v4442_v33, %v4438_v29  ;;  %v2463_v14 = vadd.f32 %v4442_v33, %v4440_v6  ;;  %v2339_v6 = vmul.f32 %v6056_v23, %v2307_v24  ;;  %v2308_v33 = vld [vmem:[#allocation4 + $0x10] sm:$0xff]  ;;  %v2309_v24 = vld [vmem:[#allocation4 + $0x18] sm:$0xff] }
 0x4b0   : > { %4443 = vpow2.f32 %v1952_v9 }
 0x4b1   : > { %2955 = vmatprep.mubr.bf16.mxu0 %v2786_v30  ;;  %2446 = vadd.xlane.f32.xlu1 %v6330_v60  ;;  %v6362_v60 = vpop.permute.xlu0 %2600 }
 0x4b2   : > { %2455 = vadd.xlane.f32.xlu0 %v2454_v52  ;;  %v6364_v15 = vpop.permute.xlu1 %2595 }
 0x4b4   : > { %2956 = vmatmul.mubr.bf16.gmra.mrb[108].mxu0 %v2785_v12 }
 0x4b5   : > { %2452 = vadd.xlane.f32.xlu1 %v2451_v3  ;;  %v6366_v49 = vpop.permute.xlu0 %2610 }
 0x4b6   : > { %2461 = vadd.xlane.f32.xlu0 %v2460_v0  ;;  %v6368_v32 = vpop.permute.xlu1 %2605 }
 0x4b9   : > { %2458 = vadd.xlane.f32.xlu1 %v2457_v61  ;;  %v6373_v57 = vpop.permute.xlu0 %2620 }
 0x4ba   : > { %v6370_v19 = vpop.eup %4443  ;;  %v6375_v54 = vpop.permute.xlu1 %2615 }
 0x4bd   : > { %2464 = vadd.xlane.f32.xlu1 %v2463_v14  ;;  %v6377_v41 = vpop.permute.xlu0 %2630  ;;  %v2340_v14 = vmul.f32 %v6074_v27, %v2308_v33  ;;  %v2723_v27 = vmul.f32 0.0, %v6346_v11 }
 0x4be   : > { %v6379_v62 = vpop.permute.xlu1 %2625 }
 0x4c1   : > { %v6381_v39 = vpop.permute.xlu0 %2640 }
 0x4c2   : > { %v6383_v25 = vpop.permute.xlu1 %2635 }
 0x4c5   : > { %v6385_v16 = vpop.permute.xlu0 %2650 }
 0x4c6   : > { %v6387_v22 = vpop.permute.xlu1 %2645 }
 0x4c9   : > { %v6389_v3 = vpop.permute.xlu0 %2660 }
 0x4ca   : > { %v6391_v2 = vpop.permute.xlu1 %2655 }
 0x4cc   : > { %2720 = vperm.xlu0 %4211, %v6370_v19  }
 0x4cd   : > { %v6393_v21 = vpop.permute.xlu0 %2670 }
 0x4ce   : > { %v6395_v38 = vpop.permute.xlu1 %2665 }
 0x4d1   : > { %v6397_v18 = vpop.permute.xlu0 %2680 }
 0x4d2   : > { %7052 = vst [vmem:[#allocation82_spill] sm:$0xff] %v6397_v18  ;;  %v6399_v13 = vpop.permute.xlu1 %2675 }
 0x4d5   : > { %v6401_v52 = vpop.permute.xlu0 %2690 }
 0x4d6   : > { %7053 = vst [vmem:[#allocation86_spill] sm:$0xff] %v6401_v52  ;;  %v6403_v31 = vpop.permute.xlu1 %2685 }
 0x4d7   : > { %7054 = vst [vmem:[#allocation84_spill] sm:$0xff] %v6403_v31 }
 0x4d9   : > { %v6405_v45 = vpop.permute.xlu0 %2700 }
 0x4da   : > { %7055 = vst [vmem:[#allocation89_spill] sm:$0xff] %v6405_v45  ;;  %v6407_v63 = vpop.permute.xlu1 %2695  ;;  %v2310_v45 = vld [vmem:[#allocation4 + $0x20] sm:$0xff] }
 0x4db   : > { %7056 = vst [vmem:[#allocation87_spill] sm:$0xff] %v6407_v63  ;;  %v2342_v23 = vmul.f32 %v6088_v53, %v2310_v45 }
 0x4dd   : > { %v6409_v61 = vpop.permute.xlu0 %2710 }
 0x4de   : > { %7057 = vst [vmem:[#allocation27_spill] sm:$0xff] %v6409_v61  ;;  %v6411_v29 = vpop.permute.xlu1 %2705  ;;  %v2338_v61 = vmul.f32 %v6065_v43, %v2306_v10  ;;  %v2341_v43 = vmul.f32 %v6082_v40, %v2309_v24 }
 0x4df   : > { %7058 = vst [vmem:[#allocation28_spill] sm:$0xff] %v6411_v29 }
 0x4e2   : > { %v6414_v30 = vpop.permute.xlu1 %2715 }
 0x4e3   : > { %7059 = vst [vmem:[#allocation90_spill] sm:$0xff] %v6414_v30  ;;  %v2312_v30 = vld [vmem:[#allocation4 + $0x30] sm:$0xff] }
 0x507   : > { %v2375_v0 = vpop.xlane.xlu0 %2374 }
 0x508   : > { %v2467_v12 = vadd.f32 %v2375_v0, %v2339_v6 }
 0x50a   : > { %2500 = vst.msk [vmem:[#allocation4 + $0x8] sm:$0xff] %vm784_vm0, %v2467_v12 }
 0x50b   : > { %v2378_v9 = vpop.xlane.xlu0 %2377 }
 0x50c   : > { %v2468_v63 = vadd.f32 %v2378_v9, %v2340_v14 }
 0x50e   : > { %2501 = vst.msk [vmem:[#allocation4 + $0x10] sm:$0xff] %vm784_vm0, %v2468_v63  ;;  %v2372_v29 = vpop.xlane.xlu1 %2371  ;;  %v2344_v63 = vmul.f32 %v6098_v7, %v2312_v30  ;;  %v2313_v30 = vld [vmem:[#allocation4 + $0x38] sm:$0xff] }
 0x50f   : > { %v3848_v52 = vpop.f32.mrb[48].mxu0  ;;  %v2466_v6 = vadd.f32 %v2372_v29, %v2338_v61  ;;  %v2384_v0 = vpop.xlane.xlu0 %2383  ;;  %v2311_v61 = vld [vmem:[#allocation4 + $0x28] sm:$0xff]  ;;  %v2724_v29 = vmul.f32 0.0, %v6348_v8 }
 0x510   : > { %v3849_v31 = vpop.f32.mrb[49].mxu0  ;;  %v2470_v12 = vadd.f32 %v2384_v0, %v2342_v23  ;;  %v2314_v0 = vld [vmem:[#allocation4 + $0x40] sm:$0xff]  ;;  %v2343_v40 = vmul.f32 %v6096_v51, %v2311_v61 }
 0x511   : > { %v3064_v33 = vld [vmem:[#allocation4 + $0x8] sm:$0xff]  ;;  %2499 = vst.msk [vmem:[#allocation4] sm:$0xff] %vm784_vm0, %v2466_v6  ;;  %v3850_v14 = vadd.f32 %v3849_v31, %v3848_v52  ;;  %v3851_v9 = vpop.f32.mrb[50].mxu0  ;;  %v2346_v7 = vmul.f32 %v6109_v36, %v2314_v0 }
 0x512   : > { %4445 = vrcp.f32 %v3064_v33  ;;  %2503 = vst.msk [vmem:[#allocation4 + $0x20] sm:$0xff] %vm784_vm0, %v2470_v12  ;;  %v3852_v53 = vpop.f32.mrb[51].mxu0  ;;  %v2381_v45 = vpop.xlane.xlu1 %2380  ;;  %v2316_v33 = vld [vmem:[#allocation4 + $0x50] sm:$0xff] }
 0x513   : > { %v3853_v10 = vadd.f32 %v3852_v53, %v3851_v9  ;;  %v2469_v23 = vadd.f32 %v2381_v45, %v2341_v43  ;;  %v2390_v11 = vpop.xlane.xlu0 %2389  ;;  %v6427_v18 = vadd.f32 %v3850_v14, %v2723_v27  ;;  %v2725_v43 = vmul.f32 0.0, %v6353_v1 }
 0x514   : > { %v2472_v52 = vadd.f32 %v2390_v11, %v2344_v63  ;;  %v2345_v63 = vmul.f32 %v6104_v44, %v2313_v30 }
 0x515   : > { %2502 = vst.msk [vmem:[#allocation4 + $0x18] sm:$0xff] %vm784_vm0, %v2469_v23  ;;  %v6431_v31 = vadd.f32 %v3853_v10, %v2724_v29  ;;  %v3065_v53 = vld [vmem:[#allocation4 + $0x10] sm:$0xff]  ;;  %v2348_v29 = vmul.f32 %v6116_v35, %v2316_v33  ;;  %v2315_v10 = vld [vmem:[#allocation4 + $0x48] sm:$0xff]  ;;  %v2726_v23 = vmul.f32 0.0, %v6351_v28 }
 0x516   : > { %2505 = vst.msk [vmem:[#allocation4 + $0x30] sm:$0xff] %vm784_vm0, %v2472_v52  ;;  %v2387_v24 = vpop.xlane.xlu1 %2386  ;;  %v2318_v52 = vld [vmem:[#allocation4 + $0x60] sm:$0xff]  ;;  %v2347_v35 = vmul.f32 %v6114_v50, %v2315_v10 }
 0x517   : > { %v3854_v8 = vpop.f32.mrb[52].mxu0  ;;  %v2471_v6 = vadd.f32 %v2387_v24, %v2343_v40  ;;  %v2396_v12 = vpop.xlane.xlu0 %2395 }
 0x518   : > { %v3063_v9 = vld [vmem:[#allocation4] sm:$0xff]  ;;  %v3855_v27 = vpop.f32.mrb[53].mxu0  ;;  %v2474_v14 = vadd.f32 %v2396_v12, %v2346_v7  ;;  %v2317_v12 = vld [vmem:[#allocation4 + $0x58] sm:$0xff] }
 0x519   : > { %4447 = vrcp.f32 %v3063_v9  ;;  %2504 = vst.msk [vmem:[#allocation4 + $0x28] sm:$0xff] %vm784_vm0, %v2471_v6  ;;  %v3856_v51 = vadd.f32 %v3855_v27, %v3854_v8  ;;  %v3857_v45 = vpop.f32.mrb[54].mxu0  ;;  %v3067_v44 = vld [vmem:[#allocation4 + $0x20] sm:$0xff]  ;;  %v2350_v6 = vmul.f32 %v6127_v42, %v2318_v52 }
 0x51a   : > { %2507 = vst.msk [vmem:[#allocation4 + $0x40] sm:$0xff] %vm784_vm0, %v2474_v14  ;;  %v3858_v36 = vpop.f32.mrb[55].mxu0  ;;  %v2393_v61 = vpop.xlane.xlu1 %2392  ;;  %4449 = vrcp.f32 %v3065_v53  ;;  %v2320_v14 = vld [vmem:[#allocation4 + $0x70] sm:$0xff] }
 0x51b   : > { %v3859_v11 = vadd.f32 %v3858_v36, %v3857_v45  ;;  %v2473_v0 = vadd.f32 %v2393_v61, %v2345_v63  ;;  %v2402_v1 = vpop.xlane.xlu0 %2401  ;;  %v6441_v40 = vadd.f32 %v3856_v51, %v2725_v43  ;;  %v2727_v45 = vmul.f32 0.0, %v6357_v34 }
 0x51c   : > { %v4446_v24 = vpop.eup %4445  ;;  %v3066_v7 = vld [vmem:[#allocation4 + $0x18] sm:$0xff]  ;;  %v2476_v8 = vadd.f32 %v2402_v1, %v2348_v29  ;;  %v2349_v61 = vmul.f32 %v6122_v17, %v2317_v12  ;;  %v2352_v10 = vmul.f32 %v6141_v26, %v2320_v14 }
 0x51d   : > { %4451 = vrcp.f32 %v3066_v7  ;;  %2506 = vst.msk [vmem:[#allocation4 + $0x38] sm:$0xff] %vm784_vm0, %v2473_v0  ;;  %3166 = vperm.xlu0 %4211, %v4446_v24   ;;  %v6445_v30 = vadd.f32 %v3859_v11, %v2726_v23  ;;  %v3069_v63 = vld [vmem:[#allocation4 + $0x30] sm:$0xff]  ;;  %v2319_v23 = vld [vmem:[#allocation4 + $0x68] sm:$0xff]  ;;  %v2728_v0 = vmul.f32 0.0, %v6355_v56  ;;  %v2322_v24 = vld [vmem:[#allocation4 + $0x80] sm:$0xff] }
 0x51e   : > { %2509 = vst.msk [vmem:[#allocation4 + $0x50] sm:$0xff] %vm784_vm0, %v2476_v8  ;;  %v2399_v28 = vpop.xlane.xlu1 %2398  ;;  %4453 = vrcp.f32 %v3067_v44  ;;  %v2351_v26 = vmul.f32 %v6132_v37, %v2319_v23  ;;  %v2321_v12 = vld [vmem:[#allocation4 + $0x78] sm:$0xff]  ;;  %v2729_v37 = vmul.f32 0.0, %v6364_v15  ;;  %v2323_v23 = vld [vmem:[#allocation4 + $0x88] sm:$0xff] }
 0x51f   : > { %v3860_v33 = vpop.f32.mrb[56].mxu0  ;;  %v2475_v9 = vadd.f32 %v2399_v28, %v2347_v35  ;;  %v2408_v27 = vpop.xlane.xlu0 %2407 }
 0x520   : > { %v3068_v43 = vld [vmem:[#allocation4 + $0x28] sm:$0xff]  ;;  %v3861_v53 = vpop.f32.mrb[57].mxu0  ;;  %v2478_v51 = vadd.f32 %v2408_v27, %v2350_v6  ;;  %v2354_v6 = vmul.f32 %v6156_v4, %v2322_v24 }
 0x521   : > { %4455 = vrcp.f32 %v3068_v43  ;;  %2508 = vst.msk [vmem:[#allocation4 + $0x48] sm:$0xff] %vm784_vm0, %v2475_v9  ;;  %v3862_v50 = vadd.f32 %v3861_v53, %v3860_v33  ;;  %v3863_v36 = vpop.f32.mrb[58].mxu0  ;;  %v3071_v17 = vld [vmem:[#allocation4 + $0x40] sm:$0xff]  ;;  %v2324_v43 = vld [vmem:[#allocation4 + $0x90] sm:$0xff] }
 0x522   : > { %2511 = vst.msk [vmem:[#allocation4 + $0x60] sm:$0xff] %vm784_vm0, %v2478_v51  ;;  %v3864_v42 = vpop.f32.mrb[59].mxu0  ;;  %v2405_v29 = vpop.xlane.xlu1 %2404  ;;  %4457 = vrcp.f32 %v3069_v63 }
 0x523   : > { %v4448_v11 = vpop.eup %4447  ;;  %v3865_v1 = vadd.f32 %v3864_v42, %v3863_v36  ;;  %v2477_v34 = vadd.f32 %v2405_v29, %v2349_v61  ;;  %v2414_v52 = vpop.xlane.xlu0 %2413  ;;  %v6455_v7 = vadd.f32 %v3862_v50, %v2727_v45  ;;  %v2353_v36 = vmul.f32 %v6148_v55, %v2321_v12 }
 0x524   : > { %v3070_v8 = vld [vmem:[#allocation4 + $0x38] sm:$0xff]  ;;  %v2480_v44 = vadd.f32 %v2414_v52, %v2352_v10  ;;  %3161 = vperm.xlu1 %4212, %v4448_v11   ;;  %v4450_v28 = vpop.eup %4449  ;;  %v2356_v10 = vmul.f32 %v6173_v59, %v2324_v43  ;;  %v2326_v52 = vld [vmem:[#allocation4 + $0xa0] sm:$0xff]  ;;  %v2355_v59 = vmul.f32 %v6161_v48, %v2323_v23  ;;  %v2731_v48 = vmul.f32 0.0, %v6368_v32 }
 0x525   : > { %4459 = vrcp.f32 %v3070_v8  ;;  %2510 = vst.msk [vmem:[#allocation4 + $0x58] sm:$0xff] %vm784_vm0, %v2477_v34  ;;  %v6459_v35 = vadd.f32 %v3865_v1, %v2728_v0  ;;  %v3073_v63 = vld [vmem:[#allocation4 + $0x50] sm:$0xff]  ;;  %v2730_v0 = vmul.f32 0.0, %v6362_v60 }
 0x526   : > { %2513 = vst.msk [vmem:[#allocation4 + $0x70] sm:$0xff] %vm784_vm0, %v2480_v44  ;;  %v2411_v56 = vpop.xlane.xlu1 %2410  ;;  %4461 = vrcp.f32 %v3071_v17 }
 0x527   : > { %v4452_v33 = vpop.eup %4451  ;;  %v3866_v9 = vpop.f32.mrb[60].mxu0  ;;  %v2479_v27 = vadd.f32 %v2411_v56, %v2351_v26  ;;  %v2325_v56 = vld [vmem:[#allocation4 + $0x98] sm:$0xff] }
 0x528   : > { %v2420_v14 = vpop.xlane.xlu0 %2419  ;;  %v3072_v53 = vld [vmem:[#allocation4 + $0x48] sm:$0xff]  ;;  %v3867_v51 = vpop.f32.mrb[61].mxu0  ;;  %3171 = vperm.xlu1 %4212, %v4450_v28   ;;  %3176 = vperm.xlu0 %4211, %v4452_v33   ;;  %v2358_v28 = vmul.f32 %v6185_v47, %v2326_v52 }
 0x529   : > { %v2482_v45 = vadd.f32 %v2420_v14, %v2354_v6  ;;  %4463 = vrcp.f32 %v3072_v53  ;;  %2512 = vst.msk [vmem:[#allocation4 + $0x68] sm:$0xff] %vm784_vm0, %v2479_v27  ;;  %v3868_v50 = vadd.f32 %v3867_v51, %v3866_v9  ;;  %v3869_v4 = vpop.f32.mrb[62].mxu0  ;;  %v4454_v61 = vpop.eup %4453  ;;  %v3075_v44 = vld [vmem:[#allocation4 + $0x60] sm:$0xff]  ;;  %v2328_v27 = vld [vmem:[#allocation4 + $0xb0] sm:$0xff] }
 0x52a   : > { %v3870_v42 = vpop.f32.mrb[63].mxu0  ;;  %v2417_v29 = vpop.xlane.xlu1 %2416  ;;  %4465 = vrcp.f32 %v3073_v63 }
 0x52b   : > { %2515 = vst.msk [vmem:[#allocation4 + $0x80] sm:$0xff] %vm784_vm0, %v2482_v45  ;;  %v4456_v11 = vpop.eup %4455  ;;  %v3871_v15 = vadd.f32 %v3870_v42, %v3869_v4  ;;  %v2481_v1 = vadd.f32 %v2417_v29, %v2353_v36  ;;  %v6469_v24 = vadd.f32 %v3868_v50, %v2729_v37  ;;  %v2357_v37 = vmul.f32 %v6180_v58, %v2325_v56 }
 0x52c   : > { %v2426_v34 = vpop.xlane.xlu0 %2425  ;;  %v3074_v8 = vld [vmem:[#allocation4 + $0x58] sm:$0xff]  ;;  %3181 = vperm.xlu1 %4212, %v4454_v61   ;;  %3186 = vperm.xlu0 %4211, %v4456_v11   ;;  %v4458_v60 = vpop.eup %4457  ;;  %v2360_v36 = vmul.f32 %v6202_v20, %v2328_v27  ;;  %v2327_v61 = vld [vmem:[#allocation4 + $0xa8] sm:$0xff]  ;;  %v2732_v29 = vmul.f32 0.0, %v6366_v49  ;;  %v2330_v11 = vld [vmem:[#allocation4 + $0xc0] sm:$0xff] }
 0x52d   : > { %v2484_v55 = vadd.f32 %v2426_v34, %v2356_v10  ;;  %4467 = vrcp.f32 %v3074_v8  ;;  %2514 = vst.msk [vmem:[#allocation4 + $0x78] sm:$0xff] %vm784_vm0, %v2481_v1  ;;  %v6473_v17 = vadd.f32 %v3871_v15, %v2730_v0  ;;  %v3077_v51 = vld [vmem:[#allocation4 + $0x70] sm:$0xff]  ;;  %v2359_v20 = vmul.f32 %v6190_v5, %v2327_v61 }
 0x52e   : > { %v2423_v26 = vpop.xlane.xlu1 %2422  ;;  %4469 = vrcp.f32 %v3075_v44  ;;  %v2362_v8 = vmul.f32 %v6214_v46, %v2330_v11  ;;  %v2733_v5 = vmul.f32 0.0, %v6375_v54  ;;  %v7060_v27 = vld [vmem:[#allocation79_spill] sm:$0xff] }
 0x52f   : > { %2517 = vst.msk [vmem:[#allocation4 + $0x90] sm:$0xff] %vm784_vm0, %v2484_v55  ;;  %v4460_v6 = vpop.eup %4459  ;;  %v3872_v12 = vpop.f32.mrb[64].mxu0  ;;  %v2483_v33 = vadd.f32 %v2423_v26, %v2355_v59  ;;  %v2329_v55 = vld [vmem:[#allocation4 + $0xb8] sm:$0xff] }
 0x530   : > { %v2432_v9 = vpop.xlane.xlu0 %2431  ;;  %v3076_v14 = vld [vmem:[#allocation4 + $0x68] sm:$0xff]  ;;  %v3873_v43 = vpop.f32.mrb[65].mxu0  ;;  %3191 = vperm.xlu1 %4212, %v4458_v60   ;;  %3196 = vperm.xlu0 %4211, %v4460_v6  }
 0x531   : > { %v2486_v53 = vadd.f32 %v2432_v9, %v2358_v28  ;;  %4471 = vrcp.f32 %v3076_v14  ;;  %2516 = vst.msk [vmem:[#allocation4 + $0x88] sm:$0xff] %vm784_vm0, %v2483_v33  ;;  %v3874_v45 = vadd.f32 %v3873_v43, %v3872_v12  ;;  %v3875_v47 = vpop.f32.mrb[66].mxu0  ;;  %v4462_v63 = vpop.eup %4461  ;;  %v2332_v28 = vld [vmem:[#allocation4 + $0xd0] sm:$0xff]  ;;  %v2361_v14 = vmul.f32 %v7060_v27, %v2329_v55 }
 0x532   : > { %v3876_v50 = vpop.f32.mrb[67].mxu0  ;;  %v2429_v4 = vpop.xlane.xlu1 %2428  ;;  %4473 = vrcp.f32 %v3077_v51  ;;  %v3079_v1 = vld [vmem:[#allocation4 + $0x80] sm:$0xff] }
 0x533   : > { %2519 = vst.msk [vmem:[#allocation4 + $0xa0] sm:$0xff] %vm784_vm0, %v2486_v53  ;;  %v4464_v42 = vpop.eup %4463  ;;  %v3877_v32 = vadd.f32 %v3876_v50, %v3875_v47  ;;  %v2485_v10 = vadd.f32 %v2429_v4, %v2357_v37  ;;  %v6483_v0 = vadd.f32 %v3874_v45, %v2731_v48  ;;  %v7061_v51 = vld [vmem:[#allocation85_spill] sm:$0xff]  ;;  %v2331_v47 = vld [vmem:[#allocation4 + $0xc8] sm:$0xff] }
 0x534   : > { %v2438_v23 = vpop.xlane.xlu0 %2437  ;;  %v3078_v15 = vld [vmem:[#allocation4 + $0x78] sm:$0xff]  ;;  %3201 = vperm.xlu1 %4212, %v4462_v63   ;;  %3206 = vperm.xlu0 %4211, %v4464_v42   ;;  %v4466_v49 = vpop.eup %4465  ;;  %v2364_v45 = vmul.f32 %v7061_v51, %v2332_v28  ;;  %v2734_v63 = vmul.f32 0.0, %v6373_v57  ;;  %v2735_v28 = vmul.f32 0.0, %v6379_v62  ;;  %v2736_v51 = vmul.f32 0.0, %v6377_v41 }
 0x535   : > { %v2488_v58 = vadd.f32 %v2438_v23, %v2360_v36  ;;  %4475 = vrcp.f32 %v3078_v15  ;;  %2518 = vst.msk [vmem:[#allocation4 + $0x98] sm:$0xff] %vm784_vm0, %v2485_v10  ;;  %v6487_v34 = vadd.f32 %v3877_v32, %v2732_v29  ;;  %v2334_v36 = vld [vmem:[#allocation4 + $0xe0] sm:$0xff] }
 0x536   : > { %v2435_v52 = vpop.xlane.xlu1 %2434  ;;  %4477 = vrcp.f32 %v3079_v1  ;;  %v3081_v33 = vld [vmem:[#allocation4 + $0x90] sm:$0xff]  ;;  %v7062_v10 = vld [vmem:[#allocation81_spill] sm:$0xff] }
 0x537   : > { %2521 = vst.msk [vmem:[#allocation4 + $0xb0] sm:$0xff] %vm784_vm0, %v2488_v58  ;;  %v4468_v44 = vpop.eup %4467  ;;  %v3878_v59 = vpop.f32.mrb[68].mxu0  ;;  %v2487_v60 = vadd.f32 %v2435_v52, %v2359_v20  ;;  %v2363_v23 = vmul.f32 %v7062_v10, %v2331_v47  ;;  %v7063_v58 = vld [vmem:[#allocation25_spill] sm:$0xff]  ;;  %v2333_v20 = vld [vmem:[#allocation4 + $0xd8] sm:$0xff] }
 0x538   : > { %v2444_v26 = vpop.xlane.xlu0 %2443  ;;  %v3080_v56 = vld [vmem:[#allocation4 + $0x88] sm:$0xff]  ;;  %v3879_v6 = vpop.f32.mrb[69].mxu0  ;;  %3211 = vperm.xlu1 %4212, %v4466_v49   ;;  %3216 = vperm.xlu0 %4211, %v4468_v44   ;;  %v2366_v1 = vmul.f32 %v7063_v58, %v2334_v36  ;;  %v2336_v44 = vld [vmem:[#allocation4 + $0xf0] sm:$0xff] }
 0x539   : > { %v2490_v12 = vadd.f32 %v2444_v26, %v2362_v8  ;;  %4479 = vrcp.f32 %v3080_v56  ;;  %2520 = vst.msk [vmem:[#allocation4 + $0xa8] sm:$0xff] %vm784_vm0, %v2487_v60  ;;  %v3880_v9 = vadd.f32 %v3879_v6, %v3878_v59  ;;  %v3881_v46 = vpop.f32.mrb[70].mxu0  ;;  %v4470_v43 = vpop.eup %4469 }
 0x53a   : > { %v3882_v53 = vpop.f32.mrb[71].mxu0  ;;  %v2441_v48 = vpop.xlane.xlu1 %2440  ;;  %4481 = vrcp.f32 %v3081_v33  ;;  %v3083_v32 = vld [vmem:[#allocation4 + $0xa0] sm:$0xff] }
 0x53b   : > { %2523 = vst.msk [vmem:[#allocation4 + $0xc0] sm:$0xff] %vm784_vm0, %v2490_v12  ;;  %v4472_v37 = vpop.eup %4471  ;;  %v3883_v54 = vadd.f32 %v3882_v53, %v3881_v46  ;;  %v2489_v50 = vadd.f32 %v2441_v48, %v2361_v14  ;;  %v6497_v61 = vadd.f32 %v3880_v9, %v2733_v5  ;;  %v7064_v5 = vld [vmem:[#allocation83_spill] sm:$0xff]  ;;  %v7065_v14 = vld [vmem:[#allocation80_spill] sm:$0xff]  ;;  %v2335_v53 = vld [vmem:[#allocation4 + $0xe8] sm:$0xff] }
 0x53c   : > { %v2450_v4 = vpop.xlane.xlu0 %2449  ;;  %v3082_v42 = vld [vmem:[#allocation4 + $0x98] sm:$0xff]  ;;  %3221 = vperm.xlu1 %4212, %v4470_v43   ;;  %3226 = vperm.xlu0 %4211, %v4472_v37   ;;  %v4474_v57 = vpop.eup %4473  ;;  %v2365_v33 = vmul.f32 %v7064_v5, %v2333_v20  ;;  %v2368_v43 = vmul.f32 %v7065_v14, %v2336_v44 }
 0x53d   : > { %v2492_v29 = vadd.f32 %v2450_v4, %v2364_v45  ;;  %4483 = vrcp.f32 %v3082_v42  ;;  %2522 = vst.msk [vmem:[#allocation4 + $0xb8] sm:$0xff] %vm784_vm0, %v2489_v50  ;;  %v6501_v11 = vadd.f32 %v3883_v54, %v2734_v63  ;;  %v7066_v4 = vld [vmem:[#allocation26_spill] sm:$0xff] }
 0x53e   : > { %v2447_v15 = vpop.xlane.xlu1 %2446  ;;  %4485 = vrcp.f32 %v3083_v32  ;;  %v3085_v56 = vld [vmem:[#allocation4 + $0xb0] sm:$0xff]  ;;  %v2367_v36 = vmul.f32 %v7066_v4, %v2335_v53  ;;  %v2337_v32 = vld [vmem:[#allocation4 + $0xf8] sm:$0xff] }
 0x53f   : > { %2525 = vst.msk [vmem:[#allocation4 + $0xd0] sm:$0xff] %vm784_vm0, %v2492_v29  ;;  %v4476_v49 = vpop.eup %4475  ;;  %v3884_v52 = vpop.f32.mrb[72].mxu0  ;;  %v2491_v8 = vadd.f32 %v2447_v15, %v2363_v23 }
 0x540   : > { %v2456_v55 = vpop.xlane.xlu0 %2455  ;;  %v3084_v59 = vld [vmem:[#allocation4 + $0xa8] sm:$0xff]  ;;  %v3885_v60 = vpop.f32.mrb[73].mxu0  ;;  %3231 = vperm.xlu1 %4212, %v4474_v57   ;;  %3236 = vperm.xlu0 %4211, %v4476_v49  }
 0x541   : > { %v2494_v26 = vadd.f32 %v2456_v55, %v2366_v1  ;;  %4487 = vrcp.f32 %v3084_v59  ;;  %2524 = vst.msk [vmem:[#allocation4 + $0xc8] sm:$0xff] %vm784_vm0, %v2491_v8  ;;  %v3886_v6 = vadd.f32 %v3885_v60, %v3884_v52  ;;  %v3887_v12 = vpop.f32.mrb[74].mxu0  ;;  %v4478_v9 = vpop.eup %4477  ;;  %v2737_v1 = vmul.f32 0.0, %v6383_v25 }
 0x542   : > { %v3888_v46 = vpop.f32.mrb[75].mxu0  ;;  %v2453_v27 = vpop.xlane.xlu1 %2452  ;;  %4489 = vrcp.f32 %v3085_v56  ;;  %v3087_v50 = vld [vmem:[#allocation4 + $0xc0] sm:$0xff]  ;;  %v2369_v8 = vmul.f32 %v6370_v19, %v2337_v32 }
 0x543   : > { %2527 = vst.msk [vmem:[#allocation4 + $0xe0] sm:$0xff] %vm784_vm0, %v2494_v26  ;;  %v4480_v48 = vpop.eup %4479  ;;  %v3889_v62 = vadd.f32 %v3888_v46, %v3887_v12  ;;  %v2493_v45 = vadd.f32 %v2453_v27, %v2365_v33  ;;  %v6511_v37 = vadd.f32 %v3886_v6, %v2735_v28  ;;  %v2738_v26 = vmul.f32 0.0, %v6381_v39 }
 0x544   : > { %v2462_v47 = vpop.xlane.xlu0 %2461  ;;  %v3086_v63 = vld [vmem:[#allocation4 + $0xb8] sm:$0xff]  ;;  %3241 = vperm.xlu1 %4212, %v4478_v9   ;;  %3246 = vperm.xlu0 %4211, %v4480_v48   ;;  %v4482_v29 = vpop.eup %4481  ;;  %v2739_v27 = vmul.f32 0.0, %v6387_v22 }
 0x545   : > { %v2496_v54 = vadd.f32 %v2462_v47, %v2368_v43  ;;  %4491 = vrcp.f32 %v3086_v63  ;;  %2526 = vst.msk [vmem:[#allocation4 + $0xd8] sm:$0xff] %vm784_vm0, %v2493_v45  ;;  %v6515_v42 = vadd.f32 %v3889_v62, %v2736_v51  ;;  %v2740_v45 = vmul.f32 0.0, %v6385_v16 }
 0x546   : > { %v2459_v41 = vpop.xlane.xlu1 %2458  ;;  %4493 = vrcp.f32 %v3087_v50  ;;  %v3089_v20 = vld [vmem:[#allocation4 + $0xd0] sm:$0xff] }
 0x547   : > { %2529 = vst.msk [vmem:[#allocation4 + $0xf0] sm:$0xff] %vm784_vm0, %v2496_v54  ;;  %v4484_v10 = vpop.eup %4483  ;;  %v3890_v23 = vpop.f32.mrb[76].mxu0  ;;  %v2495_v57 = vadd.f32 %v2459_v41, %v2367_v36  ;;  %v2741_v41 = vmul.f32 0.0, %v6391_v2  ;;  %v2743_v2 = vmul.f32 0.0, %v6395_v38 }
 0x548   : > { %v3088_v15 = vld [vmem:[#allocation4 + $0xc8] sm:$0xff]  ;;  %v3891_v58 = vpop.f32.mrb[77].mxu0  ;;  %3251 = vperm.xlu1 %4212, %v4482_v29   ;;  %3256 = vperm.xlu0 %4211, %v4484_v10   ;;  %v4486_v55 = vpop.eup %4485 }
 0x549   : > { %4495 = vrcp.f32 %v3088_v15  ;;  %2528 = vst.msk [vmem:[#allocation4 + $0xe8] sm:$0xff] %vm784_vm0, %v2495_v57  ;;  %v3892_v49 = vadd.f32 %v3891_v58, %v3890_v23  ;;  %v3893_v52 = vpop.f32.mrb[78].mxu0  ;;  %v2742_v15 = vmul.f32 0.0, %v6389_v3  ;;  %v2744_v3 = vmul.f32 0.0, %v6393_v21 }
 0x54a   : > { %v3894_v44 = vpop.f32.mrb[79].mxu0  ;;  %v2465_v59 = vpop.xlane.xlu1 %2464  ;;  %4497 = vrcp.f32 %v3089_v20  ;;  %v3091_v12 = vld [vmem:[#allocation4 + $0xe0] sm:$0xff] }
 0x54b   : > { %v4488_v60 = vpop.eup %4487  ;;  %v3895_v28 = vadd.f32 %v3894_v44, %v3893_v52  ;;  %v2497_v56 = vadd.f32 %v2465_v59, %v2369_v8  ;;  %v6522_v6 = vadd.f32 %v3892_v49, %v2737_v1 }
 0x54c   : > { %v3090_v25 = vld [vmem:[#allocation4 + $0xd8] sm:$0xff]  ;;  %3261 = vperm.xlu1 %4212, %v4486_v55   ;;  %3266 = vperm.xlu0 %4211, %v4488_v60   ;;  %v4490_v19 = vpop.eup %4489 }
 0x54d   : > { %4499 = vrcp.f32 %v3090_v25  ;;  %2530 = vst.msk [vmem:[#allocation4 + $0xf8] sm:$0xff] %vm784_vm0, %v2497_v56  ;;  %v6525_v5 = vadd.f32 %v3895_v28, %v2738_v26 }
 0x54e   : > { %4501 = vrcp.f32 %v3091_v12  ;;  %v3093_v14 = vld [vmem:[#allocation4 + $0xf0] sm:$0xff] }
 0x54f   : > { %v4492_v33 = vpop.eup %4491  ;;  %v3896_v9 = vpop.f32.mrb[80].mxu0 }
 0x550   : > { %v3092_v46 = vld [vmem:[#allocation4 + $0xe8] sm:$0xff]  ;;  %v3897_v39 = vpop.f32.mrb[81].mxu0  ;;  %3271 = vperm.xlu1 %4212, %v4490_v19   ;;  %3276 = vperm.xlu0 %4211, %v4492_v33   ;;  %v4494_v48 = vpop.eup %4493  ;;  %v2745_v19 = vmul.f32 0.0, %v6399_v13 }
 0x551   : > { %4503 = vrcp.f32 %v3092_v46  ;;  %v3898_v43 = vadd.f32 %v3897_v39, %v3896_v9  ;;  %v3899_v53 = vpop.f32.mrb[82].mxu0  ;;  %v7067_v39 = vld [vmem:[#allocation82_spill] sm:$0xff] }
 0x552   : > { %v3900_v51 = vpop.f32.mrb[83].mxu0  ;;  %4505 = vrcp.f32 %v3093_v14 }
 0x553   : > { %v4496_v62 = vpop.eup %4495  ;;  %v3901_v47 = vadd.f32 %v3900_v51, %v3899_v53  ;;  %v6529_v63 = vadd.f32 %v3898_v43, %v2739_v27  ;;  %v2746_v27 = vmul.f32 0.0, %v7067_v39  ;;  %v2721_v39 = vpop.permute.xlu0 %2720 }
 0x554   : > { %v3094_v54 = vld [vmem:[#allocation4 + $0xf8] sm:$0xff]  ;;  %3281 = vperm.xlu1 %4212, %v4494_v48   ;;  %3286 = vperm.xlu0 %4211, %v4496_v62   ;;  %v4498_v22 = vpop.eup %4497 }
 0x555   : > { %4507 = vrcp.f32 %v3094_v54  ;;  %v6531_v50 = vadd.f32 %v3901_v47, %v2740_v45  ;;  %v7068_v48 = vld [vmem:[#allocation84_spill] sm:$0xff]  ;;  %v7069_v54 = vld [vmem:[#allocation86_spill] sm:$0xff] }
 0x556   : > { %v2747_v51 = vmul.f32 0.0, %v7068_v48 }
 0x557   : > { %v4500_v4 = vpop.eup %4499  ;;  %v3902_v36 = vpop.f32.mrb[84].mxu0 }
 0x558   : > { %v3903_v29 = vpop.f32.mrb[85].mxu0  ;;  %3291 = vperm.xlu1 %4212, %v4498_v22   ;;  %3296 = vperm.xlu0 %4211, %v4500_v4   ;;  %v4502_v10 = vpop.eup %4501  ;;  %v2748_v22 = vmul.f32 0.0, %v7069_v54 }
 0x559   : > { %v3904_v32 = vadd.f32 %v3903_v29, %v3902_v36  ;;  %v3905_v16 = vpop.f32.mrb[86].mxu0 }
 0x55a   : > { %v3906_v23 = vpop.f32.mrb[87].mxu0 }
 0x55b   : > { %v4504_v57 = vpop.eup %4503  ;;  %v3907_v58 = vadd.f32 %v3906_v23, %v3905_v16  ;;  %v6535_v1 = vadd.f32 %v3904_v32, %v2741_v41  ;;  %v7070_v32 = vld [vmem:[#allocation87_spill] sm:$0xff] }
 0x55c   : > { %3301 = vperm.xlu1 %4212, %v4502_v10   ;;  %3306 = vperm.xlu0 %4211, %v4504_v57   ;;  %v4506_v49 = vpop.eup %4505  ;;  %v2749_v16 = vmul.f32 0.0, %v7070_v32 }
 0x55d   : > { %v6537_v20 = vadd.f32 %v3907_v58, %v2742_v15  ;;  %v7071_v15 = vld [vmem:[#allocation89_spill] sm:$0xff] }
 0x55e   : > { %v2750_v58 = vmul.f32 0.0, %v7071_v15 }
 0x55f   : > { %v4508_v52 = vpop.eup %4507  ;;  %v3908_v8 = vpop.f32.mrb[88].mxu0 }
 0x560   : > { %v3909_v55 = vpop.f32.mrb[89].mxu0  ;;  %3311 = vperm.xlu1 %4212, %v4506_v49   ;;  %3316 = vperm.xlu0 %4211, %v4508_v52  }
 0x561   : > { %v3910_v44 = vadd.f32 %v3909_v55, %v3908_v8  ;;  %v3911_v59 = vpop.f32.mrb[90].mxu0 }
 0x562   : > { %v3912_v60 = vpop.f32.mrb[91].mxu0 }
 0x563   : > { %v3913_v26 = vadd.f32 %v3912_v60, %v3911_v59  ;;  %v6541_v28 = vadd.f32 %v3910_v44, %v2743_v2  ;;  %v7072_v44 = vld [vmem:[#allocation28_spill] sm:$0xff] }
 0x564   : > { %v2751_v59 = vmul.f32 0.0, %v7072_v44  ;;  %v3388_v44 = vld [vmem:[%s5081_s9 + $0x18] sm:$0xff] }
 0x565   : > { %v6543_v56 = vadd.f32 %v3913_v26, %v2744_v3 }
 0x567   : > { %v3914_v25 = vpop.f32.mrb[92].mxu0 }
 0x568   : > { %v3915_v12 = vpop.f32.mrb[93].mxu0 }
 0x569   : > { %v3916_v33 = vadd.f32 %v3915_v12, %v3914_v25  ;;  %v3917_v9 = vpop.f32.mrb[94].mxu0  ;;  %v7073_v25 = vld [vmem:[#allocation27_spill] sm:$0xff] }
 0x56a   : > { %v3918_v46 = vpop.f32.mrb[95].mxu0  ;;  %v2752_v12 = vmul.f32 0.0, %v7073_v25 }
 0x56b   : > { %v3919_v38 = vadd.f32 %v3918_v46, %v3917_v9  ;;  %v6547_v14 = vadd.f32 %v3916_v33, %v2745_v19 }
 0x56d   : > { %v6549_v43 = vadd.f32 %v3919_v38, %v2746_v27  ;;  %v7074_v38 = vld [vmem:[#allocation90_spill] sm:$0xff] }
 0x56f   : > { %v3920_v21 = vpop.f32.mrb[96].mxu0 }
 0x570   : > { %v3921_v53 = vpop.f32.mrb[97].mxu0 }
 0x571   : > { %v3922_v62 = vadd.f32 %v3921_v53, %v3920_v21  ;;  %v3923_v45 = vpop.f32.mrb[98].mxu0  ;;  %v2753_v21 = vmul.f32 0.0, %v7074_v38 }
 0x572   : > { %v3924_v47 = vpop.f32.mrb[99].mxu0 }
 0x573   : > { %v3925_v13 = vadd.f32 %v3924_v47, %v3923_v45  ;;  %v6553_v4 = vadd.f32 %v3922_v62, %v2747_v51  ;;  %v2754_v62 = vmul.f32 0.0, %v2721_v39 }
 0x575   : > { %v6555_v36 = vadd.f32 %v3925_v13, %v2748_v22  ;;  %v6574_v22 = vstv %s3351_s2 }
 0x577   : > { %v3926_v29 = vpop.f32.mrb[100].mxu0 }
 0x578   : > { %v3927_v41 = vpop.f32.mrb[101].mxu0 }
 0x579   : > { %v3928_v10 = vadd.f32 %v3927_v41, %v3926_v29  ;;  %v3929_v23 = vpop.f32.mrb[102].mxu0  ;;  %v3386_v41 = vld [vmem:[%s5081_s9 + $0x8] sm:$0xff] }
 0x57a   : > { %v3930_v57 = vpop.f32.mrb[103].mxu0 }
 0x57b   : > { %v3931_v49 = vadd.f32 %v3930_v57, %v3929_v23  ;;  %v6559_v52 = vadd.f32 %v3928_v10, %v2749_v16  ;;  %v3385_v57 = vld [vmem:[%s5081_s9] sm:$0xff] }
 0x57d   : > { %v6561_v8 = vadd.f32 %v3931_v49, %v2750_v58 }
 0x57f   : > { %v3932_v55 = vpop.f32.mrb[104].mxu0 }
 0x580   : > { %v3933_v2 = vpop.f32.mrb[105].mxu0 }
 0x581   : > { %v3934_v60 = vadd.f32 %v3933_v2, %v3932_v55  ;;  %v3935_v3 = vpop.f32.mrb[106].mxu0 }
 0x582   : > { %v3936_v26 = vpop.f32.mrb[107].mxu0 }
 0x583   : > { %v3937_v19 = vadd.f32 %v3936_v26, %v3935_v3  ;;  %v6565_v33 = vadd.f32 %v3934_v60, %v2751_v59  ;;  %v3387_v59 = vld [vmem:[%s5081_s9 + $0x10] sm:$0xff] }
 0x585   : > { %v6567_v9 = vadd.f32 %v3937_v19, %v2752_v12 }
 0x587   : > { %v3938_v46 = vpop.f32.mrb[108].mxu0 }
 0x588   : > { %v3939_v27 = vpop.f32.mrb[109].mxu0 }
 0x589   : > { %v3940_v53 = vadd.f32 %v3939_v27, %v3938_v46  ;;  %v3941_v48 = vpop.f32.mrb[110].mxu0  ;;  %v3389_v46 = vld [vmem:[%s5081_s9 + $0x20] sm:$0xff] }
 0x58a   : > { %v3942_v51 = vpop.f32.mrb[111].mxu0 }
 0x58b   : > { %v3943_v45 = vadd.f32 %v3942_v51, %v3941_v48  ;;  %v6570_v47 = vadd.f32 %v3940_v53, %v2753_v21  ;;  %v3392_v51 = vld [vmem:[%s5081_s9 + $0x38] sm:$0xff] }
 0x58d   : > { %v6572_v54 = vadd.f32 %v3943_v45, %v2754_v62  ;;  %v3391_v62 = vld [vmem:[%s5081_s9 + $0x30] sm:$0xff] }
 0x59c   : > { %v3167_v13 = vpop.permute.xlu0 %3166 }
 0x59d   : > { %v3320_v29 = vmul.f32 %v3167_v13, %v6431_v31 }
 0x59f   : > { %v3354_v32 = vmul.f32 %v6574_v22, %v3320_v29 }
 0x5a1   : > { %v3418_v16 = vadd.f32 %v3386_v41, %v3354_v32 }
 0x5a3   : > { %3450 = vst [vmem:[%s6581_s21 + $0x8] sm:$0xff] %v3418_v16  ;;  %v3162_v10 = vpop.permute.xlu1 %3161 }
 0x5a4   : > { %v3319_v23 = vmul.f32 %v3162_v10, %v6427_v18  ;;  %v3394_v10 = vld [vmem:[%s5081_s9 + $0x48] sm:$0xff] }
 0x5a6   : > { %v3353_v15 = vmul.f32 %v6574_v22, %v3319_v23  ;;  %v3393_v23 = vld [vmem:[%s5081_s9 + $0x40] sm:$0xff] }
 0x5a7   : > { %v3177_v58 = vpop.permute.xlu0 %3176  ;;  %v3172_v31 = vpop.permute.xlu1 %3171 }
 0x5a8   : > { %v3417_v49 = vadd.f32 %v3385_v57, %v3353_v15  ;;  %v3322_v55 = vmul.f32 %v3177_v58, %v6445_v30  ;;  %v3321_v2 = vmul.f32 %v3172_v31, %v6441_v40  ;;  %v3390_v40 = vld [vmem:[%s5081_s9 + $0x28] sm:$0xff] }
 0x5aa   : > { %3449 = vst [vmem:[%s6581_s21] sm:$0xff] %v3417_v49  ;;  %v3356_v60 = vmul.f32 %v6574_v22, %v3322_v55  ;;  %v3355_v18 = vmul.f32 %v6574_v22, %v3321_v2  ;;  %v3396_v2 = vld [vmem:[%s5081_s9 + $0x58] sm:$0xff] }
 0x5ab   : > { %v3187_v3 = vpop.permute.xlu0 %3186  ;;  %v3182_v26 = vpop.permute.xlu1 %3181 }
 0x5ac   : > { %v3420_v25 = vadd.f32 %v3388_v44, %v3356_v60  ;;  %v3419_v12 = vadd.f32 %v3387_v59, %v3355_v18  ;;  %v3324_v19 = vmul.f32 %v3187_v3, %v6459_v35  ;;  %v3323_v30 = vmul.f32 %v3182_v26, %v6455_v7  ;;  %v3395_v44 = vld [vmem:[%s5081_s9 + $0x50] sm:$0xff] }
 0x5ae   : > { %3452 = vst [vmem:[%s6581_s21 + $0x18] sm:$0xff] %v3420_v25  ;;  %3451 = vst [vmem:[%s6581_s21 + $0x10] sm:$0xff] %v3419_v12  ;;  %v3358_v39 = vmul.f32 %v6574_v22, %v3324_v19  ;;  %v3357_v27 = vmul.f32 %v6574_v22, %v3323_v30  ;;  %v3398_v12 = vld [vmem:[%s5081_s9 + $0x68] sm:$0xff]  ;;  %v3397_v19 = vld [vmem:[%s5081_s9 + $0x60] sm:$0xff] }
 0x5af   : > { %v3197_v38 = vpop.permute.xlu0 %3196  ;;  %v3192_v21 = vpop.permute.xlu1 %3191 }
 0x5b0   : > { %v3422_v53 = vadd.f32 %v3390_v40, %v3358_v39  ;;  %v3421_v48 = vadd.f32 %v3389_v46, %v3357_v27  ;;  %v3326_v35 = vmul.f32 %v3197_v38, %v6473_v17  ;;  %v3325_v7 = vmul.f32 %v3192_v21, %v6469_v24  ;;  %v3400_v21 = vld [vmem:[%s5081_s9 + $0x78] sm:$0xff] }
 0x5b2   : > { %3454 = vst [vmem:[%s6581_s21 + $0x28] sm:$0xff] %v3422_v53  ;;  %3453 = vst [vmem:[%s6581_s21 + $0x20] sm:$0xff] %v3421_v48  ;;  %v3360_v45 = vmul.f32 %v6574_v22, %v3326_v35  ;;  %v3359_v13 = vmul.f32 %v6574_v22, %v3325_v7  ;;  %v3399_v53 = vld [vmem:[%s5081_s9 + $0x70] sm:$0xff] }
 0x5b3   : > { %v3207_v29 = vpop.permute.xlu0 %3206  ;;  %v3202_v41 = vpop.permute.xlu1 %3201 }
 0x5b4   : > { %v3424_v32 = vadd.f32 %v3392_v51, %v3360_v45  ;;  %v3423_v16 = vadd.f32 %v3391_v62, %v3359_v13  ;;  %v3328_v17 = vmul.f32 %v3207_v29, %v6487_v34  ;;  %v3327_v24 = vmul.f32 %v3202_v41, %v6483_v0  ;;  %v3402_v13 = vld [vmem:[%s5081_s9 + $0x88] sm:$0xff]  ;;  %v3401_v29 = vld [vmem:[%s5081_s9 + $0x80] sm:$0xff] }
 0x5b6   : > { %3456 = vst [vmem:[%s6581_s21 + $0x38] sm:$0xff] %v3424_v32  ;;  %3455 = vst [vmem:[%s6581_s21 + $0x30] sm:$0xff] %v3423_v16  ;;  %v3362_v57 = vmul.f32 %v6574_v22, %v3328_v17  ;;  %v3361_v15 = vmul.f32 %v6574_v22, %v3327_v24 }
 0x5b7   : > { %v3217_v58 = vpop.permute.xlu0 %3216  ;;  %v3212_v31 = vpop.permute.xlu1 %3211 }
 0x5b8   : > { %v3426_v49 = vadd.f32 %v3394_v10, %v3362_v57  ;;  %v3425_v55 = vadd.f32 %v3393_v23, %v3361_v15  ;;  %v3330_v34 = vmul.f32 %v3217_v58, %v6501_v11  ;;  %v3329_v0 = vmul.f32 %v3212_v31, %v6497_v61  ;;  %v3404_v23 = vld [vmem:[%s5081_s9 + $0x98] sm:$0xff]  ;;  %v3403_v57 = vld [vmem:[%s5081_s9 + $0x90] sm:$0xff] }
 0x5ba   : > { %3458 = vst [vmem:[%s6581_s21 + $0x48] sm:$0xff] %v3426_v49  ;;  %3457 = vst [vmem:[%s6581_s21 + $0x40] sm:$0xff] %v3425_v55  ;;  %v3364_v59 = vmul.f32 %v6574_v22, %v3330_v34  ;;  %v3363_v60 = vmul.f32 %v6574_v22, %v3329_v0  ;;  %v3406_v0 = vld [vmem:[%s5081_s9 + $0xa8] sm:$0xff] }
 0x5bb   : > { %v3227_v18 = vpop.permute.xlu0 %3226  ;;  %v3222_v3 = vpop.permute.xlu1 %3221 }
 0x5bc   : > { %v3428_v26 = vadd.f32 %v3396_v2, %v3364_v59  ;;  %v3427_v25 = vadd.f32 %v3395_v44, %v3363_v60  ;;  %v3332_v11 = vmul.f32 %v3227_v18, %v6515_v42  ;;  %v3331_v61 = vmul.f32 %v3222_v3, %v6511_v37  ;;  %v3405_v2 = vld [vmem:[%s5081_s9 + $0xa0] sm:$0xff] }
 0x5be   : > { %3460 = vst [vmem:[%s6581_s21 + $0x58] sm:$0xff] %v3428_v26  ;;  %3459 = vst [vmem:[%s6581_s21 + $0x50] sm:$0xff] %v3427_v25  ;;  %v3366_v30 = vmul.f32 %v6574_v22, %v3332_v11  ;;  %v3365_v40 = vmul.f32 %v6574_v22, %v3331_v61  ;;  %v3408_v25 = vld [vmem:[%s5081_s9 + $0xb8] sm:$0xff]  ;;  %v3407_v11 = vld [vmem:[%s5081_s9 + $0xb0] sm:$0xff] }
 0x5bf   : > { %v3237_v46 = vpop.permute.xlu0 %3236  ;;  %v3232_v39 = vpop.permute.xlu1 %3231 }
 0x5c0   : > { %v3430_v27 = vadd.f32 %v3398_v12, %v3366_v30  ;;  %v3429_v38 = vadd.f32 %v3397_v19, %v3365_v40  ;;  %v3334_v42 = vmul.f32 %v3237_v46, %v6525_v5  ;;  %v3333_v37 = vmul.f32 %v3232_v39, %v6522_v6  ;;  %v3410_v39 = vld [vmem:[%s5081_s9 + $0xc8] sm:$0xff] }
 0x5c2   : > { %3462 = vst [vmem:[%s6581_s21 + $0x68] sm:$0xff] %v3430_v27  ;;  %3461 = vst [vmem:[%s6581_s21 + $0x60] sm:$0xff] %v3429_v38  ;;  %v3368_v48 = vmul.f32 %v6574_v22, %v3334_v42  ;;  %v3367_v35 = vmul.f32 %v6574_v22, %v3333_v37  ;;  %v3409_v27 = vld [vmem:[%s5081_s9 + $0xc0] sm:$0xff] }
 0x5c3   : > { %v3247_v7 = vpop.permute.xlu0 %3246  ;;  %v3242_v51 = vpop.permute.xlu1 %3241 }
 0x5c4   : > { %v3432_v62 = vadd.f32 %v3400_v21, %v3368_v48  ;;  %v3431_v45 = vadd.f32 %v3399_v53, %v3367_v35  ;;  %v3336_v5 = vmul.f32 %v3247_v7, %v6531_v50  ;;  %v3335_v6 = vmul.f32 %v3242_v51, %v6529_v63  ;;  %v3412_v35 = vld [vmem:[%s5081_s9 + $0xd8] sm:$0xff]  ;;  %v3411_v7 = vld [vmem:[%s5081_s9 + $0xd0] sm:$0xff] }
 0x5c6   : > { %3464 = vst [vmem:[%s6581_s21 + $0x78] sm:$0xff] %v3432_v62  ;;  %3463 = vst [vmem:[%s6581_s21 + $0x70] sm:$0xff] %v3431_v45  ;;  %v3370_v41 = vmul.f32 %v6574_v22, %v3336_v5  ;;  %v3369_v32 = vmul.f32 %v6574_v22, %v3335_v6 }
 0x5c7   : > { %v3257_v16 = vpop.permute.xlu0 %3256  ;;  %v3252_v17 = vpop.permute.xlu1 %3251 }
 0x5c8   : > { %v3434_v24 = vadd.f32 %v3402_v13, %v3370_v41  ;;  %v3433_v10 = vadd.f32 %v3401_v29, %v3369_v32  ;;  %v3338_v50 = vmul.f32 %v3257_v16, %v6537_v20  ;;  %v3337_v63 = vmul.f32 %v3252_v17, %v6535_v1  ;;  %v3414_v29 = vld [vmem:[%s5081_s9 + $0xe8] sm:$0xff]  ;;  %v3413_v41 = vld [vmem:[%s5081_s9 + $0xe0] sm:$0xff] }
 0x5ca   : > { %3466 = vst [vmem:[%s6581_s21 + $0x88] sm:$0xff] %v3434_v24  ;;  %3465 = vst [vmem:[%s6581_s21 + $0x80] sm:$0xff] %v3433_v10  ;;  %v3372_v15 = vmul.f32 %v6574_v22, %v3338_v50  ;;  %v3371_v58 = vmul.f32 %v6574_v22, %v3337_v63  ;;  %v3416_v63 = vld [vmem:[%s5081_s9 + $0xf8] sm:$0xff] }
 0x5cb   : > { %v3267_v31 = vpop.permute.xlu0 %3266  ;;  %v3262_v49 = vpop.permute.xlu1 %3261 }
 0x5cc   : > { %v3436_v55 = vadd.f32 %v3404_v23, %v3372_v15  ;;  %v3435_v34 = vadd.f32 %v3403_v57, %v3371_v58  ;;  %v3340_v20 = vmul.f32 %v3267_v31, %v6543_v56  ;;  %v3339_v1 = vmul.f32 %v3262_v49, %v6541_v28  ;;  %v3415_v23 = vld [vmem:[%s5081_s9 + $0xf0] sm:$0xff]  ;;  %s3482_s9 = scalar_lea.sflag [#allocation9], %s5075_s10 }
 0x5ce   : > { %3468 = vst [vmem:[%s6581_s21 + $0x98] sm:$0xff] %v3436_v55  ;;  %3467 = vst [vmem:[%s6581_s21 + $0x90] sm:$0xff] %v3435_v34  ;;  %v3374_v44 = vmul.f32 %v6574_v22, %v3340_v20  ;;  %v3373_v59 = vmul.f32 %v6574_v22, %v3339_v1 }
 0x5cf   : > { %v3277_v60 = vpop.permute.xlu0 %3276  ;;  %v3272_v18 = vpop.permute.xlu1 %3271 }
 0x5d0   : > { %v3438_v3 = vadd.f32 %v3406_v0, %v3374_v44  ;;  %v3437_v26 = vadd.f32 %v3405_v2, %v3373_v59  ;;  %v3342_v56 = vmul.f32 %v3277_v60, %v6549_v43  ;;  %v3341_v28 = vmul.f32 %v3272_v18, %v6547_v14 }
 0x5d2   : > { %3470 = vst [vmem:[%s6581_s21 + $0xa8] sm:$0xff] %v3438_v3  ;;  %3469 = vst [vmem:[%s6581_s21 + $0xa0] sm:$0xff] %v3437_v26  ;;  %v3376_v61 = vmul.f32 %v6574_v22, %v3342_v56  ;;  %v3375_v12 = vmul.f32 %v6574_v22, %v3341_v28 }
 0x5d3   : > { %v3287_v19 = vpop.permute.xlu0 %3286  ;;  %v3282_v30 = vpop.permute.xlu1 %3281 }
 0x5d4   : > { %v3440_v40 = vadd.f32 %v3408_v25, %v3376_v61  ;;  %v3439_v46 = vadd.f32 %v3407_v11, %v3375_v12  ;;  %v3344_v43 = vmul.f32 %v3287_v19, %v6555_v36  ;;  %v3343_v14 = vmul.f32 %v3282_v30, %v6553_v4 }
 0x5d6   : > { %3472 = vst [vmem:[%s6581_s21 + $0xb8] sm:$0xff] %v3440_v40  ;;  %3471 = vst [vmem:[%s6581_s21 + $0xb0] sm:$0xff] %v3439_v46  ;;  %v3378_v38 = vmul.f32 %v6574_v22, %v3344_v43  ;;  %v3377_v42 = vmul.f32 %v6574_v22, %v3343_v14 }
 0x5d7   : > { %v3297_v37 = vpop.permute.xlu0 %3296  ;;  %v3292_v21 = vpop.permute.xlu1 %3291 }
 0x5d8   : > { %v3442_v53 = vadd.f32 %v3410_v39, %v3378_v38  ;;  %v3441_v48 = vadd.f32 %v3409_v27, %v3377_v42  ;;  %v3346_v36 = vmul.f32 %v3297_v37, %v6561_v8  ;;  %v3345_v4 = vmul.f32 %v3292_v21, %v6559_v52 }
 0x5da   : > { %3474 = vst [vmem:[%s6581_s21 + $0xc8] sm:$0xff] %v3442_v53  ;;  %3473 = vst [vmem:[%s6581_s21 + $0xc0] sm:$0xff] %v3441_v48  ;;  %v3380_v51 = vmul.f32 %v6574_v22, %v3346_v36  ;;  %v3379_v62 = vmul.f32 %v6574_v22, %v3345_v4 }
 0x5db   : > { %v3307_v45 = vpop.permute.xlu0 %3306  ;;  %v3302_v5 = vpop.permute.xlu1 %3301 }
 0x5dc   : > { %v3444_v6 = vadd.f32 %v3412_v35, %v3380_v51  ;;  %v3443_v13 = vadd.f32 %v3411_v7, %v3379_v62  ;;  %v3348_v8 = vmul.f32 %v3307_v45, %v6567_v9  ;;  %v3347_v52 = vmul.f32 %v3302_v5, %v6565_v33 }
 0x5de   : > { %3476 = vst [vmem:[%s6581_s21 + $0xd8] sm:$0xff] %v3444_v6  ;;  %3475 = vst [vmem:[%s6581_s21 + $0xd0] sm:$0xff] %v3443_v13  ;;  %v3382_v32 = vmul.f32 %v6574_v22, %v3348_v8  ;;  %v3381_v16 = vmul.f32 %v6574_v22, %v3347_v52 }
 0x5df   : > { %v3317_v17 = vpop.permute.xlu0 %3316  ;;  %v3312_v24 = vpop.permute.xlu1 %3311 }
 0x5e0   : > { %v3446_v10 = vadd.f32 %v3414_v29, %v3382_v32  ;;  %v3445_v50 = vadd.f32 %v3413_v41, %v3381_v16  ;;  %v3350_v9 = vmul.f32 %v3317_v17, %v6572_v54  ;;  %v3349_v33 = vmul.f32 %v3312_v24, %v6570_v47 }
 0x5e2   : > { %3478 = vst [vmem:[%s6581_s21 + $0xe8] sm:$0xff] %v3446_v10  ;;  %3477 = vst [vmem:[%s6581_s21 + $0xe0] sm:$0xff] %v3445_v50  ;;  %v3384_v57 = vmul.f32 %v6574_v22, %v3350_v9  ;;  %v3383_v15 = vmul.f32 %v6574_v22, %v3349_v33 }
 0x5e4   : > { %v3448_v47 = vadd.f32 %v3416_v63, %v3384_v57  ;;  %v3447_v54 = vadd.f32 %v3415_v23, %v3383_v15 }
 0x5e6   : > { %3480 = vst [vmem:[%s6581_s21 + $0xf8] sm:$0xff] %v3448_v47  ;;  %3479 = vst [vmem:[%s6581_s21 + $0xf0] sm:$0xff] %v3447_v54 }
 0x5e7   : > { %4666 = shalt.err (!%p4663_p11)
}
 0x5e8   : > { %s4667_s28 = scalar_lea.hbm %s6711_s4, 4096  ;;  %s4671_s24 = scalar_lea.hbm %s7077_s0, 8192 }
 0x5e9   : > { %p4668_p12 = scmp.ne.s32.totalorder %s6711_s4, %s4667_s28  ;;  %p4672_p9 = scmp.lt.u32.totalorder %s6711_s4, %s7077_s0 }
 0x5ea   : > { %p4673_p0 = scmp.lt.u32.totalorder %s4671_s24, %s4667_s28  ;;  %p4675_p4 = scmp.lt.u32.totalorder %s4667_s28, %s6711_s4 }
 0x5eb   : > { %p4669_p6 = pnand %p4668_p12, %p4973_p10 }
 0x5ec   : > { %p4674_p2 = por %p4673_p0, %p4672_p9 }
 0x5ed   : > { %p4670_p7 = pneg %p4669_p6 }
 0x5ee   : > { %p4676_p8 = por %p4675_p4, %p4674_p2 }
 0x5f0   : > { %p4677_p1 = pnand %p4676_p8, %p4670_p7 }
 0x5f2   : > { %4680 = shalt.err (!%p4677_p1)
}
 0x5f3   : > { %s4762_s26 = smov 128   ;;  %s4763_s22 = smov 8  }
 0x5f4   : > { %4120 = dma.vmem_to_hbm [thread:$0]  (%p4973_p10), %s6713_s6, 4096, %s6711_s4, %s3482_s9, %s4762_s26, %s4762_s26, %s4763_s22  }
 0x5f5 PF: > { %s7078_s19 = sld [smem:[#allocation22_spill]]  ;;  %s7079_s30 = sld [smem:[#allocation24_spill]] }
 0x5f6   : > { %p7081_p3 = scmp.ge.s32.totalorder %s4747_s16, 2 }
 0x5fb   : > { %s3512_s14 = sand.u32 1, %s7078_s19   ;;  %p7080_p13 = scmp.ne.s32.totalorder %s7079_s30, 0 }
 0x5fc   : > { %s3513_s20 = scalar_lea.sflag [#allocation9], %s3512_s14 }
 0x5fd   : > { %p4140_p5 = pnand %p7081_p3, %p7080_p13 }
 0x5ff   : > { %4722 = dma.done.wait (!%p4140_p5), %s3513_s20, 4096  }
 0x600   : > { %4724 = vsyncadd (!%p4140_p5), %s3513_s20, 4294963200  ;;  %s30_s16 = sadd.s32 1, %s4747_s16   ;;  %s7082_s11 = smov %s4731_s12 }
 0x601   : > { %p27_p11 = scmp.ge.s32.totalorder %s30_s16, 4   ;;  %s7083_s12 = smov %s4735_s13 }
 0x602   : > { %s7084_s13 = smov %s4988_s17  ;;  %s7085_s14 = smov %s4743_s15 }
 0x603   : > { %s7086_s15 = smov %s7088_s23  ;;  %29 = sbr.rel (!%p27_p11) target bundleno = 16 (0x10), region = 134 }
 0x60a   :  { %3518 = vsyncpa [#allocation8], 1 }
 0x60b   :  { %3520 = vsyncpa [#allocation8 + $0x1], 1 }
 0x60c   :  { %3521 = vsyncpa [#allocation11], 1 }
 0x60d   :  { %3523 = vsyncpa [#allocation11 + $0x1], 1 }
 0x60e   :  { %3524 = vsyncpa [#allocation14], 1 }
 0x60f   :  { %3525 = vsyncpa [#allocation9], 1 }
 0x610   :  { %3527 = vsyncpa [#allocation9 + $0x1], 1 }

</bundles_post_ra>
